<compile_context>
chip_gen: v7x
topology: tpu7x:2x2x1
jax: 0.10.0
libtpu: 0.0.40
codegen_flags: <defaults>
</compile_context>

<pallas_src>
import math

import numpy as np
import jax
import jax.numpy as jnp
from jax.experimental import pallas as pl
from jax.experimental.pallas import tpu as pltpu

# ------------------------------ config (small) ------------------------------
VOCAB = 50
PAD_IDX = 1
E = 32                 # embed_size == embed_output_dim == decoder_embed_dim
CONV_DIM = 32          # decoder_conv_dim
HEADS = 4              # decoder_attention_heads
D_HEAD = E // HEADS
KERNEL_SIZES = [3, 3]  # decoder_kernel_size_list, decoder_layers = 2
L = len(KERNEL_SIZES)
FFN = 64               # decoder_ffn_embed_dim
IMG_DIM = 2048         # hard-coded C in the module
ART_DIM = 48           # article_embed_size
INIT_SIZE = 128        # sinusoidal table size
NORMALIZE_BEFORE = True
FINAL_NORM = True
DECODER_GLU = True

B = 2
T = 8
S_IMG = 4
S_ART = 6

BT = B * T
LANES = 128
SCALE = float(D_HEAD) ** -0.5


def _round_up(x, m):
    return -(-x // m) * m


NK_IMG = _round_up(B * S_IMG, 8)    # padded key-row count (image)   = 8
NK_ART = _round_up(B * S_ART, 8)    # padded key-row count (article) = 16
HBS_IMG = HEADS * NK_IMG
HBS_ART = HEADS * NK_ART
PADROWS = 8                         # zero rows above y in the causal-shift scratch

_VMEM = pl.BlockSpec(memory_space=pltpu.MemorySpace.VMEM)


# ------------------------- static slab layouts (config-only) -----------------
def _build_layouts():
    woff, coff = {}, {}
    wr = cr = 0

    def walloc(name, rows):           # bf16 weight slab, 16-row (bf16 tile) aligned
        nonlocal wr
        wr = _round_up(wr, 16)
        woff[name] = wr
        wr += rows

    def calloc(name, rows):           # f32 const slab, 8-row (f32 tile) aligned
        nonlocal cr
        cr = _round_up(cr, 8)
        coff[name] = cr
        cr += rows

    walloc('art_kv_w', ART_DIM)
    for l in range(L):
        walloc(f'l{l}_lin1', E)
        walloc(f'l{l}_convw', CONV_DIM)
        walloc(f'l{l}_lin2', CONV_DIM)
        walloc(f'l{l}_wq', E)
        walloc(f'l{l}_img_wo', E)
        walloc(f'l{l}_art_wo', E)
        walloc(f'l{l}_ctx_fc', 2 * E)
        walloc(f'l{l}_fc1', E)
        walloc(f'l{l}_fc2', FFN)

    for n in ('img_kv_b', 'art_kv_b', 'final_g', 'final_b'):
        calloc(n, 1)
    for l in range(L):
        for n in ('lin1_b', 'convw_b', 'lin2_b', 'wq_b', 'img_bo', 'art_bo',
                  'ctx_b', 'fc1_b', 'fc2_b'):
            calloc(f'l{l}_{n}', 1)
        K = KERNEL_SIZES[l]
        calloc(f'l{l}_conv_A', HEADS * K)
        for k in range(K):
            calloc(f'l{l}_conv_S{k}', HEADS * K)
    calloc('hm_img', HBS_IMG)
    calloc('g_img', HBS_IMG)
    calloc('hm_art', HBS_ART)
    calloc('g_art', HBS_ART)
    calloc('avg_art', HBS_ART)
    return woff, _round_up(wr, 16), coff, _round_up(cr, 8)


WOFF, W_ROWS, COFF, C_ROWS = _build_layouts()
ROFF = {'x0': 0, 'imgb': BT, 'artb': 2 * BT, 'art': 3 * BT}
R_ROWS = 3 * BT + NK_ART


# ---------------------- constant matrices (numpy, packed once) ---------------
def _conv_consts(K):
    """A: per-head tap group-sum; S[k]: spread head-tap-k weight onto that head's channels."""
    HK = HEADS * K
    R = CONV_DIM // HEADS
    A = np.zeros((HK, HK), np.float32)
    S = [np.zeros((HK, CONV_DIM), np.float32) for _ in range(K)]
    for h in range(HEADS):
        A[h * K:(h + 1) * K, h * K:(h + 1) * K] = 1.0
        for k in range(K):
            S[k][h * K + k, h * R:(h + 1) * R] = 1.0
    return A, S


def _attn_consts(NK):
    """hm: 0/1 head mask for tiled K/V rows; g: per-(head,batch) softmax group-sum matrix."""
    HBS = HEADS * NK
    head_e = np.arange(E) // D_HEAD
    head_c = np.arange(HBS) // NK
    hm = (head_c[:, None] == head_e[None, :]).astype(np.float32)      # (HBS, E)
    b_c = (np.arange(HBS) % NK) % B                                    # key rows are (s*B + b)
    g = ((head_c[:, None] == head_c[None, :]) &
         (b_c[:, None] == b_c[None, :])).astype(np.float32)            # (HBS, HBS)
    return hm, g


def _avg_const():
    """Head-averaged attention weight extraction matrix for the article attention."""
    HBS = HEADS * NK_ART
    s_c = (np.arange(HBS) % NK_ART) // B
    avg = np.zeros((HBS, S_ART), np.float32)
    keep = s_c < S_ART
    avg[np.arange(HBS)[keep], s_c[keep]] = 1.0 / HEADS
    return avg


# ------------------------------ parameter packing ----------------------------
def _fold_ln(g, b, W, bias_v, scale=1.0):
    """Fold LayerNorm affine (g, b) of the *input* into the following Linear (W, bias)."""
    Wf = (g[:, None] * W) * scale
    bf = (b @ W + bias_v) * scale
    return Wf, bf


def pack_params(params):
    """Repack all parameters into 3 lane-dense slabs (done once, outside jit)."""
    pn = jax.tree_util.tree_map(lambda a: np.asarray(a, np.float32), params)
    wslab = np.zeros((W_ROWS, LANES), np.float32)
    cslab = np.zeros((C_ROWS, LANES), np.float32)

    def putw(name, M):
        r, c = M.shape
        wslab[WOFF[name]:WOFF[name] + r, :c] = M

    def putc(name, M):
        M = np.asarray(M, np.float32)
        if M.ndim == 1:
            M = M[None, :]
        r, c = M.shape
        cslab[COFF[name]:COFF[name] + r, :c] = M

    layers = pn['layers']
    img_kv_w = np.concatenate([layers[l]['img_attn'][k] for l in range(L)
                               for k in ('wk', 'wv')], axis=1)                 # (2048, 4E)
    putc('img_kv_b', np.concatenate([layers[l]['img_attn'][k] for l in range(L)
                                     for k in ('bk', 'bv')]))
    putw('art_kv_w', np.concatenate([layers[l]['art_attn'][k] for l in range(L)
                                     for k in ('wk', 'wv')], axis=1))          # (48, 4E)
    putc('art_kv_b', np.concatenate([layers[l]['art_attn'][k] for l in range(L)
                                     for k in ('bk', 'bv')]))
    putc('final_g', pn['final_ln_g'])
    putc('final_b', pn['final_ln_b'])

    for l, lp in enumerate(layers):
        K = KERNEL_SIZES[l]
        w, b = _fold_ln(lp['conv_ln_g'], lp['conv_ln_b'], lp['lin1_w'], lp['lin1_b'])
        putw(f'l{l}_lin1', w); putc(f'l{l}_lin1_b', b)
        putw(f'l{l}_convw', lp['convw_w']); putc(f'l{l}_convw_b', lp['convw_b'])
        putw(f'l{l}_lin2', lp['lin2_w']); putc(f'l{l}_lin2_b', lp['lin2_b'])
        # img/art LN + q-scale folded into the Q projections, fused into one (E, 2E) matmul
        wqi, bqi = _fold_ln(lp['img_ln_g'], lp['img_ln_b'],
                            lp['img_attn']['wq'], lp['img_attn']['bq'], SCALE)
        wqa, bqa = _fold_ln(lp['art_ln_g'], lp['art_ln_b'],
                            lp['art_attn']['wq'], lp['art_attn']['bq'], SCALE)
        putw(f'l{l}_wq', np.concatenate([wqi, wqa], axis=1))
        putc(f'l{l}_wq_b', np.concatenate([bqi, bqa]))
        putw(f'l{l}_img_wo', lp['img_attn']['wo']); putc(f'l{l}_img_bo', lp['img_attn']['bo'])
        putw(f'l{l}_art_wo', lp['art_attn']['wo']); putc(f'l{l}_art_bo', lp['art_attn']['bo'])
        putw(f'l{l}_ctx_fc', lp['ctx_fc_w']); putc(f'l{l}_ctx_b', lp['ctx_fc_b'])
        w, b = _fold_ln(lp['fin_ln_g'], lp['fin_ln_b'], lp['fc1_w'], lp['fc1_b'])
        putw(f'l{l}_fc1', w); putc(f'l{l}_fc1_b', b)
        putw(f'l{l}_fc2', lp['fc2_w']); putc(f'l{l}_fc2_b', lp['fc2_b'])
        A, Sk = _conv_consts(K)
        putc(f'l{l}_conv_A', A)
        for k in range(K):
            putc(f'l{l}_conv_S{k}', Sk[k])

    hm, g = _attn_consts(NK_IMG); putc('hm_img', hm); putc('g_img', g)
    hm, g = _attn_consts(NK_ART); putc('hm_art', hm); putc('g_art', g)
    putc('avg_art', _avg_const())

    return {
        'wslab': jnp.asarray(wslab, jnp.bfloat16),       # all small matmul weights (bf16)
        'img_kv_w': jnp.asarray(img_kv_w, jnp.bfloat16),  # dominant 2048-reduction weight
        'cslab': jnp.asarray(cslab, jnp.float32),        # biases + softmax constants
        'word_embed': params['word_embed'],
        'pos_table': params['pos_table'],
    }


# ------------------------------ fused decoder kernel -------------------------
def _decoder_kernel(wslab_ref, imgkv_ref, cslab_ref, rslab_ref, img_ref, out_ref, ybuf_ref):
    f32, bf16 = jnp.float32, jnp.bfloat16

    def ws(name, rows, cols):
        off = WOFF[name]
        return wslab_ref[off:off + rows, :cols]

    def cs(name, rows, cols):
        off = COFF[name]
        return cslab_ref[off:off + rows, :cols]

    def bias(name, cols):
        return cs(name, 1, cols)

    def mm(x, w):                                   # bf16 MXU matmul, f32 accumulation
        return jnp.dot(x.astype(bf16), w.astype(bf16), preferred_element_type=f32)

    def mm_nt(a, b):                                # a (m,k) . b (n,k)^T, bf16 operands
        return jax.lax.dot_general(a.astype(bf16), b.astype(bf16),
                                   (((1,), (1,)), ((), ())), preferred_element_type=f32)

    def mm_f32(a, b):                               # tiny exact matmuls (softmax helpers)
        return jnp.dot(a, b, preferred_element_type=f32)

    def normalize(x):                               # affine-free LN (affine folded host-side)
        mu = jnp.mean(x, axis=-1, keepdims=True)
        xc = x - mu
        var = jnp.mean(xc * xc, axis=-1, keepdims=True)
        return xc * jax.lax.rsqrt(var + 1e-5)

    # ---- context K/V for BOTH layers: single lane-dense (N = 4E = 128) matmuls ----
    img_kv = mm(img_ref[...], imgkv_ref[...]) + bias('img_kv_b', 4 * E)          # (NK_IMG, 4E)
    art_in = rslab_ref[ROFF['art']:ROFF['art'] + NK_ART, :ART_DIM]
    art_kv = mm(art_in, ws('art_kv_w', ART_DIM, 4 * E)) + bias('art_kv_b', 4 * E)  # (NK_ART, 4E)

    img_bias = rslab_ref[ROFF['imgb']:ROFF['imgb'] + BT, :HBS_IMG]   # additive (batch+keypad)
    art_bias = rslab_ref[ROFF['artb']:ROFF['artb'] + BT, :HBS_ART]

    def cross_attn(q, kv, kv_off, abias, NK, hm_name, g_name, wo_name, bo_name, want_attn):
        """All heads & batches of one cross-attention in 3 matmuls (+1 for avg weights)."""
        HBS = HEADS * NK
        k_all = kv[:, kv_off:kv_off + E]                              # (NK, E) rows = s*B+b
        v_all = kv[:, kv_off + E:kv_off + 2 * E]
        hm = cs(hm_name, HBS, E)                                      # 0/1 head mask
        k_rows = jnp.concatenate([k_all] * HEADS, axis=0) * hm        # (HBS, E)
        v_rows = jnp.concatenate([v_all] * HEADS, axis=0) * hm
        s = mm_nt(q, k_rows) + abias                                  # (BT, HBS)
        s = s - jnp.max(s, axis=-1, keepdims=True)                    # row-global max (cancels)
        es = jnp.exp(s)
        den = mm_f32(es, cs(g_name, HBS, HBS))                        # per-(head,batch) sums
        p = es * pl.reciprocal(den + 1e-20, approx=True)              # EUP reciprocal
        ctx = mm(p, v_rows)                                           # heads land in own lanes
        o = mm(ctx, ws(wo_name, E, E)) + bias(bo_name, E)
        a = mm_f32(p, cs('avg_art', HBS, S_ART)) if want_attn else None
        return o, a

    # row position within each sequence (rows are batch-major: r = b*T + t)
    row_t = jax.lax.broadcasted_iota(jnp.int32, (BT, CONV_DIM), 0) % T

    # zero the causal-shift pad rows once
    ybuf_ref[0:PADROWS, :] = jnp.zeros((PADROWS, CONV_DIM), f32)

    x = rslab_ref[ROFF['x0']:ROFF['x0'] + BT, :E]                     # (BT, E)
    attn = None
    inners = []

    for li in range(L):
        K = KERNEL_SIZES[li]
        HK = HEADS * K

        # ---- dyn-conv block: LN(folded) -> GLU linear -> causal dynamic conv -> linear ----
        res = x
        y = mm(normalize(x), ws(f'l{li}_lin1', E, 2 * CONV_DIM)) + bias(f'l{li}_lin1_b', 2 * CONV_DIM)
        y = y[:, :CONV_DIM] * jax.nn.sigmoid(y[:, CONV_DIM:2 * CONV_DIM])       # GLU
        wl = mm(y, ws(f'l{li}_convw', CONV_DIM, HK)) + bias(f'l{li}_convw_b', HK)
        ew = jnp.exp(wl - jnp.max(wl, axis=-1, keepdims=True))                   # stable tap softmax
        den = mm_f32(ew, cs(f'l{li}_conv_A', HK, HK))
        pw = ew * pl.reciprocal(den + 1e-20, approx=True)
        ybuf_ref[PADROWS:PADROWS + BT, :] = y                                    # shift staging (VMEM)
        conv = jnp.zeros((BT, CONV_DIM), f32)
        for k in range(K):
            d = K - 1 - k                                                        # causal lag (padding_l=K-1)
            wb = mm_f32(pw, cs(f'l{li}_conv_S{k}', HK, CONV_DIM))                # spread tap weight
            if d == 0:
                xl = y
            else:                                                                # shifted load, off the MXU
                xl = ybuf_ref[PADROWS - d:PADROWS - d + BT, :]
                xl = jnp.where(row_t >= d, xl, 0.0)                              # respect batch boundary
            conv = conv + wb * xl
        x = res + mm(conv, ws(f'l{li}_lin2', CONV_DIM, E)) + bias(f'l{li}_lin2_b', E)

        # ---- image / article cross-attention (shared residual, shared normalized x) ----
        res = x
        q2 = mm(normalize(x), ws(f'l{li}_wq', E, 2 * E)) + bias(f'l{li}_wq_b', 2 * E)
        o_img, _ = cross_attn(q2[:, :E], img_kv, li * 2 * E, img_bias, NK_IMG,
                              'hm_img', 'g_img', f'l{li}_img_wo', f'l{li}_img_bo', False)
        o_art, a = cross_attn(q2[:, E:2 * E], art_kv, li * 2 * E, art_bias, NK_ART,
                              'hm_art', 'g_art', f'l{li}_art_wo', f'l{li}_art_bo', li == L - 1)
        if a is not None:
            attn = a
        x_img = res + o_img
        x_art = res + o_art

        # ---- fuse contexts + FFN (LN folded into fc1) ----
        x = mm(jnp.concatenate([x_img, x_art], axis=1), ws(f'l{li}_ctx_fc', 2 * E, E)) \
            + bias(f'l{li}_ctx_b', E)
        res = x
        h = jnp.maximum(mm(normalize(x), ws(f'l{li}_fc1', E, FFN)) + bias(f'l{li}_fc1_b', FFN), 0.0)
        x = res + mm(h, ws(f'l{li}_fc2', FFN, E)) + bias(f'l{li}_fc2_b', E)
        inners.append(x)

    if NORMALIZE_BEFORE and FINAL_NORM:
        x = normalize(x) * cs('final_g', 1, E) + cs('final_b', 1, E)

    # ---- single lane-dense (48, 128) f32 store: [final | attn | pad] + inner states ----
    top = jnp.concatenate([x, attn, jnp.zeros((BT, LANES - E - S_ART), f32)], axis=1)
    body = [jnp.concatenate([xi, jnp.zeros((BT, LANES - E), f32)], axis=1) for xi in inners]
    out_ref[...] = jnp.concatenate([top] + body, axis=0)


# ------------------------------ decoder forward ------------------------------
def sinusoidal_embedding(num_embeddings, embedding_dim, padding_idx):
    half_dim = embedding_dim // 2
    emb = math.log(10000) / (half_dim - 1)
    emb = jnp.exp(jnp.arange(half_dim, dtype=jnp.float32) * -emb)
    emb = jnp.arange(num_embeddings, dtype=jnp.float32)[:, None] * emb[None, :]
    emb = jnp.concatenate([jnp.sin(emb), jnp.cos(emb)], axis=1)
    if embedding_dim % 2 == 1:
        emb = jnp.concatenate([emb, jnp.zeros((num_embeddings, 1), jnp.float32)], axis=1)
    return emb.at[padding_idx].set(0.0)


def make_positions(tokens, padding_idx):
    mask = (tokens != padding_idx).astype(jnp.int32)
    return jnp.cumsum(mask, axis=1) * mask + padding_idx


def _attn_bias(key_mask, S, NK):
    """Combined additive mask: batch mismatch + key padding + (article) length padding.
    Column convention matches the (S, B, D)->(S*B, D) key row ordering (j = s*B + b)."""
    S_pad = NK // B
    km = key_mask.astype(jnp.float32)
    if S_pad > S:
        km = jnp.concatenate([km, jnp.ones((B, S_pad - S), jnp.float32)], axis=1)
    km_cols = jnp.transpose(km).reshape(1, NK)
    col_b = (jnp.arange(NK) % B)[None, :]
    row_b = (jnp.arange(BT) // T)[:, None]
    neq = (row_b != col_b).astype(jnp.float32)
    bias = jnp.float32(-1e30) * jnp.maximum(neq, km_cols)            # (BT, NK)
    return jnp.tile(bias, (1, HEADS))                                 # (BT, HEADS*NK)


def decoder_forward(packed, prev_target, image, image_mask, article, article_mask):
    # ---- token + positional embedding (gathers stay in XLA); dropout = identity (eval) ----
    X_word = jnp.take(packed['word_embed'], prev_target, axis=0)      # (B, T, E)
    pos = make_positions(prev_target, PAD_IDX)
    X_pos = jnp.take(packed['pos_table'], pos, axis=0)
    X0 = X_word + X_pos
    x0 = X0.reshape(BT, E)                                            # rows: b*T + t

    # image/article fed in their native (S, B, D) layout -> free reshape, no XLA transpose
    img2d = image.reshape(S_IMG * B, IMG_DIM).astype(jnp.bfloat16)    # rows: s*B + b
    art2d = article.reshape(S_ART * B, ART_DIM)

    img_bias = _attn_bias(image_mask, S_IMG, NK_IMG)
    art_bias = _attn_bias(article_mask, S_ART, NK_ART)

    def padded(a, rows):
        return jnp.pad(a, ((0, rows - a.shape[0]), (0, LANES - a.shape[1])))

    rslab = jnp.concatenate([padded(x0, BT), padded(img_bias, BT),
                             padded(art_bias, BT), padded(art2d, NK_ART)], axis=0)

    out = pl.pallas_call(
        _decoder_kernel,
        out_shape=jax.ShapeDtypeStruct(((L + 1) * BT, LANES), jnp.float32),
        in_specs=[_VMEM] * 5,
        out_specs=_VMEM,
        scratch_shapes=[pltpu.VMEM((PADROWS + BT, CONV_DIM), jnp.float32)],
    )(packed['wslab'], packed['img_kv_w'], packed['cslab'], rslab, img2d)

    X = out[:BT, :E].reshape(B, T, E)
    attn = out[:BT, E:E + S_ART].reshape(B, T, S_ART)
    inner_states = [jnp.transpose(X0, (1, 0, 2))]                     # (T, B, E), module layout
    for li in range(L):
        xi = out[(1 + li) * BT:(2 + li) * BT, :E].reshape(B, T, E)
        inner_states.append(jnp.transpose(xi, (1, 0, 2)))
    return X, {"attn": attn, "inner_states": inner_states}


# ------------------------------ parameters ----------------------------------
def init_params(key):
    keys = iter(jax.random.split(key, 512))

    def nrm(shape, scale=0.05):
        return scale * jax.random.normal(next(keys), shape, dtype=jnp.float32)

    zeros = lambda s: jnp.zeros(s, jnp.float32)
    ones = lambda s: jnp.ones(s, jnp.float32)

    def attn_params(kdim):
        return {"wq": nrm((E, E)), "bq": zeros((E,)),
                "wk": nrm((kdim, E)), "bk": zeros((E,)),
                "wv": nrm((kdim, E)), "bv": zeros((E,)),
                "wo": nrm((E, E)), "bo": zeros((E,))}

    params = {
        "word_embed": nrm((VOCAB, E), 0.1).at[PAD_IDX].set(0.0),
        "pos_table": sinusoidal_embedding(INIT_SIZE, E, PAD_IDX),
        "final_ln_g": ones((E,)), "final_ln_b": zeros((E,)),
        "layers": [],
    }

    lin1_out = 2 * CONV_DIM if DECODER_GLU else CONV_DIM
    for ks in KERNEL_SIZES:
        params["layers"].append({
            "conv_ln_g": ones((E,)), "conv_ln_b": zeros((E,)),
            "lin1_w": nrm((E, lin1_out)), "lin1_b": zeros((lin1_out,)),
            "convw_w": nrm((CONV_DIM, HEADS * ks)), "convw_b": zeros((HEADS * ks,)),
            "lin2_w": nrm((CONV_DIM, E)), "lin2_b": zeros((E,)),
            "img_ln_g": ones((E,)), "img_ln_b": zeros((E,)),
            "art_ln_g": ones((E,)), "art_ln_b": zeros((E,)),
            "img_attn": attn_params(IMG_DIM),
            "art_attn": attn_params(ART_DIM),
            "ctx_fc_w": nrm((2 * E, E)), "ctx_fc_b": zeros((E,)),
            "fc1_w": nrm((E, FFN)), "fc1_b": zeros((FFN,)),
            "fc2_w": nrm((FFN, E)), "fc2_b": zeros((E,)),
            "fin_ln_g": ones((E,)), "fin_ln_b": zeros((E,)),
        })
    return params


# ------------------------------ main -----------------------------------------
if __name__ == "__main__":
    key = jax.random.PRNGKey(0)
    kp, kt, ki, ka = jax.random.split(key, 4)

    params = init_params(kp)
    packed = pack_params(params)                                       # one-time host packing

    prev_target = jax.random.randint(kt, (B, T), 2, VOCAB)                 # (B, T) token ids
    image = 0.1 * jax.random.normal(ki, (S_IMG, B, IMG_DIM), jnp.float32)  # (S_img, B, 2048)
    article = 0.1 * jax.random.normal(ka, (S_ART, B, ART_DIM), jnp.float32)
    image_mask = jnp.zeros((B, S_IMG), jnp.float32).at[1, -1].set(1.0)     # 1.0 = padded key
    article_mask = jnp.zeros((B, S_ART), jnp.float32).at[1, -2:].set(1.0)

    fwd = jax.jit(decoder_forward)
    X, extras = fwd(packed, prev_target, image, image_mask, article, article_mask)
    jax.block_until_ready(X)

    assert X.shape == (B, T, E), X.shape
    assert extras["attn"].shape == (B, T, S_ART), extras["attn"].shape
    assert len(extras["inner_states"]) == L + 1
    assert not bool(jnp.any(jnp.isnan(X)))
    print("KERNEL_OK")
</pallas_src>

<mosaic_0001>
module attributes {stable_mosaic.version = 11 : i64} {
  func.func @_decoder_kernel(%arg0: memref<752x128xbf16, #tpu.memory_space<vmem>>, %arg1: memref<2048x128xbf16, #tpu.memory_space<vmem>>, %arg2: memref<560x128xf32, #tpu.memory_space<vmem>>, %arg3: memref<64x128xf32, #tpu.memory_space<vmem>>, %arg4: memref<8x2048xbf16, #tpu.memory_space<vmem>>, %arg5: memref<48x128xf32, #tpu.memory_space<vmem>>, %arg6: memref<24x32xf32, #tpu.memory_space<vmem>>) attributes {dimension_semantics = [], scalar_prefetch = 0 : i64, scratch_operands = 1 : i64, tpu.core_type = #tpu.core_type<tc>} {
    %c0 = arith.constant 0 : index
    %c0_0 = arith.constant 0 : index
    %0 = vector.load %arg4[%c0, %c0_0] : memref<8x2048xbf16, #tpu.memory_space<vmem>>, vector<8x2048xbf16>
    %c0_1 = arith.constant 0 : index
    %c0_2 = arith.constant 0 : index
    %1 = vector.load %arg1[%c0_1, %c0_2] : memref<2048x128xbf16, #tpu.memory_space<vmem>>, vector<2048x128xbf16>
    %cst = arith.constant dense<0.000000e+00> : vector<8x128xf32>
    %2 = tpu.matmul %0, %1, %cst {dimension_numbers = #tpu.dot_dimension_numbers<[1], [0], [0], [1], [0, 0, 1, 1], [], []>} : vector<8x2048xbf16>, vector<2048x128xbf16>, vector<8x128xf32> -> vector<8x128xf32>
    %c0_3 = arith.constant 0 : index
    %c0_4 = arith.constant 0 : index
    %3 = vector.load %arg2[%c0_3, %c0_4] : memref<560x128xf32, #tpu.memory_space<vmem>>, vector<1x128xf32>
    %4 = vector.broadcast %3 : vector<1x128xf32> to vector<8x128xf32>
    %5 = arith.addf %2, %4 : vector<8x128xf32>
    %c48 = arith.constant 48 : index
    %c0_5 = arith.constant 0 : index
    %6 = vector.load %arg3[%c48, %c0_5] : memref<64x128xf32, #tpu.memory_space<vmem>>, vector<16x48xf32>
    %c0_6 = arith.constant 0 : index
    %c0_7 = arith.constant 0 : index
    %7 = vector.load %arg0[%c0_6, %c0_7] : memref<752x128xbf16, #tpu.memory_space<vmem>>, vector<48x128xbf16>
    %8 = arith.truncf %6 : vector<16x48xf32> to vector<16x48xbf16>
    %cst_8 = arith.constant dense<0.000000e+00> : vector<16x128xf32>
    %9 = tpu.matmul %8, %7, %cst_8 {dimension_numbers = #tpu.dot_dimension_numbers<[1], [0], [0], [1], [0, 0, 1, 1], [], []>} : vector<16x48xbf16>, vector<48x128xbf16>, vector<16x128xf32> -> vector<16x128xf32>
    %c8 = arith.constant 8 : index
    %c0_9 = arith.constant 0 : index
    %10 = vector.load %arg2[%c8, %c0_9] : memref<560x128xf32, #tpu.memory_space<vmem>>, vector<1x128xf32>
    %11 = vector.broadcast %10 : vector<1x128xf32> to vector<16x128xf32>
    %12 = arith.addf %9, %11 : vector<16x128xf32>
    %c16 = arith.constant 16 : index
    %c0_10 = arith.constant 0 : index
    %13 = vector.load %arg3[%c16, %c0_10] : memref<64x128xf32, #tpu.memory_space<vmem>>, vector<16x32xf32>
    %c32 = arith.constant 32 : index
    %c0_11 = arith.constant 0 : index
    %14 = vector.load %arg3[%c32, %c0_11] : memref<64x128xf32, #tpu.memory_space<vmem>>, vector<16x64xf32>
    %15 = tpu.iota {dimensions = array<i32: 0>} : vector<16x32xi32>
    %c8_i32 = arith.constant 8 : i32
    %c0_i32 = arith.constant 0 : i32
    %16 = arith.cmpi eq, %c8_i32, %c0_i32 : i32
    %c1_i32 = arith.constant 1 : i32
    %17 = arith.select %16, %c1_i32, %c8_i32 : i32
    %18 = vector.broadcast %17 : i32 to vector<16x32xi32>
    %19 = arith.remsi %15, %18 : vector<16x32xi32>
    %c0_i32_12 = arith.constant 0 : i32
    %20 = vector.broadcast %c0_i32_12 : i32 to vector<16x32xi32>
    %21 = arith.cmpi ne, %19, %20 : vector<16x32xi32>
    %c0_i32_13 = arith.constant 0 : i32
    %22 = vector.broadcast %c0_i32_13 : i32 to vector<16x32xi32>
    %23 = arith.cmpi slt, %19, %22 : vector<16x32xi32>
    %c0_i32_14 = arith.constant 0 : i32
    %24 = arith.cmpi slt, %17, %c0_i32_14 : i32
    %25 = vector.broadcast %24 : i1 to vector<16x32xi1>
    %26 = vector.broadcast %25 : vector<16x32xi1> to vector<16x32xi1>
    %27 = arith.xori %23, %26 : vector<16x32xi1>
    %28 = arith.andi %27, %21 : vector<16x32xi1>
    %29 = vector.broadcast %17 : i32 to vector<16x32xi32>
    %30 = arith.addi %19, %29 : vector<16x32xi32>
    %31 = arith.select %28, %30, %19 : vector<16x32xi1>, vector<16x32xi32>
    %cst_15 = arith.constant 0.000000e+00 : f32
    %32 = vector.broadcast %cst_15 : f32 to vector<8x32xf32>
    %c0_16 = arith.constant 0 : index
    %c0_17 = arith.constant 0 : index
    %33 = vector.load %arg6[%c0_16, %c0_17] : memref<24x32xf32, #tpu.memory_space<vmem>>, vector<8x32xf32>
    tpu.vector_store %arg6[%c0_16, %c0_17], %32 {strides = array<i32>} : memref<24x32xf32, #tpu.memory_space<vmem>>, vector<8x32xf32>,
    %c0_18 = arith.constant 0 : index
    %c0_19 = arith.constant 0 : index
    %34 = vector.load %arg3[%c0_18, %c0_19] : memref<64x128xf32, #tpu.memory_space<vmem>>, vector<16x32xf32>
    %cst_20 = arith.constant dense<0.000000e+00> : vector<16xf32>
    %35 = vector.multi_reduction <add>, %34, %cst_20 [1] : vector<16x32xf32> to vector<16xf32>
    %36 = vector.shape_cast %35 : vector<16xf32> to vector<16x1xf32>
    %cst_21 = arith.constant 3.200000e+01 : f32
    %37 = vector.broadcast %cst_21 : f32 to vector<16x1xf32>
    %38 = arith.divf %36, %37 : vector<16x1xf32>
    %39 = vector.broadcast %38 : vector<16x1xf32> to vector<16x32xf32>
    %40 = arith.subf %34, %39 : vector<16x32xf32>
    %41 = arith.mulf %40, %40 : vector<16x32xf32>
    %cst_22 = arith.constant dense<0.000000e+00> : vector<16xf32>
    %42 = vector.multi_reduction <add>, %41, %cst_22 [1] : vector<16x32xf32> to vector<16xf32>
    %43 = vector.shape_cast %42 : vector<16xf32> to vector<16x1xf32>
    %cst_23 = arith.constant 3.200000e+01 : f32
    %44 = vector.broadcast %cst_23 : f32 to vector<16x1xf32>
    %45 = arith.divf %43, %44 : vector<16x1xf32>
    %cst_24 = arith.constant 9.99999974E-6 : f32
    %46 = vector.broadcast %cst_24 : f32 to vector<16x1xf32>
    %47 = arith.addf %45, %46 : vector<16x1xf32>
    %48 = math.rsqrt %47 : vector<16x1xf32>
    %49 = vector.broadcast %48 : vector<16x1xf32> to vector<16x32xf32>
    %50 = arith.mulf %40, %49 : vector<16x32xf32>
    %c48_25 = arith.constant 48 : index
    %c0_26 = arith.constant 0 : index
    %51 = vector.load %arg0[%c48_25, %c0_26] : memref<752x128xbf16, #tpu.memory_space<vmem>>, vector<32x64xbf16>
    %52 = arith.truncf %50 : vector<16x32xf32> to vector<16x32xbf16>
    %cst_27 = arith.constant dense<0.000000e+00> : vector<16x64xf32>
    %53 = tpu.matmul %52, %51, %cst_27 {dimension_numbers = #tpu.dot_dimension_numbers<[1], [0], [0], [1], [0, 0, 1, 1], [], []>} : vector<16x32xbf16>, vector<32x64xbf16>, vector<16x64xf32> -> vector<16x64xf32>
    %c32_28 = arith.constant 32 : index
    %c0_29 = arith.constant 0 : index
    %54 = vector.load %arg2[%c32_28, %c0_29] : memref<560x128xf32, #tpu.memory_space<vmem>>, vector<1x64xf32>
    %55 = vector.broadcast %54 : vector<1x64xf32> to vector<16x64xf32>
    %56 = arith.addf %53, %55 : vector<16x64xf32>
    %57 = vector.extract_strided_slice %56 {offsets = [0, 0], sizes = [16, 32], strides = [1, 1]} : vector<16x64xf32> to vector<16x32xf32>
    %58 = vector.extract_strided_slice %56 {offsets = [0, 32], sizes = [16, 32], strides = [1, 1]} : vector<16x64xf32> to vector<16x32xf32>
    %59 = arith.negf %58 : vector<16x32xf32>
    %60 = math.exp %59 : vector<16x32xf32>
    %cst_30 = arith.constant 1.000000e+00 : f32
    %61 = vector.broadcast %cst_30 : f32 to vector<16x32xf32>
    %62 = arith.addf %61, %60 : vector<16x32xf32>
    %63 = arith.divf %61, %62 : vector<16x32xf32>
    %64 = arith.mulf %57, %63 : vector<16x32xf32>
    %c80 = arith.constant 80 : index
    %c0_31 = arith.constant 0 : index
    %65 = vector.load %arg0[%c80, %c0_31] : memref<752x128xbf16, #tpu.memory_space<vmem>>, vector<32x12xbf16>
    %66 = arith.truncf %64 : vector<16x32xf32> to vector<16x32xbf16>
    %cst_32 = arith.constant dense<0.000000e+00> : vector<16x12xf32>
    %67 = tpu.matmul %66, %65, %cst_32 {dimension_numbers = #tpu.dot_dimension_numbers<[1], [0], [0], [1], [0, 0, 1, 1], [], []>} : vector<16x32xbf16>, vector<32x12xbf16>, vector<16x12xf32> -> vector<16x12xf32>
    %c40 = arith.constant 40 : index
    %c0_33 = arith.constant 0 : index
    %68 = vector.load %arg2[%c40, %c0_33] : memref<560x128xf32, #tpu.memory_space<vmem>>, vector<1x12xf32>
    %69 = vector.broadcast %68 : vector<1x12xf32> to vector<16x12xf32>
    %70 = arith.addf %67, %69 : vector<16x12xf32>
    %cst_34 = arith.constant dense<0xFF800000> : vector<16xf32>
    %71 = vector.multi_reduction <maximumf>, %70, %cst_34 [1] : vector<16x12xf32> to vector<16xf32>
    %72 = vector.shape_cast %71 : vector<16xf32> to vector<16x1xf32>
    %73 = vector.broadcast %72 : vector<16x1xf32> to vector<16x12xf32>
    %74 = arith.subf %70, %73 : vector<16x12xf32>
    %75 = math.exp %74 : vector<16x12xf32>
    %c104 = arith.constant 104 : index
    %c0_35 = arith.constant 0 : index
    %76 = vector.load %arg2[%c104, %c0_35] : memref<560x128xf32, #tpu.memory_space<vmem>>, vector<12x12xf32>
    %cst_36 = arith.constant dense<0.000000e+00> : vector<16x12xf32>
    %77 = tpu.matmul %75, %76, %cst_36 {dimension_numbers = #tpu.dot_dimension_numbers<[1], [0], [0], [1], [0, 0, 1, 1], [], []>} : vector<16x12xf32>, vector<12x12xf32>, vector<16x12xf32> -> vector<16x12xf32>
    %cst_37 = arith.constant 9.99999968E-21 : f32
    %78 = vector.broadcast %cst_37 : f32 to vector<16x12xf32>
    %79 = arith.addf %77, %78 : vector<16x12xf32>
    %80 = tpu.reciprocal %79 {approx = true} : vector<16x12xf32> -> vector<16x12xf32>
    %81 = arith.mulf %75, %80 : vector<16x12xf32>
    %c8_38 = arith.constant 8 : index
    %c0_39 = arith.constant 0 : index
    %82 = vector.load %arg6[%c8_38, %c0_39] : memref<24x32xf32, #tpu.memory_space<vmem>>, vector<16x32xf32>
    tpu.vector_store %arg6[%c8_38, %c0_39], %64 {strides = array<i32>} : memref<24x32xf32, #tpu.memory_space<vmem>>, vector<16x32xf32>,
    %cst_40 = arith.constant 0.000000e+00 : f32
    %83 = vector.broadcast %cst_40 : f32 to vector<16x32xf32>
    %c120 = arith.constant 120 : index
    %c0_41 = arith.constant 0 : index
    %84 = vector.load %arg2[%c120, %c0_41] : memref<560x128xf32, #tpu.memory_space<vmem>>, vector<12x32xf32>
    %cst_42 = arith.constant dense<0.000000e+00> : vector<16x32xf32>
    %85 = tpu.matmul %81, %84, %cst_42 {dimension_numbers = #tpu.dot_dimension_numbers<[1], [0], [0], [1], [0, 0, 1, 1], [], []>} : vector<16x12xf32>, vector<12x32xf32>, vector<16x32xf32> -> vector<16x32xf32>
    %c6 = arith.constant 6 : index
    %c0_43 = arith.constant 0 : index
    %86 = vector.load %arg6[%c6, %c0_43] : memref<24x32xf32, #tpu.memory_space<vmem>>, vector<16x32xf32>
    %c2_i32 = arith.constant 2 : i32
    %87 = vector.broadcast %c2_i32 : i32 to vector<16x32xi32>
    %88 = arith.cmpi sge, %31, %87 : vector<16x32xi32>
    %cst_44 = arith.constant 0.000000e+00 : f32
    %89 = vector.broadcast %cst_44 : f32 to vector<16x32xf32>
    %90 = arith.select %88, %86, %89 : vector<16x32xi1>, vector<16x32xf32>
    %91 = arith.mulf %85, %90 : vector<16x32xf32>
    %92 = arith.addf %83, %91 : vector<16x32xf32>
    %c136 = arith.constant 136 : index
    %c0_45 = arith.constant 0 : index
    %93 = vector.load %arg2[%c136, %c0_45] : memref<560x128xf32, #tpu.memory_space<vmem>>, vector<12x32xf32>
    %cst_46 = arith.constant dense<0.000000e+00> : vector<16x32xf32>
    %94 = tpu.matmul %81, %93, %cst_46 {dimension_numbers = #tpu.dot_dimension_numbers<[1], [0], [0], [1], [0, 0, 1, 1], [], []>} : vector<16x12xf32>, vector<12x32xf32>, vector<16x32xf32> -> vector<16x32xf32>
    %c7 = arith.constant 7 : index
    %c0_47 = arith.constant 0 : index
    %95 = vector.load %arg6[%c7, %c0_47] : memref<24x32xf32, #tpu.memory_space<vmem>>, vector<16x32xf32>
    %c1_i32_48 = arith.constant 1 : i32
    %96 = vector.broadcast %c1_i32_48 : i32 to vector<16x32xi32>
    %97 = arith.cmpi sge, %31, %96 : vector<16x32xi32>
    %cst_49 = arith.constant 0.000000e+00 : f32
    %98 = vector.broadcast %cst_49 : f32 to vector<16x32xf32>
    %99 = arith.select %97, %95, %98 : vector<16x32xi1>, vector<16x32xf32>
    %100 = arith.mulf %94, %99 : vector<16x32xf32>
    %101 = arith.addf %92, %100 : vector<16x32xf32>
    %c152 = arith.constant 152 : index
    %c0_50 = arith.constant 0 : index
    %102 = vector.load %arg2[%c152, %c0_50] : memref<560x128xf32, #tpu.memory_space<vmem>>, vector<12x32xf32>
    %cst_51 = arith.constant dense<0.000000e+00> : vector<16x32xf32>
    %103 = tpu.matmul %81, %102, %cst_51 {dimension_numbers = #tpu.dot_dimension_numbers<[1], [0], [0], [1], [0, 0, 1, 1], [], []>} : vector<16x12xf32>, vector<12x32xf32>, vector<16x32xf32> -> vector<16x32xf32>
    %104 = arith.mulf %103, %64 : vector<16x32xf32>
    %105 = arith.addf %101, %104 : vector<16x32xf32>
    %c112 = arith.constant 112 : index
    %c0_52 = arith.constant 0 : index
    %106 = vector.load %arg0[%c112, %c0_52] : memref<752x128xbf16, #tpu.memory_space<vmem>>, vector<32x32xbf16>
    %107 = arith.truncf %105 : vector<16x32xf32> to vector<16x32xbf16>
    %cst_53 = arith.constant dense<0.000000e+00> : vector<16x32xf32>
    %108 = tpu.matmul %107, %106, %cst_53 {dimension_numbers = #tpu.dot_dimension_numbers<[1], [0], [0], [1], [0, 0, 1, 1], [], []>} : vector<16x32xbf16>, vector<32x32xbf16>, vector<16x32xf32> -> vector<16x32xf32>
    %109 = arith.addf %34, %108 : vector<16x32xf32>
    %c48_54 = arith.constant 48 : index
    %c0_55 = arith.constant 0 : index
    %110 = vector.load %arg2[%c48_54, %c0_55] : memref<560x128xf32, #tpu.memory_space<vmem>>, vector<1x32xf32>
    %111 = vector.broadcast %110 : vector<1x32xf32> to vector<16x32xf32>
    %112 = arith.addf %109, %111 : vector<16x32xf32>
    %cst_56 = arith.constant dense<0.000000e+00> : vector<16xf32>
    %113 = vector.multi_reduction <add>, %112, %cst_56 [1] : vector<16x32xf32> to vector<16xf32>
    %114 = vector.shape_cast %113 : vector<16xf32> to vector<16x1xf32>
    %cst_57 = arith.constant 3.200000e+01 : f32
    %115 = vector.broadcast %cst_57 : f32 to vector<16x1xf32>
    %116 = arith.divf %114, %115 : vector<16x1xf32>
    %117 = vector.broadcast %116 : vector<16x1xf32> to vector<16x32xf32>
    %118 = arith.subf %112, %117 : vector<16x32xf32>
    %119 = arith.mulf %118, %118 : vector<16x32xf32>
    %cst_58 = arith.constant dense<0.000000e+00> : vector<16xf32>
    %120 = vector.multi_reduction <add>, %119, %cst_58 [1] : vector<16x32xf32> to vector<16xf32>
    %121 = vector.shape_cast %120 : vector<16xf32> to vector<16x1xf32>
    %cst_59 = arith.constant 3.200000e+01 : f32
    %122 = vector.broadcast %cst_59 : f32 to vector<16x1xf32>
    %123 = arith.divf %121, %122 : vector<16x1xf32>
    %cst_60 = arith.constant 9.99999974E-6 : f32
    %124 = vector.broadcast %cst_60 : f32 to vector<16x1xf32>
    %125 = arith.addf %123, %124 : vector<16x1xf32>
    %126 = math.rsqrt %125 : vector<16x1xf32>
    %127 = vector.broadcast %126 : vector<16x1xf32> to vector<16x32xf32>
    %128 = arith.mulf %118, %127 : vector<16x32xf32>
    %c144 = arith.constant 144 : index
    %c0_61 = arith.constant 0 : index
    %129 = vector.load %arg0[%c144, %c0_61] : memref<752x128xbf16, #tpu.memory_space<vmem>>, vector<32x64xbf16>
    %130 = arith.truncf %128 : vector<16x32xf32> to vector<16x32xbf16>
    %cst_62 = arith.constant dense<0.000000e+00> : vector<16x64xf32>
    %131 = tpu.matmul %130, %129, %cst_62 {dimension_numbers = #tpu.dot_dimension_numbers<[1], [0], [0], [1], [0, 0, 1, 1], [], []>} : vector<16x32xbf16>, vector<32x64xbf16>, vector<16x64xf32> -> vector<16x64xf32>
    %c56 = arith.constant 56 : index
    %c0_63 = arith.constant 0 : index
    %132 = vector.load %arg2[%c56, %c0_63] : memref<560x128xf32, #tpu.memory_space<vmem>>, vector<1x64xf32>
    %133 = vector.broadcast %132 : vector<1x64xf32> to vector<16x64xf32>
    %134 = arith.addf %131, %133 : vector<16x64xf32>
    %135 = vector.extract_strided_slice %134 {offsets = [0, 0], sizes = [16, 32], strides = [1, 1]} : vector<16x64xf32> to vector<16x32xf32>
    %136 = vector.extract_strided_slice %5 {offsets = [0, 0], sizes = [8, 32], strides = [1, 1]} : vector<8x128xf32> to vector<8x32xf32>
    %137 = vector.extract_strided_slice %5 {offsets = [0, 32], sizes = [8, 32], strides = [1, 1]} : vector<8x128xf32> to vector<8x32xf32>
    %c304 = arith.constant 304 : index
    %c0_64 = arith.constant 0 : index
    %138 = vector.load %arg2[%c304, %c0_64] : memref<560x128xf32, #tpu.memory_space<vmem>>, vector<32x32xf32>
    %139 = tpu.concatenate %136, %136, %136, %136 in 0 : vector<8x32xf32>, vector<8x32xf32>, vector<8x32xf32>, vector<8x32xf32> -> vector<32x32xf32>
    %140 = arith.mulf %139, %138 : vector<32x32xf32>
    %141 = tpu.concatenate %137, %137, %137, %137 in 0 : vector<8x32xf32>, vector<8x32xf32>, vector<8x32xf32>, vector<8x32xf32> -> vector<32x32xf32>
    %142 = arith.mulf %141, %138 : vector<32x32xf32>
    %143 = arith.truncf %135 : vector<16x32xf32> to vector<16x32xbf16>
    %144 = arith.truncf %140 : vector<32x32xf32> to vector<32x32xbf16>
    %cst_65 = arith.constant dense<0.000000e+00> : vector<16x32xf32>
    %145 = tpu.matmul %143, %144, %cst_65 {dimension_numbers = #tpu.dot_dimension_numbers<[1], [1], [0], [0], [0, 0, 1, 0], [], []>} : vector<16x32xbf16>, vector<32x32xbf16>, vector<16x32xf32> -> vector<16x32xf32>
    %146 = arith.addf %145, %13 : vector<16x32xf32>
    %cst_66 = arith.constant dense<0xFF800000> : vector<16xf32>
    %147 = vector.multi_reduction <maximumf>, %146, %cst_66 [1] : vector<16x32xf32> to vector<16xf32>
    %148 = vector.shape_cast %147 : vector<16xf32> to vector<16x1xf32>
    %149 = vector.broadcast %148 : vector<16x1xf32> to vector<16x32xf32>
    %150 = arith.subf %146, %149 : vector<16x32xf32>
    %151 = math.exp %150 : vector<16x32xf32>
    %c336 = arith.constant 336 : index
    %c0_67 = arith.constant 0 : index
    %152 = vector.load %arg2[%c336, %c0_67] : memref<560x128xf32, #tpu.memory_space<vmem>>, vector<32x32xf32>
    %cst_68 = arith.constant dense<0.000000e+00> : vector<16x32xf32>
    %153 = tpu.matmul %151, %152, %cst_68 {dimension_numbers = #tpu.dot_dimension_numbers<[1], [0], [0], [1], [0, 0, 1, 1], [], []>} : vector<16x32xf32>, vector<32x32xf32>, vector<16x32xf32> -> vector<16x32xf32>
    %cst_69 = arith.constant 9.99999968E-21 : f32
    %154 = vector.broadcast %cst_69 : f32 to vector<16x32xf32>
    %155 = arith.addf %153, %154 : vector<16x32xf32>
    %156 = tpu.reciprocal %155 {approx = true} : vector<16x32xf32> -> vector<16x32xf32>
    %157 = arith.mulf %151, %156 : vector<16x32xf32>
    %158 = arith.truncf %157 : vector<16x32xf32> to vector<16x32xbf16>
    %159 = arith.truncf %142 : vector<32x32xf32> to vector<32x32xbf16>
    %cst_70 = arith.constant dense<0.000000e+00> : vector<16x32xf32>
    %160 = tpu.matmul %158, %159, %cst_70 {dimension_numbers = #tpu.dot_dimension_numbers<[1], [0], [0], [1], [0, 0, 1, 1], [], []>} : vector<16x32xbf16>, vector<32x32xbf16>, vector<16x32xf32> -> vector<16x32xf32>
    %c176 = arith.constant 176 : index
    %c0_71 = arith.constant 0 : index
    %161 = vector.load %arg0[%c176, %c0_71] : memref<752x128xbf16, #tpu.memory_space<vmem>>, vector<32x32xbf16>
    %162 = arith.truncf %160 : vector<16x32xf32> to vector<16x32xbf16>
    %cst_72 = arith.constant dense<0.000000e+00> : vector<16x32xf32>
    %163 = tpu.matmul %162, %161, %cst_72 {dimension_numbers = #tpu.dot_dimension_numbers<[1], [0], [0], [1], [0, 0, 1, 1], [], []>} : vector<16x32xbf16>, vector<32x32xbf16>, vector<16x32xf32> -> vector<16x32xf32>
    %c64 = arith.constant 64 : index
    %c0_73 = arith.constant 0 : index
    %164 = vector.load %arg2[%c64, %c0_73] : memref<560x128xf32, #tpu.memory_space<vmem>>, vector<1x32xf32>
    %165 = vector.broadcast %164 : vector<1x32xf32> to vector<16x32xf32>
    %166 = arith.addf %163, %165 : vector<16x32xf32>
    %167 = vector.extract_strided_slice %134 {offsets = [0, 32], sizes = [16, 32], strides = [1, 1]} : vector<16x64xf32> to vector<16x32xf32>
    %168 = vector.extract_strided_slice %12 {offsets = [0, 0], sizes = [16, 32], strides = [1, 1]} : vector<16x128xf32> to vector<16x32xf32>
    %169 = vector.extract_strided_slice %12 {offsets = [0, 32], sizes = [16, 32], strides = [1, 1]} : vector<16x128xf32> to vector<16x32xf32>
    %c368 = arith.constant 368 : index
    %c0_74 = arith.constant 0 : index
    %170 = vector.load %arg2[%c368, %c0_74] : memref<560x128xf32, #tpu.memory_space<vmem>>, vector<64x32xf32>
    %171 = tpu.concatenate %168, %168, %168, %168 in 0 : vector<16x32xf32>, vector<16x32xf32>, vector<16x32xf32>, vector<16x32xf32> -> vector<64x32xf32>
    %172 = arith.mulf %171, %170 : vector<64x32xf32>
    %173 = tpu.concatenate %169, %169, %169, %169 in 0 : vector<16x32xf32>, vector<16x32xf32>, vector<16x32xf32>, vector<16x32xf32> -> vector<64x32xf32>
    %174 = arith.mulf %173, %170 : vector<64x32xf32>
    %175 = arith.truncf %167 : vector<16x32xf32> to vector<16x32xbf16>
    %176 = arith.truncf %172 : vector<64x32xf32> to vector<64x32xbf16>
    %cst_75 = arith.constant dense<0.000000e+00> : vector<16x64xf32>
    %177 = tpu.matmul %175, %176, %cst_75 {dimension_numbers = #tpu.dot_dimension_numbers<[1], [1], [0], [0], [0, 0, 1, 0], [], []>} : vector<16x32xbf16>, vector<64x32xbf16>, vector<16x64xf32> -> vector<16x64xf32>
    %178 = arith.addf %177, %14 : vector<16x64xf32>
    %cst_76 = arith.constant dense<0xFF800000> : vector<16xf32>
    %179 = vector.multi_reduction <maximumf>, %178, %cst_76 [1] : vector<16x64xf32> to vector<16xf32>
    %180 = vector.shape_cast %179 : vector<16xf32> to vector<16x1xf32>
    %181 = vector.broadcast %180 : vector<16x1xf32> to vector<16x64xf32>
    %182 = arith.subf %178, %181 : vector<16x64xf32>
    %183 = math.exp %182 : vector<16x64xf32>
    %c432 = arith.constant 432 : index
    %c0_77 = arith.constant 0 : index
    %184 = vector.load %arg2[%c432, %c0_77] : memref<560x128xf32, #tpu.memory_space<vmem>>, vector<64x64xf32>
    %cst_78 = arith.constant dense<0.000000e+00> : vector<16x64xf32>
    %185 = tpu.matmul %183, %184, %cst_78 {dimension_numbers = #tpu.dot_dimension_numbers<[1], [0], [0], [1], [0, 0, 1, 1], [], []>} : vector<16x64xf32>, vector<64x64xf32>, vector<16x64xf32> -> vector<16x64xf32>
    %cst_79 = arith.constant 9.99999968E-21 : f32
    %186 = vector.broadcast %cst_79 : f32 to vector<16x64xf32>
    %187 = arith.addf %185, %186 : vector<16x64xf32>
    %188 = tpu.reciprocal %187 {approx = true} : vector<16x64xf32> -> vector<16x64xf32>
    %189 = arith.mulf %183, %188 : vector<16x64xf32>
    %190 = arith.truncf %189 : vector<16x64xf32> to vector<16x64xbf16>
    %191 = arith.truncf %174 : vector<64x32xf32> to vector<64x32xbf16>
    %cst_80 = arith.constant dense<0.000000e+00> : vector<16x32xf32>
    %192 = tpu.matmul %190, %191, %cst_80 {dimension_numbers = #tpu.dot_dimension_numbers<[1], [0], [0], [1], [0, 0, 1, 1], [], []>} : vector<16x64xbf16>, vector<64x32xbf16>, vector<16x32xf32> -> vector<16x32xf32>
    %c208 = arith.constant 208 : index
    %c0_81 = arith.constant 0 : index
    %193 = vector.load %arg0[%c208, %c0_81] : memref<752x128xbf16, #tpu.memory_space<vmem>>, vector<32x32xbf16>
    %194 = arith.truncf %192 : vector<16x32xf32> to vector<16x32xbf16>
    %cst_82 = arith.constant dense<0.000000e+00> : vector<16x32xf32>
    %195 = tpu.matmul %194, %193, %cst_82 {dimension_numbers = #tpu.dot_dimension_numbers<[1], [0], [0], [1], [0, 0, 1, 1], [], []>} : vector<16x32xbf16>, vector<32x32xbf16>, vector<16x32xf32> -> vector<16x32xf32>
    %c72 = arith.constant 72 : index
    %c0_83 = arith.constant 0 : index
    %196 = vector.load %arg2[%c72, %c0_83] : memref<560x128xf32, #tpu.memory_space<vmem>>, vector<1x32xf32>
    %197 = vector.broadcast %196 : vector<1x32xf32> to vector<16x32xf32>
    %198 = arith.addf %195, %197 : vector<16x32xf32>
    %199 = arith.addf %112, %166 : vector<16x32xf32>
    %200 = arith.addf %112, %198 : vector<16x32xf32>
    %201 = tpu.concatenate %199, %200 in 1 : vector<16x32xf32>, vector<16x32xf32> -> vector<16x64xf32>
    %c240 = arith.constant 240 : index
    %c0_84 = arith.constant 0 : index
    %202 = vector.load %arg0[%c240, %c0_84] : memref<752x128xbf16, #tpu.memory_space<vmem>>, vector<64x32xbf16>
    %203 = arith.truncf %201 : vector<16x64xf32> to vector<16x64xbf16>
    %cst_85 = arith.constant dense<0.000000e+00> : vector<16x32xf32>
    %204 = tpu.matmul %203, %202, %cst_85 {dimension_numbers = #tpu.dot_dimension_numbers<[1], [0], [0], [1], [0, 0, 1, 1], [], []>} : vector<16x64xbf16>, vector<64x32xbf16>, vector<16x32xf32> -> vector<16x32xf32>
    %c80_86 = arith.constant 80 : index
    %c0_87 = arith.constant 0 : index
    %205 = vector.load %arg2[%c80_86, %c0_87] : memref<560x128xf32, #tpu.memory_space<vmem>>, vector<1x32xf32>
    %206 = vector.broadcast %205 : vector<1x32xf32> to vector<16x32xf32>
    %207 = arith.addf %204, %206 : vector<16x32xf32>
    %cst_88 = arith.constant dense<0.000000e+00> : vector<16xf32>
    %208 = vector.multi_reduction <add>, %207, %cst_88 [1] : vector<16x32xf32> to vector<16xf32>
    %209 = vector.shape_cast %208 : vector<16xf32> to vector<16x1xf32>
    %cst_89 = arith.constant 3.200000e+01 : f32
    %210 = vector.broadcast %cst_89 : f32 to vector<16x1xf32>
    %211 = arith.divf %209, %210 : vector<16x1xf32>
    %212 = vector.broadcast %211 : vector<16x1xf32> to vector<16x32xf32>
    %213 = arith.subf %207, %212 : vector<16x32xf32>
    %214 = arith.mulf %213, %213 : vector<16x32xf32>
    %cst_90 = arith.constant dense<0.000000e+00> : vector<16xf32>
    %215 = vector.multi_reduction <add>, %214, %cst_90 [1] : vector<16x32xf32> to vector<16xf32>
    %216 = vector.shape_cast %215 : vector<16xf32> to vector<16x1xf32>
    %cst_91 = arith.constant 3.200000e+01 : f32
    %217 = vector.broadcast %cst_91 : f32 to vector<16x1xf32>
    %218 = arith.divf %216, %217 : vector<16x1xf32>
    %cst_92 = arith.constant 9.99999974E-6 : f32
    %219 = vector.broadcast %cst_92 : f32 to vector<16x1xf32>
    %220 = arith.addf %218, %219 : vector<16x1xf32>
    %221 = math.rsqrt %220 : vector<16x1xf32>
    %222 = vector.broadcast %221 : vector<16x1xf32> to vector<16x32xf32>
    %223 = arith.mulf %213, %222 : vector<16x32xf32>
    %c304_93 = arith.constant 304 : index
    %c0_94 = arith.constant 0 : index
    %224 = vector.load %arg0[%c304_93, %c0_94] : memref<752x128xbf16, #tpu.memory_space<vmem>>, vector<32x64xbf16>
    %225 = arith.truncf %223 : vector<16x32xf32> to vector<16x32xbf16>
    %cst_95 = arith.constant dense<0.000000e+00> : vector<16x64xf32>
    %226 = tpu.matmul %225, %224, %cst_95 {dimension_numbers = #tpu.dot_dimension_numbers<[1], [0], [0], [1], [0, 0, 1, 1], [], []>} : vector<16x32xbf16>, vector<32x64xbf16>, vector<16x64xf32> -> vector<16x64xf32>
    %c88 = arith.constant 88 : index
    %c0_96 = arith.constant 0 : index
    %227 = vector.load %arg2[%c88, %c0_96] : memref<560x128xf32, #tpu.memory_space<vmem>>, vector<1x64xf32>
    %228 = vector.broadcast %227 : vector<1x64xf32> to vector<16x64xf32>
    %229 = arith.addf %226, %228 : vector<16x64xf32>
    %cst_97 = arith.constant 0.000000e+00 : f32
    %230 = vector.broadcast %cst_97 : f32 to vector<16x64xf32>
    %231 = arith.maximumf %229, %230 : vector<16x64xf32>
    %c336_98 = arith.constant 336 : index
    %c0_99 = arith.constant 0 : index
    %232 = vector.load %arg0[%c336_98, %c0_99] : memref<752x128xbf16, #tpu.memory_space<vmem>>, vector<64x32xbf16>
    %233 = arith.truncf %231 : vector<16x64xf32> to vector<16x64xbf16>
    %cst_100 = arith.constant dense<0.000000e+00> : vector<16x32xf32>
    %234 = tpu.matmul %233, %232, %cst_100 {dimension_numbers = #tpu.dot_dimension_numbers<[1], [0], [0], [1], [0, 0, 1, 1], [], []>} : vector<16x64xbf16>, vector<64x32xbf16>, vector<16x32xf32> -> vector<16x32xf32>
    %235 = arith.addf %207, %234 : vector<16x32xf32>
    %c96 = arith.constant 96 : index
    %c0_101 = arith.constant 0 : index
    %236 = vector.load %arg2[%c96, %c0_101] : memref<560x128xf32, #tpu.memory_space<vmem>>, vector<1x32xf32>
    %237 = vector.broadcast %236 : vector<1x32xf32> to vector<16x32xf32>
    %238 = arith.addf %235, %237 : vector<16x32xf32>
    %cst_102 = arith.constant dense<0.000000e+00> : vector<16xf32>
    %239 = vector.multi_reduction <add>, %238, %cst_102 [1] : vector<16x32xf32> to vector<16xf32>
    %240 = vector.shape_cast %239 : vector<16xf32> to vector<16x1xf32>
    %cst_103 = arith.constant 3.200000e+01 : f32
    %241 = vector.broadcast %cst_103 : f32 to vector<16x1xf32>
    %242 = arith.divf %240, %241 : vector<16x1xf32>
    %243 = vector.broadcast %242 : vector<16x1xf32> to vector<16x32xf32>
    %244 = arith.subf %238, %243 : vector<16x32xf32>
    %245 = arith.mulf %244, %244 : vector<16x32xf32>
    %cst_104 = arith.constant dense<0.000000e+00> : vector<16xf32>
    %246 = vector.multi_reduction <add>, %245, %cst_104 [1] : vector<16x32xf32> to vector<16xf32>
    %247 = vector.shape_cast %246 : vector<16xf32> to vector<16x1xf32>
    %cst_105 = arith.constant 3.200000e+01 : f32
    %248 = vector.broadcast %cst_105 : f32 to vector<16x1xf32>
    %249 = arith.divf %247, %248 : vector<16x1xf32>
    %cst_106 = arith.constant 9.99999974E-6 : f32
    %250 = vector.broadcast %cst_106 : f32 to vector<16x1xf32>
    %251 = arith.addf %249, %250 : vector<16x1xf32>
    %252 = math.rsqrt %251 : vector<16x1xf32>
    %253 = vector.broadcast %252 : vector<16x1xf32> to vector<16x32xf32>
    %254 = arith.mulf %244, %253 : vector<16x32xf32>
    %c400 = arith.constant 400 : index
    %c0_107 = arith.constant 0 : index
    %255 = vector.load %arg0[%c400, %c0_107] : memref<752x128xbf16, #tpu.memory_space<vmem>>, vector<32x64xbf16>
    %256 = arith.truncf %254 : vector<16x32xf32> to vector<16x32xbf16>
    %cst_108 = arith.constant dense<0.000000e+00> : vector<16x64xf32>
    %257 = tpu.matmul %256, %255, %cst_108 {dimension_numbers = #tpu.dot_dimension_numbers<[1], [0], [0], [1], [0, 0, 1, 1], [], []>} : vector<16x32xbf16>, vector<32x64xbf16>, vector<16x64xf32> -> vector<16x64xf32>
    %c168 = arith.constant 168 : index
    %c0_109 = arith.constant 0 : index
    %258 = vector.load %arg2[%c168, %c0_109] : memref<560x128xf32, #tpu.memory_space<vmem>>, vector<1x64xf32>
    %259 = vector.broadcast %258 : vector<1x64xf32> to vector<16x64xf32>
    %260 = arith.addf %257, %259 : vector<16x64xf32>
    %261 = vector.extract_strided_slice %260 {offsets = [0, 0], sizes = [16, 32], strides = [1, 1]} : vector<16x64xf32> to vector<16x32xf32>
    %262 = vector.extract_strided_slice %260 {offsets = [0, 32], sizes = [16, 32], strides = [1, 1]} : vector<16x64xf32> to vector<16x32xf32>
    %263 = arith.negf %262 : vector<16x32xf32>
    %264 = math.exp %263 : vector<16x32xf32>
    %cst_110 = arith.constant 1.000000e+00 : f32
    %265 = vector.broadcast %cst_110 : f32 to vector<16x32xf32>
    %266 = arith.addf %265, %264 : vector<16x32xf32>
    %267 = arith.divf %265, %266 : vector<16x32xf32>
    %268 = arith.mulf %261, %267 : vector<16x32xf32>
    %c432_111 = arith.constant 432 : index
    %c0_112 = arith.constant 0 : index
    %269 = vector.load %arg0[%c432_111, %c0_112] : memref<752x128xbf16, #tpu.memory_space<vmem>>, vector<32x12xbf16>
    %270 = arith.truncf %268 : vector<16x32xf32> to vector<16x32xbf16>
    %cst_113 = arith.constant dense<0.000000e+00> : vector<16x12xf32>
    %271 = tpu.matmul %270, %269, %cst_113 {dimension_numbers = #tpu.dot_dimension_numbers<[1], [0], [0], [1], [0, 0, 1, 1], [], []>} : vector<16x32xbf16>, vector<32x12xbf16>, vector<16x12xf32> -> vector<16x12xf32>
    %c176_114 = arith.constant 176 : index
    %c0_115 = arith.constant 0 : index
    %272 = vector.load %arg2[%c176_114, %c0_115] : memref<560x128xf32, #tpu.memory_space<vmem>>, vector<1x12xf32>
    %273 = vector.broadcast %272 : vector<1x12xf32> to vector<16x12xf32>
    %274 = arith.addf %271, %273 : vector<16x12xf32>
    %cst_116 = arith.constant dense<0xFF800000> : vector<16xf32>
    %275 = vector.multi_reduction <maximumf>, %274, %cst_116 [1] : vector<16x12xf32> to vector<16xf32>
    %276 = vector.shape_cast %275 : vector<16xf32> to vector<16x1xf32>
    %277 = vector.broadcast %276 : vector<16x1xf32> to vector<16x12xf32>
    %278 = arith.subf %274, %277 : vector<16x12xf32>
    %279 = math.exp %278 : vector<16x12xf32>
    %c240_117 = arith.constant 240 : index
    %c0_118 = arith.constant 0 : index
    %280 = vector.load %arg2[%c240_117, %c0_118] : memref<560x128xf32, #tpu.memory_space<vmem>>, vector<12x12xf32>
    %cst_119 = arith.constant dense<0.000000e+00> : vector<16x12xf32>
    %281 = tpu.matmul %279, %280, %cst_119 {dimension_numbers = #tpu.dot_dimension_numbers<[1], [0], [0], [1], [0, 0, 1, 1], [], []>} : vector<16x12xf32>, vector<12x12xf32>, vector<16x12xf32> -> vector<16x12xf32>
    %cst_120 = arith.constant 9.99999968E-21 : f32
    %282 = vector.broadcast %cst_120 : f32 to vector<16x12xf32>
    %283 = arith.addf %281, %282 : vector<16x12xf32>
    %284 = tpu.reciprocal %283 {approx = true} : vector<16x12xf32> -> vector<16x12xf32>
    %285 = arith.mulf %279, %284 : vector<16x12xf32>
    %c8_121 = arith.constant 8 : index
    %c0_122 = arith.constant 0 : index
    %286 = vector.load %arg6[%c8_121, %c0_122] : memref<24x32xf32, #tpu.memory_space<vmem>>, vector<16x32xf32>
    tpu.vector_store %arg6[%c8_121, %c0_122], %268 {strides = array<i32>} : memref<24x32xf32, #tpu.memory_space<vmem>>, vector<16x32xf32>,
    %cst_123 = arith.constant 0.000000e+00 : f32
    %287 = vector.broadcast %cst_123 : f32 to vector<16x32xf32>
    %c256 = arith.constant 256 : index
    %c0_124 = arith.constant 0 : index
    %288 = vector.load %arg2[%c256, %c0_124] : memref<560x128xf32, #tpu.memory_space<vmem>>, vector<12x32xf32>
    %cst_125 = arith.constant dense<0.000000e+00> : vector<16x32xf32>
    %289 = tpu.matmul %285, %288, %cst_125 {dimension_numbers = #tpu.dot_dimension_numbers<[1], [0], [0], [1], [0, 0, 1, 1], [], []>} : vector<16x12xf32>, vector<12x32xf32>, vector<16x32xf32> -> vector<16x32xf32>
    %c6_126 = arith.constant 6 : index
    %c0_127 = arith.constant 0 : index
    %290 = vector.load %arg6[%c6_126, %c0_127] : memref<24x32xf32, #tpu.memory_space<vmem>>, vector<16x32xf32>
    %c2_i32_128 = arith.constant 2 : i32
    %291 = vector.broadcast %c2_i32_128 : i32 to vector<16x32xi32>
    %292 = arith.cmpi sge, %31, %291 : vector<16x32xi32>
    %cst_129 = arith.constant 0.000000e+00 : f32
    %293 = vector.broadcast %cst_129 : f32 to vector<16x32xf32>
    %294 = arith.select %292, %290, %293 : vector<16x32xi1>, vector<16x32xf32>
    %295 = arith.mulf %289, %294 : vector<16x32xf32>
    %296 = arith.addf %287, %295 : vector<16x32xf32>
    %c272 = arith.constant 272 : index
    %c0_130 = arith.constant 0 : index
    %297 = vector.load %arg2[%c272, %c0_130] : memref<560x128xf32, #tpu.memory_space<vmem>>, vector<12x32xf32>
    %cst_131 = arith.constant dense<0.000000e+00> : vector<16x32xf32>
    %298 = tpu.matmul %285, %297, %cst_131 {dimension_numbers = #tpu.dot_dimension_numbers<[1], [0], [0], [1], [0, 0, 1, 1], [], []>} : vector<16x12xf32>, vector<12x32xf32>, vector<16x32xf32> -> vector<16x32xf32>
    %c7_132 = arith.constant 7 : index
    %c0_133 = arith.constant 0 : index
    %299 = vector.load %arg6[%c7_132, %c0_133] : memref<24x32xf32, #tpu.memory_space<vmem>>, vector<16x32xf32>
    %c1_i32_134 = arith.constant 1 : i32
    %300 = vector.broadcast %c1_i32_134 : i32 to vector<16x32xi32>
    %301 = arith.cmpi sge, %31, %300 : vector<16x32xi32>
    %cst_135 = arith.constant 0.000000e+00 : f32
    %302 = vector.broadcast %cst_135 : f32 to vector<16x32xf32>
    %303 = arith.select %301, %299, %302 : vector<16x32xi1>, vector<16x32xf32>
    %304 = arith.mulf %298, %303 : vector<16x32xf32>
    %305 = arith.addf %296, %304 : vector<16x32xf32>
    %c288 = arith.constant 288 : index
    %c0_136 = arith.constant 0 : index
    %306 = vector.load %arg2[%c288, %c0_136] : memref<560x128xf32, #tpu.memory_space<vmem>>, vector<12x32xf32>
    %cst_137 = arith.constant dense<0.000000e+00> : vector<16x32xf32>
    %307 = tpu.matmul %285, %306, %cst_137 {dimension_numbers = #tpu.dot_dimension_numbers<[1], [0], [0], [1], [0, 0, 1, 1], [], []>} : vector<16x12xf32>, vector<12x32xf32>, vector<16x32xf32> -> vector<16x32xf32>
    %308 = arith.mulf %307, %268 : vector<16x32xf32>
    %309 = arith.addf %305, %308 : vector<16x32xf32>
    %c464 = arith.constant 464 : index
    %c0_138 = arith.constant 0 : index
    %310 = vector.load %arg0[%c464, %c0_138] : memref<752x128xbf16, #tpu.memory_space<vmem>>, vector<32x32xbf16>
    %311 = arith.truncf %309 : vector<16x32xf32> to vector<16x32xbf16>
    %cst_139 = arith.constant dense<0.000000e+00> : vector<16x32xf32>
    %312 = tpu.matmul %311, %310, %cst_139 {dimension_numbers = #tpu.dot_dimension_numbers<[1], [0], [0], [1], [0, 0, 1, 1], [], []>} : vector<16x32xbf16>, vector<32x32xbf16>, vector<16x32xf32> -> vector<16x32xf32>
    %313 = arith.addf %238, %312 : vector<16x32xf32>
    %c184 = arith.constant 184 : index
    %c0_140 = arith.constant 0 : index
    %314 = vector.load %arg2[%c184, %c0_140] : memref<560x128xf32, #tpu.memory_space<vmem>>, vector<1x32xf32>
    %315 = vector.broadcast %314 : vector<1x32xf32> to vector<16x32xf32>
    %316 = arith.addf %313, %315 : vector<16x32xf32>
    %cst_141 = arith.constant dense<0.000000e+00> : vector<16xf32>
    %317 = vector.multi_reduction <add>, %316, %cst_141 [1] : vector<16x32xf32> to vector<16xf32>
    %318 = vector.shape_cast %317 : vector<16xf32> to vector<16x1xf32>
    %cst_142 = arith.constant 3.200000e+01 : f32
    %319 = vector.broadcast %cst_142 : f32 to vector<16x1xf32>
    %320 = arith.divf %318, %319 : vector<16x1xf32>
    %321 = vector.broadcast %320 : vector<16x1xf32> to vector<16x32xf32>
    %322 = arith.subf %316, %321 : vector<16x32xf32>
    %323 = arith.mulf %322, %322 : vector<16x32xf32>
    %cst_143 = arith.constant dense<0.000000e+00> : vector<16xf32>
    %324 = vector.multi_reduction <add>, %323, %cst_143 [1] : vector<16x32xf32> to vector<16xf32>
    %325 = vector.shape_cast %324 : vector<16xf32> to vector<16x1xf32>
    %cst_144 = arith.constant 3.200000e+01 : f32
    %326 = vector.broadcast %cst_144 : f32 to vector<16x1xf32>
    %327 = arith.divf %325, %326 : vector<16x1xf32>
    %cst_145 = arith.constant 9.99999974E-6 : f32
    %328 = vector.broadcast %cst_145 : f32 to vector<16x1xf32>
    %329 = arith.addf %327, %328 : vector<16x1xf32>
    %330 = math.rsqrt %329 : vector<16x1xf32>
    %331 = vector.broadcast %330 : vector<16x1xf32> to vector<16x32xf32>
    %332 = arith.mulf %322, %331 : vector<16x32xf32>
    %c496 = arith.constant 496 : index
    %c0_146 = arith.constant 0 : index
    %333 = vector.load %arg0[%c496, %c0_146] : memref<752x128xbf16, #tpu.memory_space<vmem>>, vector<32x64xbf16>
    %334 = arith.truncf %332 : vector<16x32xf32> to vector<16x32xbf16>
    %cst_147 = arith.constant dense<0.000000e+00> : vector<16x64xf32>
    %335 = tpu.matmul %334, %333, %cst_147 {dimension_numbers = #tpu.dot_dimension_numbers<[1], [0], [0], [1], [0, 0, 1, 1], [], []>} : vector<16x32xbf16>, vector<32x64xbf16>, vector<16x64xf32> -> vector<16x64xf32>
    %c192 = arith.constant 192 : index
    %c0_148 = arith.constant 0 : index
    %336 = vector.load %arg2[%c192, %c0_148] : memref<560x128xf32, #tpu.memory_space<vmem>>, vector<1x64xf32>
    %337 = vector.broadcast %336 : vector<1x64xf32> to vector<16x64xf32>
    %338 = arith.addf %335, %337 : vector<16x64xf32>
    %339 = vector.extract_strided_slice %338 {offsets = [0, 0], sizes = [16, 32], strides = [1, 1]} : vector<16x64xf32> to vector<16x32xf32>
    %340 = vector.extract_strided_slice %5 {offsets = [0, 64], sizes = [8, 32], strides = [1, 1]} : vector<8x128xf32> to vector<8x32xf32>
    %341 = vector.extract_strided_slice %5 {offsets = [0, 96], sizes = [8, 32], strides = [1, 1]} : vector<8x128xf32> to vector<8x32xf32>
    %c304_149 = arith.constant 304 : index
    %c0_150 = arith.constant 0 : index
    %342 = vector.load %arg2[%c304_149, %c0_150] : memref<560x128xf32, #tpu.memory_space<vmem>>, vector<32x32xf32>
    %343 = tpu.concatenate %340, %340, %340, %340 in 0 : vector<8x32xf32>, vector<8x32xf32>, vector<8x32xf32>, vector<8x32xf32> -> vector<32x32xf32>
    %344 = arith.mulf %343, %342 : vector<32x32xf32>
    %345 = tpu.concatenate %341, %341, %341, %341 in 0 : vector<8x32xf32>, vector<8x32xf32>, vector<8x32xf32>, vector<8x32xf32> -> vector<32x32xf32>
    %346 = arith.mulf %345, %342 : vector<32x32xf32>
    %347 = arith.truncf %339 : vector<16x32xf32> to vector<16x32xbf16>
    %348 = arith.truncf %344 : vector<32x32xf32> to vector<32x32xbf16>
    %cst_151 = arith.constant dense<0.000000e+00> : vector<16x32xf32>
    %349 = tpu.matmul %347, %348, %cst_151 {dimension_numbers = #tpu.dot_dimension_numbers<[1], [1], [0], [0], [0, 0, 1, 0], [], []>} : vector<16x32xbf16>, vector<32x32xbf16>, vector<16x32xf32> -> vector<16x32xf32>
    %350 = arith.addf %349, %13 : vector<16x32xf32>
    %cst_152 = arith.constant dense<0xFF800000> : vector<16xf32>
    %351 = vector.multi_reduction <maximumf>, %350, %cst_152 [1] : vector<16x32xf32> to vector<16xf32>
    %352 = vector.shape_cast %351 : vector<16xf32> to vector<16x1xf32>
    %353 = vector.broadcast %352 : vector<16x1xf32> to vector<16x32xf32>
    %354 = arith.subf %350, %353 : vector<16x32xf32>
    %355 = math.exp %354 : vector<16x32xf32>
    %c336_153 = arith.constant 336 : index
    %c0_154 = arith.constant 0 : index
    %356 = vector.load %arg2[%c336_153, %c0_154] : memref<560x128xf32, #tpu.memory_space<vmem>>, vector<32x32xf32>
    %cst_155 = arith.constant dense<0.000000e+00> : vector<16x32xf32>
    %357 = tpu.matmul %355, %356, %cst_155 {dimension_numbers = #tpu.dot_dimension_numbers<[1], [0], [0], [1], [0, 0, 1, 1], [], []>} : vector<16x32xf32>, vector<32x32xf32>, vector<16x32xf32> -> vector<16x32xf32>
    %cst_156 = arith.constant 9.99999968E-21 : f32
    %358 = vector.broadcast %cst_156 : f32 to vector<16x32xf32>
    %359 = arith.addf %357, %358 : vector<16x32xf32>
    %360 = tpu.reciprocal %359 {approx = true} : vector<16x32xf32> -> vector<16x32xf32>
    %361 = arith.mulf %355, %360 : vector<16x32xf32>
    %362 = arith.truncf %361 : vector<16x32xf32> to vector<16x32xbf16>
    %363 = arith.truncf %346 : vector<32x32xf32> to vector<32x32xbf16>
    %cst_157 = arith.constant dense<0.000000e+00> : vector<16x32xf32>
    %364 = tpu.matmul %362, %363, %cst_157 {dimension_numbers = #tpu.dot_dimension_numbers<[1], [0], [0], [1], [0, 0, 1, 1], [], []>} : vector<16x32xbf16>, vector<32x32xbf16>, vector<16x32xf32> -> vector<16x32xf32>
    %c528 = arith.constant 528 : index
    %c0_158 = arith.constant 0 : index
    %365 = vector.load %arg0[%c528, %c0_158] : memref<752x128xbf16, #tpu.memory_space<vmem>>, vector<32x32xbf16>
    %366 = arith.truncf %364 : vector<16x32xf32> to vector<16x32xbf16>
    %cst_159 = arith.constant dense<0.000000e+00> : vector<16x32xf32>
    %367 = tpu.matmul %366, %365, %cst_159 {dimension_numbers = #tpu.dot_dimension_numbers<[1], [0], [0], [1], [0, 0, 1, 1], [], []>} : vector<16x32xbf16>, vector<32x32xbf16>, vector<16x32xf32> -> vector<16x32xf32>
    %c200 = arith.constant 200 : index
    %c0_160 = arith.constant 0 : index
    %368 = vector.load %arg2[%c200, %c0_160] : memref<560x128xf32, #tpu.memory_space<vmem>>, vector<1x32xf32>
    %369 = vector.broadcast %368 : vector<1x32xf32> to vector<16x32xf32>
    %370 = arith.addf %367, %369 : vector<16x32xf32>
    %371 = vector.extract_strided_slice %338 {offsets = [0, 32], sizes = [16, 32], strides = [1, 1]} : vector<16x64xf32> to vector<16x32xf32>
    %372 = vector.extract_strided_slice %12 {offsets = [0, 64], sizes = [16, 32], strides = [1, 1]} : vector<16x128xf32> to vector<16x32xf32>
    %373 = vector.extract_strided_slice %12 {offsets = [0, 96], sizes = [16, 32], strides = [1, 1]} : vector<16x128xf32> to vector<16x32xf32>
    %c368_161 = arith.constant 368 : index
    %c0_162 = arith.constant 0 : index
    %374 = vector.load %arg2[%c368_161, %c0_162] : memref<560x128xf32, #tpu.memory_space<vmem>>, vector<64x32xf32>
    %375 = tpu.concatenate %372, %372, %372, %372 in 0 : vector<16x32xf32>, vector<16x32xf32>, vector<16x32xf32>, vector<16x32xf32> -> vector<64x32xf32>
    %376 = arith.mulf %375, %374 : vector<64x32xf32>
    %377 = tpu.concatenate %373, %373, %373, %373 in 0 : vector<16x32xf32>, vector<16x32xf32>, vector<16x32xf32>, vector<16x32xf32> -> vector<64x32xf32>
    %378 = arith.mulf %377, %374 : vector<64x32xf32>
    %379 = arith.truncf %371 : vector<16x32xf32> to vector<16x32xbf16>
    %380 = arith.truncf %376 : vector<64x32xf32> to vector<64x32xbf16>
    %cst_163 = arith.constant dense<0.000000e+00> : vector<16x64xf32>
    %381 = tpu.matmul %379, %380, %cst_163 {dimension_numbers = #tpu.dot_dimension_numbers<[1], [1], [0], [0], [0, 0, 1, 0], [], []>} : vector<16x32xbf16>, vector<64x32xbf16>, vector<16x64xf32> -> vector<16x64xf32>
    %382 = arith.addf %381, %14 : vector<16x64xf32>
    %cst_164 = arith.constant dense<0xFF800000> : vector<16xf32>
    %383 = vector.multi_reduction <maximumf>, %382, %cst_164 [1] : vector<16x64xf32> to vector<16xf32>
    %384 = vector.shape_cast %383 : vector<16xf32> to vector<16x1xf32>
    %385 = vector.broadcast %384 : vector<16x1xf32> to vector<16x64xf32>
    %386 = arith.subf %382, %385 : vector<16x64xf32>
    %387 = math.exp %386 : vector<16x64xf32>
    %c432_165 = arith.constant 432 : index
    %c0_166 = arith.constant 0 : index
    %388 = vector.load %arg2[%c432_165, %c0_166] : memref<560x128xf32, #tpu.memory_space<vmem>>, vector<64x64xf32>
    %cst_167 = arith.constant dense<0.000000e+00> : vector<16x64xf32>
    %389 = tpu.matmul %387, %388, %cst_167 {dimension_numbers = #tpu.dot_dimension_numbers<[1], [0], [0], [1], [0, 0, 1, 1], [], []>} : vector<16x64xf32>, vector<64x64xf32>, vector<16x64xf32> -> vector<16x64xf32>
    %cst_168 = arith.constant 9.99999968E-21 : f32
    %390 = vector.broadcast %cst_168 : f32 to vector<16x64xf32>
    %391 = arith.addf %389, %390 : vector<16x64xf32>
    %392 = tpu.reciprocal %391 {approx = true} : vector<16x64xf32> -> vector<16x64xf32>
    %393 = arith.mulf %387, %392 : vector<16x64xf32>
    %394 = arith.truncf %393 : vector<16x64xf32> to vector<16x64xbf16>
    %395 = arith.truncf %378 : vector<64x32xf32> to vector<64x32xbf16>
    %cst_169 = arith.constant dense<0.000000e+00> : vector<16x32xf32>
    %396 = tpu.matmul %394, %395, %cst_169 {dimension_numbers = #tpu.dot_dimension_numbers<[1], [0], [0], [1], [0, 0, 1, 1], [], []>} : vector<16x64xbf16>, vector<64x32xbf16>, vector<16x32xf32> -> vector<16x32xf32>
    %c560 = arith.constant 560 : index
    %c0_170 = arith.constant 0 : index
    %397 = vector.load %arg0[%c560, %c0_170] : memref<752x128xbf16, #tpu.memory_space<vmem>>, vector<32x32xbf16>
    %398 = arith.truncf %396 : vector<16x32xf32> to vector<16x32xbf16>
    %cst_171 = arith.constant dense<0.000000e+00> : vector<16x32xf32>
    %399 = tpu.matmul %398, %397, %cst_171 {dimension_numbers = #tpu.dot_dimension_numbers<[1], [0], [0], [1], [0, 0, 1, 1], [], []>} : vector<16x32xbf16>, vector<32x32xbf16>, vector<16x32xf32> -> vector<16x32xf32>
    %c208_172 = arith.constant 208 : index
    %c0_173 = arith.constant 0 : index
    %400 = vector.load %arg2[%c208_172, %c0_173] : memref<560x128xf32, #tpu.memory_space<vmem>>, vector<1x32xf32>
    %401 = vector.broadcast %400 : vector<1x32xf32> to vector<16x32xf32>
    %402 = arith.addf %399, %401 : vector<16x32xf32>
    %c496_174 = arith.constant 496 : index
    %c0_175 = arith.constant 0 : index
    %403 = vector.load %arg2[%c496_174, %c0_175] : memref<560x128xf32, #tpu.memory_space<vmem>>, vector<64x6xf32>
    %cst_176 = arith.constant dense<0.000000e+00> : vector<16x6xf32>
    %404 = tpu.matmul %393, %403, %cst_176 {dimension_numbers = #tpu.dot_dimension_numbers<[1], [0], [0], [1], [0, 0, 1, 1], [], []>} : vector<16x64xf32>, vector<64x6xf32>, vector<16x6xf32> -> vector<16x6xf32>
    %405 = arith.addf %316, %370 : vector<16x32xf32>
    %406 = arith.addf %316, %402 : vector<16x32xf32>
    %407 = tpu.concatenate %405, %406 in 1 : vector<16x32xf32>, vector<16x32xf32> -> vector<16x64xf32>
    %c592 = arith.constant 592 : index
    %c0_177 = arith.constant 0 : index
    %408 = vector.load %arg0[%c592, %c0_177] : memref<752x128xbf16, #tpu.memory_space<vmem>>, vector<64x32xbf16>
    %409 = arith.truncf %407 : vector<16x64xf32> to vector<16x64xbf16>
    %cst_178 = arith.constant dense<0.000000e+00> : vector<16x32xf32>
    %410 = tpu.matmul %409, %408, %cst_178 {dimension_numbers = #tpu.dot_dimension_numbers<[1], [0], [0], [1], [0, 0, 1, 1], [], []>} : vector<16x64xbf16>, vector<64x32xbf16>, vector<16x32xf32> -> vector<16x32xf32>
    %c216 = arith.constant 216 : index
    %c0_179 = arith.constant 0 : index
    %411 = vector.load %arg2[%c216, %c0_179] : memref<560x128xf32, #tpu.memory_space<vmem>>, vector<1x32xf32>
    %412 = vector.broadcast %411 : vector<1x32xf32> to vector<16x32xf32>
    %413 = arith.addf %410, %412 : vector<16x32xf32>
    %cst_180 = arith.constant dense<0.000000e+00> : vector<16xf32>
    %414 = vector.multi_reduction <add>, %413, %cst_180 [1] : vector<16x32xf32> to vector<16xf32>
    %415 = vector.shape_cast %414 : vector<16xf32> to vector<16x1xf32>
    %cst_181 = arith.constant 3.200000e+01 : f32
    %416 = vector.broadcast %cst_181 : f32 to vector<16x1xf32>
    %417 = arith.divf %415, %416 : vector<16x1xf32>
    %418 = vector.broadcast %417 : vector<16x1xf32> to vector<16x32xf32>
    %419 = arith.subf %413, %418 : vector<16x32xf32>
    %420 = arith.mulf %419, %419 : vector<16x32xf32>
    %cst_182 = arith.constant dense<0.000000e+00> : vector<16xf32>
    %421 = vector.multi_reduction <add>, %420, %cst_182 [1] : vector<16x32xf32> to vector<16xf32>
    %422 = vector.shape_cast %421 : vector<16xf32> to vector<16x1xf32>
    %cst_183 = arith.constant 3.200000e+01 : f32
    %423 = vector.broadcast %cst_183 : f32 to vector<16x1xf32>
    %424 = arith.divf %422, %423 : vector<16x1xf32>
    %cst_184 = arith.constant 9.99999974E-6 : f32
    %425 = vector.broadcast %cst_184 : f32 to vector<16x1xf32>
    %426 = arith.addf %424, %425 : vector<16x1xf32>
    %427 = math.rsqrt %426 : vector<16x1xf32>
    %428 = vector.broadcast %427 : vector<16x1xf32> to vector<16x32xf32>
    %429 = arith.mulf %419, %428 : vector<16x32xf32>
    %c656 = arith.constant 656 : index
    %c0_185 = arith.constant 0 : index
    %430 = vector.load %arg0[%c656, %c0_185] : memref<752x128xbf16, #tpu.memory_space<vmem>>, vector<32x64xbf16>
    %431 = arith.truncf %429 : vector<16x32xf32> to vector<16x32xbf16>
    %cst_186 = arith.constant dense<0.000000e+00> : vector<16x64xf32>
    %432 = tpu.matmul %431, %430, %cst_186 {dimension_numbers = #tpu.dot_dimension_numbers<[1], [0], [0], [1], [0, 0, 1, 1], [], []>} : vector<16x32xbf16>, vector<32x64xbf16>, vector<16x64xf32> -> vector<16x64xf32>
    %c224 = arith.constant 224 : index
    %c0_187 = arith.constant 0 : index
    %433 = vector.load %arg2[%c224, %c0_187] : memref<560x128xf32, #tpu.memory_space<vmem>>, vector<1x64xf32>
    %434 = vector.broadcast %433 : vector<1x64xf32> to vector<16x64xf32>
    %435 = arith.addf %432, %434 : vector<16x64xf32>
    %cst_188 = arith.constant 0.000000e+00 : f32
    %436 = vector.broadcast %cst_188 : f32 to vector<16x64xf32>
    %437 = arith.maximumf %435, %436 : vector<16x64xf32>
    %c688 = arith.constant 688 : index
    %c0_189 = arith.constant 0 : index
    %438 = vector.load %arg0[%c688, %c0_189] : memref<752x128xbf16, #tpu.memory_space<vmem>>, vector<64x32xbf16>
    %439 = arith.truncf %437 : vector<16x64xf32> to vector<16x64xbf16>
    %cst_190 = arith.constant dense<0.000000e+00> : vector<16x32xf32>
    %440 = tpu.matmul %439, %438, %cst_190 {dimension_numbers = #tpu.dot_dimension_numbers<[1], [0], [0], [1], [0, 0, 1, 1], [], []>} : vector<16x64xbf16>, vector<64x32xbf16>, vector<16x32xf32> -> vector<16x32xf32>
    %441 = arith.addf %413, %440 : vector<16x32xf32>
    %c232 = arith.constant 232 : index
    %c0_191 = arith.constant 0 : index
    %442 = vector.load %arg2[%c232, %c0_191] : memref<560x128xf32, #tpu.memory_space<vmem>>, vector<1x32xf32>
    %443 = vector.broadcast %442 : vector<1x32xf32> to vector<16x32xf32>
    %444 = arith.addf %441, %443 : vector<16x32xf32>
    %cst_192 = arith.constant dense<0.000000e+00> : vector<16xf32>
    %445 = vector.multi_reduction <add>, %444, %cst_192 [1] : vector<16x32xf32> to vector<16xf32>
    %446 = vector.shape_cast %445 : vector<16xf32> to vector<16x1xf32>
    %cst_193 = arith.constant 3.200000e+01 : f32
    %447 = vector.broadcast %cst_193 : f32 to vector<16x1xf32>
    %448 = arith.divf %446, %447 : vector<16x1xf32>
    %449 = vector.broadcast %448 : vector<16x1xf32> to vector<16x32xf32>
    %450 = arith.subf %444, %449 : vector<16x32xf32>
    %451 = arith.mulf %450, %450 : vector<16x32xf32>
    %cst_194 = arith.constant dense<0.000000e+00> : vector<16xf32>
    %452 = vector.multi_reduction <add>, %451, %cst_194 [1] : vector<16x32xf32> to vector<16xf32>
    %453 = vector.shape_cast %452 : vector<16xf32> to vector<16x1xf32>
    %cst_195 = arith.constant 3.200000e+01 : f32
    %454 = vector.broadcast %cst_195 : f32 to vector<16x1xf32>
    %455 = arith.divf %453, %454 : vector<16x1xf32>
    %cst_196 = arith.constant 9.99999974E-6 : f32
    %456 = vector.broadcast %cst_196 : f32 to vector<16x1xf32>
    %457 = arith.addf %455, %456 : vector<16x1xf32>
    %458 = math.rsqrt %457 : vector<16x1xf32>
    %459 = vector.broadcast %458 : vector<16x1xf32> to vector<16x32xf32>
    %460 = arith.mulf %450, %459 : vector<16x32xf32>
    %c16_197 = arith.constant 16 : index
    %c0_198 = arith.constant 0 : index
    %461 = vector.load %arg2[%c16_197, %c0_198] : memref<560x128xf32, #tpu.memory_space<vmem>>, vector<1x32xf32>
    %462 = vector.broadcast %461 : vector<1x32xf32> to vector<16x32xf32>
    %463 = arith.mulf %460, %462 : vector<16x32xf32>
    %c24 = arith.constant 24 : index
    %c0_199 = arith.constant 0 : index
    %464 = vector.load %arg2[%c24, %c0_199] : memref<560x128xf32, #tpu.memory_space<vmem>>, vector<1x32xf32>
    %465 = vector.broadcast %464 : vector<1x32xf32> to vector<16x32xf32>
    %466 = arith.addf %463, %465 : vector<16x32xf32>
    %cst_200 = arith.constant 0.000000e+00 : f32
    %467 = vector.broadcast %cst_200 : f32 to vector<16x90xf32>
    %468 = tpu.concatenate %466, %404, %467 in 1 : vector<16x32xf32>, vector<16x6xf32>, vector<16x90xf32> -> vector<16x128xf32>
    %cst_201 = arith.constant 0.000000e+00 : f32
    %469 = vector.broadcast %cst_201 : f32 to vector<16x96xf32>
    %470 = tpu.concatenate %238, %469 in 1 : vector<16x32xf32>, vector<16x96xf32> -> vector<16x128xf32>
    %cst_202 = arith.constant 0.000000e+00 : f32
    %471 = vector.broadcast %cst_202 : f32 to vector<16x96xf32>
    %472 = tpu.concatenate %444, %471 in 1 : vector<16x32xf32>, vector<16x96xf32> -> vector<16x128xf32>
    %473 = tpu.concatenate %468, %470, %472 in 0 : vector<16x128xf32>, vector<16x128xf32>, vector<16x128xf32> -> vector<48x128xf32>
    %c0_203 = arith.constant 0 : index
    %c0_204 = arith.constant 0 : index
    %474 = vector.load %arg5[%c0_203, %c0_204] : memref<48x128xf32, #tpu.memory_space<vmem>>, vector<48x128xf32>
    tpu.vector_store %arg5[%c0_203, %c0_204], %473 {strides = array<i32>} : memref<48x128xf32, #tpu.memory_space<vmem>>, vector<48x128xf32>,
    return
  }
}

</mosaic_0001>

<bundles_post_ra>
// kernel: tile.19
= control target key start
LH: loop header
LB: loop body
LE: loop exit
PB: predicated region body
PF: predicated region fallthrough
CT: control target
= control target key end

     0   :  { %vm82_vm0 = vcmask 1047556   ;;  %vm84_vm1 = vcmask 130048   ;;  %s195_s9 = smov 48   ;;  %s196_s14 = smov 16   ;;  %vm103_vm2 = vcmask 523648   ;;  %vm124_vm3 = vcmask 392448   ;;  %s289_s0 = inlined_call_operand.vmem [shape: f32[16,4,16], index: 0, kind: input, shape index: {}]   ;;  %s290_s1 = inlined_call_operand.vmem [shape: f32[16,64], index: 1, kind: output, shape index: {}]  }
   0x1   :  { %v180_v0 = vld [vmem:[%s289_s0 + $0x1c] sm:$0xf]  ;;  %v181_v1 = vld [vmem:[%s289_s0 + $0x18] sm:$0xf]  ;;  %v182_v2 = vld [vmem:[%s289_s0 + $0x14] sm:$0xf] }
   0x2   :  { %48 = vst [vmem:[#allocation0 + $0x38] sm:$0xf] %v180_v0  ;;  %53 = vst [vmem:[#allocation0 + $0x30] sm:$0xf] %v181_v1  ;;  %v183_v3 = vld [vmem:[%s289_s0 + $0x10] sm:$0xf] }
   0x3   :  { %58 = vst [vmem:[#allocation0 + $0x28] sm:$0xf] %v182_v2  ;;  %v184_v4 = vld [vmem:[%s289_s0 + $0xc] sm:$0xf]  ;;  %v185_v5 = vld [vmem:[%s289_s0 + $0x8] sm:$0xf] }
   0x4   :  { %63 = vst [vmem:[#allocation0 + $0x20] sm:$0xf] %v183_v3  ;;  %68 = vst [vmem:[#allocation0 + $0x18] sm:$0xf] %v184_v4  ;;  %v186_v6 = vld [vmem:[%s289_s0 + $0x4] sm:$0xf] }
   0x5   :  { %73 = vst [vmem:[#allocation0 + $0x10] sm:$0xf] %v185_v5  ;;  %v78_v7 = vld [vmem:[%s289_s0] sm:$0xf]  ;;  %77 = vst [vmem:[#allocation0 + $0x8] sm:$0xf] %v186_v6 }
   0x6   :  { %79 = vst [vmem:[#allocation0] sm:$0xf] %v78_v7  ;;  %v172_v8 = vld [vmem:[%s289_s0 + $0x3c] sm:$0xf]  ;;  %v173_v9 = vld [vmem:[%s289_s0 + $0x38] sm:$0xf] }
   0x7   :  { %8 = vst [vmem:[#allocation0 + $0x78] sm:$0xf] %v172_v8  ;;  %13 = vst [vmem:[#allocation0 + $0x70] sm:$0xf] %v173_v9  ;;  %v174_v10 = vld [vmem:[%s289_s0 + $0x34] sm:$0xf] }
   0x8   :  { %v175_v11 = vld [vmem:[%s289_s0 + $0x30] sm:$0xf]  ;;  %v176_v12 = vld [vmem:[%s289_s0 + $0x2c] sm:$0xf]  ;;  %18 = vst [vmem:[#allocation0 + $0x68] sm:$0xf] %v174_v10 }
   0x9   :  { %23 = vst [vmem:[#allocation0 + $0x60] sm:$0xf] %v175_v11  ;;  %28 = vst [vmem:[#allocation0 + $0x58] sm:$0xf] %v176_v12  ;;  %v177_v13 = vld [vmem:[%s289_s0 + $0x28] sm:$0xf] }
   0xa   :  { %v178_v14 = vld [vmem:[%s289_s0 + $0x24] sm:$0xf]  ;;  %v179_v15 = vld [vmem:[%s289_s0 + $0x20] sm:$0xf]  ;;  %33 = vst [vmem:[#allocation0 + $0x50] sm:$0xf] %v177_v13 }
   0xb   :  { %38 = vst [vmem:[#allocation0 + $0x48] sm:$0xf] %v178_v14  ;;  %43 = vst [vmem:[#allocation0 + $0x40] sm:$0xf] %v179_v15  ;;  %s194_s0 = smov 32   ;;  %vm145_vm4 = vcmask 261248  }
   0xc   :  { %v119_v16 = vld [vmem:[#allocation0 + $0x2] ss:$8 sm:$0xf0]   ;;  %v98_v17 = vld [vmem:[#allocation0 + $0x3] ss:$8 sm:$0xf0]  }
   0xd   :  { %v117_v18 = vld [vmem:[#allocation0 + $0x2] ss:$8 sm:$0xf]   ;;  %v96_v19 = vld [vmem:[#allocation0 + $0x3] ss:$8 sm:$0xf]  }
   0xe   :  { %v121_v20 = vsel %vm82_vm0, %v119_v16, %v117_v18  ;;  %v100_v21 = vsel %vm82_vm0, %v98_v17, %v96_v19  ;;  %v138_v24 = vld [vmem:[#allocation0 + $0x1] ss:$8 sm:$0xf]   ;;  %v80_v32 = vld [vmem:[#allocation0] ss:$8 sm:$0xf]  }
   0xf   :  { %122 = vrot.lane.b32.xlu1 %v121_v20, %s194_s0  ;;  %101 = vrot.lane.b32.xlu0 %v100_v21, %s195_s9  ;;  %v140_v25 = vld [vmem:[#allocation0 + $0x1] ss:$8 sm:$0xf0]   ;;  %v81_v33 = vld [vmem:[#allocation0] ss:$8 sm:$0xf0]  }
  0x10   :  { %v129_v22 = vld [vmem:[#allocation0 + $0x42] ss:$8 sm:$0xf0]   ;;  %v108_v23 = vld [vmem:[#allocation0 + $0x43] ss:$8 sm:$0xf0]   ;;  %v83_v34 = vsel %vm82_vm0, %v81_v33, %v80_v32  ;;  %v142_v38 = vsel %vm82_vm0, %v140_v25, %v138_v24 }
  0x11   :  { %v150_v31 = vld [vmem:[#allocation0 + $0x41] ss:$8 sm:$0xf0]   ;;  %v89_v36 = vld [vmem:[#allocation0 + $0x40] ss:$8 sm:$0xf0]  }
  0x12   :  { %v127_v26 = vld [vmem:[#allocation0 + $0x42] ss:$8 sm:$0xf]   ;;  %v106_v27 = vld [vmem:[#allocation0 + $0x43] ss:$8 sm:$0xf]  }
  0x13   :  { %v131_v28 = vsel %vm82_vm0, %v129_v22, %v127_v26  ;;  %v110_v29 = vsel %vm82_vm0, %v108_v23, %v106_v27  ;;  %v148_v30 = vld [vmem:[#allocation0 + $0x41] ss:$8 sm:$0xf]   ;;  %v87_v35 = vld [vmem:[#allocation0 + $0x40] ss:$8 sm:$0xf]  }
  0x14   :  { %132 = vrot.lane.b32.xlu1 %v131_v28, %s194_s0  ;;  %111 = vrot.lane.b32.xlu0 %v110_v29, %s195_s9  ;;  %v152_v37 = vsel %vm82_vm0, %v150_v31, %v148_v30  ;;  %85 = vst.msk [vmem:[%s290_s1] sm:$0xff] %vm84_vm1, %v83_v34   ;;  %v91_v39 = vsel %vm82_vm0, %v89_v36, %v87_v35 }
  0x15   :  { %187 = vst.msk [vmem:[%s290_s1 + $0x8] sm:$0xff] %vm84_vm1, %v91_v39  }
  0x18   :  { %153 = vrot.lane.b32.xlu1 %v152_v37, %s196_s14  ;;  %143 = vrot.lane.b32.xlu0 %v142_v38, %s196_s14 }
  0x81   :  { %v123_v40 = vpop.permute.xlu1 %122   ;;  %v102_v41 = vpop.permute.xlu0 %101  }
  0x82   :  { %104 = vst.msk [vmem:[%s290_s1] sm:$0xff] %vm103_vm2, %v102_v41  }
  0x83   :  { %125 = vst.msk [vmem:[%s290_s1] sm:$0xff] %vm124_vm3, %v123_v40  }
  0x86   :  { %v133_v42 = vpop.permute.xlu1 %132   ;;  %v112_v43 = vpop.permute.xlu0 %111  }
  0x87   :  { %188 = vst.msk [vmem:[%s290_s1 + $0x8] sm:$0xff] %vm103_vm2, %v112_v43  }
  0x88   :  { %189 = vst.msk [vmem:[%s290_s1 + $0x8] sm:$0xff] %vm124_vm3, %v133_v42  }
  0x8a   :  { %v154_v44 = vpop.permute.xlu1 %153   ;;  %v144_v45 = vpop.permute.xlu0 %143  }
  0x8b   :  { %190 = vst.msk [vmem:[%s290_s1 + $0x8] sm:$0xff] %vm145_vm4, %v154_v44   ;;  %146 = vst.msk [vmem:[%s290_s1] sm:$0xff] %vm145_vm4, %v144_v45  }

// kernel: decoder_forward.1
= control target key start
LH: loop header
LB: loop body
LE: loop exit
PB: predicated region body
PF: predicated region fallthrough
CT: control target
= control target key end

     0   :  { %10 = vsyncpa [#allocation4], 0  ;;  %s6522_s18 = smov [#allocation3]   ;;  %s7803_s0 = inlined_call_operand.vmem [shape: bf16[752,128], index: 0, kind: input, shape index: {}]   ;;  %s7804_s1 = inlined_call_operand.vmem [shape: bf16[2048,128], index: 1, kind: input, shape index: {}]   ;;  %s7805_s2 = inlined_call_operand.hbm [shape: f32[560,128], index: 2, kind: input, shape index: {}]   ;;  %s7806_s3 = inlined_call_operand.vmem [shape: f32[64,128], index: 3, kind: input, shape index: {}]   ;;  %s7807_s4 = inlined_call_operand.vmem [shape: bf16[8,2048], index: 4, kind: input, shape index: {}]   ;;  %s7808_s5 = inlined_call_operand.vmem [shape: f32[48,128], index: 5, kind: output, shape index: {}]  }
   0x1   :  { %s20_s19 = sshll.u32 %s6522_s18, 4  ;;  %s6498_s22 = scalar_lea.hbm %s7805_s2, 8960  ;;  %s21_s19 = int_to_ptr.vmem [resolvable:$true] %s20_s19 }
   0x2   :  { %p6499_p0 = scmp.ne.s32.totalorder %s7805_s2, %s6498_s22  ;;  %p6502_p1 = scmp.lt.u32.totalorder %s6498_s22, %s7805_s2 }
   0x4   :  { %p6504_p2 = pnand %p6502_p1, %p6499_p0 }
   0x6   :  { %6507 = shalt.err (!%p6504_p2)
}
   0x7   :  { %s6508_s27 = scalar_lea.vmem %s21_s19, 8960  ;;  %p6513_p4 = scmp.lt.s32.totalorder %s21_s19, %s21_s19 }
   0x8   :  { %p6509_p3 = scmp.ne.s32.totalorder %s21_s19, %s6508_s27  ;;  %p6514_p5 = scmp.lt.s32.totalorder %s6508_s27, %s6508_s27 }
   0xa   :  { %p6515_p6 = por %p6514_p5, %p6513_p4 }
   0xc   :  { %p6516_p7 = pnand %p6515_p6, %p6509_p3 }
   0xe   :  { %6519 = shalt.err (!%p6516_p7)
}
   0xf   :  { %s6523_s28 = smov 128   ;;  %s6524_s29 = smov 8  }
  0x10   :  { %26 = dma.hbm_to_vmem [thread:$0]  %s7805_s2, 8960, %s21_s19, [#allocation4], %s6523_s28, %s6523_s28, %s6524_s29  }
  0x11   :  { %6520 = dma.done.wait [#allocation4], 8960  }
  0x12   :  { %6521 = vsyncadd [#allocation4], 4294958336  ;;  %vm1556_vm0 = vcmask 261120   ;;  %v1558_v0 = vld [vmem:[%s7806_s3] sm:$0xff]  ;;  %v1559_v1 = vld [vmem:[%s7806_s3 + $0x8] sm:$0xff]  ;;  %vm6526_vm1 = vmmov 0  }
  0x13   :  { %v1560_v2 = vsel %vm1556_vm0, %v1558_v0, 0.0  ;;  %v6209_v3 = vld [vmem:[%s7804_s1 + $0x40] sm:$0xff]   ;;  %v1563_v5 = vsel %vm1556_vm0, %v1559_v1, 0.0  ;;  %v6213_v8 = vld [vmem:[%s7804_s1 + $0x48] sm:$0xff]   ;;  %v6217_v12 = vld [vmem:[%s7804_s1 + $0x50] sm:$0xff]   ;;  %s6527_s7 = smov 96  }
  0x14   :  { %v6210_v4 = vld [vmem:[%s7804_s1] sm:$0xff]   ;;  %1561 = vadd.xlane.f32.xlu0 %v1560_v2  ;;  %5345 = vmatprep.subr.bf16.mxu0 %v6209_v3  ;;  %v6214_v9 = vld [vmem:[%s7804_s1 + $0x8] sm:$0xff]   ;;  %v6218_v13 = vld [vmem:[%s7804_s1 + $0x10] sm:$0xff]   ;;  %vm1741_vm2 = vcmask 97280   ;;  %vm1762_vm3 = vcmask 1043456   ;;  %vm6528_vm4 = vmmov 1  }
  0x15   :  { %v6211_v6 = vld [vmem:[%s7804_s1 + $0xc0] sm:$0xff]   ;;  %5346 = vmatpush3.bf16.msra.mxu0 %v6210_v4  ;;  %v6215_v10 = vld [vmem:[%s7804_s1 + $0xc8] sm:$0xff]   ;;  %v6219_v14 = vld [vmem:[%s7804_s1 + $0xd0] sm:$0xff]   ;;  %vm1480_vm6 = vcmask 392192   ;;  %s6529_s27 = smov 32   ;;  %vm2701_vm11 = vcmask 523264  }
  0x16   :  { %v6212_v7 = vld [vmem:[%s7804_s1 + $0x80] sm:$0xff]   ;;  %5367 = vmatprep.subr.bf16.mxu1 %v6211_v6  ;;  %5347 = vmatprep.subr.bf16.mxu0 %v6213_v8  ;;  %v6216_v11 = vld [vmem:[%s7804_s1 + $0x88] sm:$0xff]   ;;  %v6220_v15 = vld [vmem:[%s7804_s1 + $0x90] sm:$0xff]   ;;  %vm5053_vm12 = vcmask 310272  }
  0x17   :  { %5368 = vmatpush3.bf16.msra.mxu1 %v6212_v7  ;;  %v6221_v16 = vld [vmem:[%s7804_s1 + $0x58] sm:$0xff]   ;;  %v6225_v20 = vld [vmem:[%s7804_s1 + $0x60] sm:$0xff]   ;;  %v6229_v24 = vld [vmem:[%s7804_s1 + $0x68] sm:$0xff]  }
  0x18   :  { %1564 = vadd.xlane.f32.xlu0 %v1563_v5  ;;  %5369 = vmatprep.subr.bf16.mxu1 %v6215_v10  ;;  %v6222_v17 = vld [vmem:[%s7804_s1 + $0x18] sm:$0xff]   ;;  %v6226_v21 = vld [vmem:[%s7804_s1 + $0x20] sm:$0xff]   ;;  %v6230_v25 = vld [vmem:[%s7804_s1 + $0x28] sm:$0xff]  }
  0x19   :  { %5348 = vmatpush3.bf16.msra.mxu0 %v6214_v9  ;;  %v6223_v18 = vld [vmem:[%s7804_s1 + $0xd8] sm:$0xff]   ;;  %v6227_v22 = vld [vmem:[%s7804_s1 + $0xe0] sm:$0xff]   ;;  %v6231_v26 = vld [vmem:[%s7804_s1 + $0xe8] sm:$0xff]  }
  0x1a   :  { %5349 = vmatprep.subr.bf16.mxu0 %v6217_v12  ;;  %v6224_v19 = vld [vmem:[%s7804_s1 + $0x98] sm:$0xff]   ;;  %v6228_v23 = vld [vmem:[%s7804_s1 + $0xa0] sm:$0xff]   ;;  %v6232_v27 = vld [vmem:[%s7804_s1 + $0xa8] sm:$0xff]  }
  0x1b   :  { %5370 = vmatpush3.bf16.msra.mxu1 %v6216_v11  ;;  %v6233_v28 = vld [vmem:[%s7804_s1 + $0x70] sm:$0xff]   ;;  %v6237_v32 = vld [vmem:[%s7804_s1 + $0x78] sm:$0xff]   ;;  %v35_v36 = vld [vmem:[%s7807_s4] sm:$0xff] }
  0x1c   :  { %5371 = vmatprep.subr.bf16.mxu1 %v6219_v14  ;;  %v6234_v29 = vld [vmem:[%s7804_s1 + $0x30] sm:$0xff]   ;;  %v6238_v33 = vld [vmem:[%s7804_s1 + $0x38] sm:$0xff]   ;;  %v5068_v37 = vcombine.low %v35_v36, %v35_v36  ;;  %v5069_v38 = vcombine.high %v35_v36, %v35_v36  ;;  %v6243_v39 = vld [vmem:[%s7804_s1 + $0x140] sm:$0xff]  }
  0x1d   :  { %5350 = vmatpush3.bf16.msra.mxu0 %v6218_v13  ;;  %v6235_v30 = vld [vmem:[%s7804_s1 + $0xf0] sm:$0xff]   ;;  %v6239_v34 = vld [vmem:[%s7804_s1 + $0xf8] sm:$0xff]   ;;  %v6244_v40 = vld [vmem:[%s7804_s1 + $0x100] sm:$0xff]  }
  0x1e   :  { %5351 = vmatprep.subr.bf16.mxu0 %v6221_v16  ;;  %v6236_v31 = vld [vmem:[%s7804_s1 + $0xb0] sm:$0xff]   ;;  %v6240_v35 = vld [vmem:[%s7804_s1 + $0xb8] sm:$0xff]   ;;  %1160 = vmatprep.mubr.bf16.mxu0 %v5069_v38  ;;  %v36_v41 = vld [vmem:[%s7807_s4 + $0x8] sm:$0xff] }
  0x1f   :  { %5372 = vmatpush3.bf16.msra.mxu1 %v6220_v15  ;;  %v5070_v42 = vcombine.low %v36_v41, %v36_v41  ;;  %v5071_v43 = vcombine.high %v36_v41, %v36_v41  ;;  %v6247_v44 = vld [vmem:[%s7804_s1 + $0x1c0] sm:$0xff]   ;;  %v6249_v46 = vld [vmem:[%s7804_s1 + $0x148] sm:$0xff]   ;;  %v6253_v50 = vld [vmem:[%s7804_s1 + $0x150] sm:$0xff]  }
  0x20   :  { %5373 = vmatprep.subr.bf16.mxu1 %v6223_v18  ;;  %v6248_v45 = vld [vmem:[%s7804_s1 + $0x180] sm:$0xff]   ;;  %v6250_v47 = vld [vmem:[%s7804_s1 + $0x108] sm:$0xff]   ;;  %v6254_v51 = vld [vmem:[%s7804_s1 + $0x110] sm:$0xff]  }
  0x21   :  { %5352 = vmatpush3.bf16.msra.mxu0 %v6222_v17  ;;  %1200 = vmatprep.mubr.bf16.mxu1 %v5071_v43  ;;  %v6251_v48 = vld [vmem:[%s7804_s1 + $0x1c8] sm:$0xff]   ;;  %v6255_v52 = vld [vmem:[%s7804_s1 + $0x1d0] sm:$0xff]   ;;  %v6257_v54 = vld [vmem:[%s7804_s1 + $0x158] sm:$0xff]  }
  0x22   :  { %5353 = vmatprep.subr.bf16.mxu0 %v6225_v20  ;;  %v6252_v49 = vld [vmem:[%s7804_s1 + $0x188] sm:$0xff]   ;;  %v6256_v53 = vld [vmem:[%s7804_s1 + $0x190] sm:$0xff]   ;;  %v6258_v55 = vld [vmem:[%s7804_s1 + $0x118] sm:$0xff]  }
  0x23   :  { %5374 = vmatpush3.bf16.msra.mxu1 %v6224_v19  ;;  %v6259_v56 = vld [vmem:[%s7804_s1 + $0x1d8] sm:$0xff]   ;;  %v6261_v58 = vld [vmem:[%s7804_s1 + $0x160] sm:$0xff]   ;;  %v6265_v62 = vld [vmem:[%s7804_s1 + $0x168] sm:$0xff]  }
  0x24   :  { %5375 = vmatprep.subr.bf16.mxu1 %v6227_v22  ;;  %v6260_v57 = vld [vmem:[%s7804_s1 + $0x198] sm:$0xff]   ;;  %v6262_v59 = vld [vmem:[%s7804_s1 + $0x120] sm:$0xff]   ;;  %v6266_v63 = vld [vmem:[%s7804_s1 + $0x128] sm:$0xff]  }
  0x25   :  { %5354 = vmatpush3.bf16.msra.mxu0 %v6226_v21  ;;  %v6263_v60 = vld [vmem:[%s7804_s1 + $0x1e0] sm:$0xff]   ;;  %v6267_v0 = vld [vmem:[%s7804_s1 + $0x1e8] sm:$0xff]   ;;  %v6269_v2 = vld [vmem:[%s7804_s1 + $0x170] sm:$0xff]  }
  0x26   :  { %5355 = vmatprep.subr.bf16.mxu0 %v6229_v24  ;;  %v6264_v61 = vld [vmem:[%s7804_s1 + $0x1a0] sm:$0xff]   ;;  %v6268_v1 = vld [vmem:[%s7804_s1 + $0x1a8] sm:$0xff]   ;;  %v6270_v3 = vld [vmem:[%s7804_s1 + $0x130] sm:$0xff]  }
  0x27   :  { %5376 = vmatpush3.bf16.msra.mxu1 %v6228_v23  ;;  %v6271_v4 = vld [vmem:[%s7804_s1 + $0x1f0] sm:$0xff]   ;;  %v6273_v6 = vld [vmem:[%s7804_s1 + $0x178] sm:$0xff]   ;;  %v6279_v13 = vld [vmem:[%s7804_s1 + $0x240] sm:$0xff]  }
  0x28   :  { %5377 = vmatprep.subr.bf16.mxu1 %v6231_v26  ;;  %v6272_v5 = vld [vmem:[%s7804_s1 + $0x1b0] sm:$0xff]   ;;  %v6274_v7 = vld [vmem:[%s7804_s1 + $0x138] sm:$0xff]   ;;  %v6280_v14 = vld [vmem:[%s7804_s1 + $0x200] sm:$0xff]  }
  0x29   :  { %5356 = vmatpush3.bf16.msra.mxu0 %v6230_v25  ;;  %v6275_v8 = vld [vmem:[%s7804_s1 + $0x1f8] sm:$0xff]   ;;  %v37_v10 = vld [vmem:[%s7807_s4 + $0x10] sm:$0xff]  ;;  %v6283_v18 = vld [vmem:[%s7804_s1 + $0x2c0] sm:$0xff]  }
  0x2a   :  { %5357 = vmatprep.subr.bf16.mxu0 %v6233_v28  ;;  %v6276_v9 = vld [vmem:[%s7804_s1 + $0x1b8] sm:$0xff]   ;;  %v5072_v11 = vcombine.low %v37_v10, %v37_v10  ;;  %v5073_v12 = vcombine.high %v37_v10, %v37_v10  ;;  %v6284_v19 = vld [vmem:[%s7804_s1 + $0x280] sm:$0xff]   ;;  %v6285_v20 = vld [vmem:[%s7804_s1 + $0x248] sm:$0xff]  }
  0x2b   :  { %5378 = vmatpush3.bf16.msra.mxu1 %v6232_v27  ;;  %v38_v15 = vld [vmem:[%s7807_s4 + $0x18] sm:$0xff]  ;;  %v6286_v21 = vld [vmem:[%s7804_s1 + $0x208] sm:$0xff]   ;;  %v6289_v24 = vld [vmem:[%s7804_s1 + $0x250] sm:$0xff]  }
  0x2c   :  { %5379 = vmatprep.subr.bf16.mxu1 %v6235_v30  ;;  %v5074_v16 = vcombine.low %v38_v15, %v38_v15  ;;  %v5075_v17 = vcombine.high %v38_v15, %v38_v15  ;;  %v6287_v22 = vld [vmem:[%s7804_s1 + $0x2c8] sm:$0xff]   ;;  %v6290_v25 = vld [vmem:[%s7804_s1 + $0x210] sm:$0xff]   ;;  %v6293_v28 = vld [vmem:[%s7804_s1 + $0x258] sm:$0xff]  }
  0x2d   :  { %5358 = vmatpush3.bf16.msra.mxu0 %v6234_v29  ;;  %v6288_v23 = vld [vmem:[%s7804_s1 + $0x288] sm:$0xff]   ;;  %v6291_v26 = vld [vmem:[%s7804_s1 + $0x2d0] sm:$0xff]   ;;  %v6294_v29 = vld [vmem:[%s7804_s1 + $0x218] sm:$0xff]  }
  0x2e   :  { %5359 = vmatprep.subr.bf16.mxu0 %v6237_v32  ;;  %v6292_v27 = vld [vmem:[%s7804_s1 + $0x290] sm:$0xff]   ;;  %v6295_v30 = vld [vmem:[%s7804_s1 + $0x2d8] sm:$0xff]   ;;  %v6297_v32 = vld [vmem:[%s7804_s1 + $0x260] sm:$0xff]  }
  0x2f   :  { %5380 = vmatpush3.bf16.msra.mxu1 %v6236_v31  ;;  %v6296_v31 = vld [vmem:[%s7804_s1 + $0x298] sm:$0xff]   ;;  %v6301_v36 = vld [vmem:[%s7804_s1 + $0x268] sm:$0xff]   ;;  %v6306_v41 = vld [vmem:[%s7804_s1 + $0x230] sm:$0xff]  }
  0x30   :  { %5381 = vmatprep.subr.bf16.mxu1 %v6239_v34  ;;  %v6299_v34 = vld [vmem:[%s7804_s1 + $0x2e0] sm:$0xff]   ;;  %v6303_v38 = vld [vmem:[%s7804_s1 + $0x2e8] sm:$0xff]   ;;  %v6308_v43 = vld [vmem:[%s7804_s1 + $0x2b0] sm:$0xff]  }
  0x31   :  { %5360 = vmatpush3.bf16.msra.mxu0 %v6238_v33  ;;  %v6298_v33 = vld [vmem:[%s7804_s1 + $0x220] sm:$0xff]   ;;  %v6337_v10 = vld [vmem:[%s7804_s1 + $0x368] sm:$0xff]   ;;  %v6342_v15 = vld [vmem:[%s7804_s1 + $0x330] sm:$0xff]  }
  0x32   :  { %5389 = vmatprep.subr.bf16.mxu0 %v6243_v39  ;;  %v6304_v39 = vld [vmem:[%s7804_s1 + $0x2a8] sm:$0xff]   ;;  %vm7046_vm5 = vmpackc.low %vm1762_vm3, %vm6528_vm4 }
  0x33   :  { %5382 = vmatpush3.bf16.msra.mxu1 %v6240_v35  ;;  %v6300_v35 = vld [vmem:[%s7804_s1 + $0x2a0] sm:$0xff]  }
  0x34   :  { %1161 = vmatmul.mubr.bf16.vlgmr.msra.gmra.mrb[0].mxu0 %v5068_v37  ;;  %5411 = vmatprep.subr.bf16.mxu1 %v6247_v44  ;;  %v6302_v37 = vld [vmem:[%s7804_s1 + $0x228] sm:$0xff]   ;;  %v6309_v44 = vld [vmem:[%s7804_s1 + $0x278] sm:$0xff]  }
  0x35   :  { %5390 = vmatpush3.bf16.msra.mxu0 %v6244_v40  ;;  %1240 = vmatprep.mubr.bf16.mxu0 %v5073_v12  ;;  %v6305_v40 = vld [vmem:[%s7804_s1 + $0x270] sm:$0xff]   ;;  %v6339_v12 = vld [vmem:[%s7804_s1 + $0x3e8] sm:$0xff]  }
  0x36   :  { %1201 = vmatmul.mubr.bf16.vlgmr.msra.gmra.mrb[0].mxu1 %v5070_v42  ;;  %5391 = vmatprep.subr.bf16.mxu0 %v6249_v46  ;;  %v6307_v42 = vld [vmem:[%s7804_s1 + $0x2f0] sm:$0xff]   ;;  %v6311_v46 = vld [vmem:[%s7804_s1 + $0x2f8] sm:$0xff]  }
  0x37   :  { %5412 = vmatpush3.bf16.msra.mxu1 %v6248_v45  ;;  %1280 = vmatprep.mubr.bf16.mxu1 %v5075_v17  ;;  %v6310_v45 = vld [vmem:[%s7804_s1 + $0x238] sm:$0xff]   ;;  %v6344_v17 = vld [vmem:[%s7804_s1 + $0x3b0] sm:$0xff]  }
  0x38   :  { %5413 = vmatprep.subr.bf16.mxu1 %v6251_v48  ;;  %v39_v48 = vld [vmem:[%s7807_s4 + $0x20] sm:$0xff] }
  0x39   :  { %5392 = vmatpush3.bf16.msra.mxu0 %v6250_v47  ;;  %v6312_v47 = vld [vmem:[%s7804_s1 + $0x2b8] sm:$0xff]  }
  0x3a   :  { %5393 = vmatprep.subr.bf16.mxu0 %v6253_v50  ;;  %v5077_v50 = vcombine.high %v39_v48, %v39_v48 }
  0x3b   :  { %5414 = vmatpush3.bf16.msra.mxu1 %v6252_v49  ;;  %v5076_v49 = vcombine.low %v39_v48, %v39_v48 }
  0x3c   :  { %5415 = vmatprep.subr.bf16.mxu1 %v6255_v52  ;;  %v6316_v52 = vld [vmem:[%s7804_s1 + $0x300] sm:$0xff]  }
  0x3d   :  { %5394 = vmatpush3.bf16.msra.mxu0 %v6254_v51  ;;  %v6315_v51 = vld [vmem:[%s7804_s1 + $0x340] sm:$0xff]  }
  0x3e   :  { %5395 = vmatprep.subr.bf16.mxu0 %v6257_v54 }
  0x3f   :  { %5416 = vmatpush3.bf16.msra.mxu1 %v6256_v53  ;;  %v40_v53 = vld [vmem:[%s7807_s4 + $0x28] sm:$0xff] }
  0x40   :  { %5417 = vmatprep.subr.bf16.mxu1 %v6259_v56  ;;  %v5078_v54 = vcombine.low %v40_v53, %v40_v53  ;;  %v6319_v56 = vld [vmem:[%s7804_s1 + $0x3c0] sm:$0xff]  }
  0x41   :  { %5396 = vmatpush3.bf16.msra.mxu0 %v6258_v55  ;;  %v5079_v55 = vcombine.high %v40_v53, %v40_v53 }
  0x42   :  { %5397 = vmatprep.subr.bf16.mxu0 %v6261_v58  ;;  %v6321_v58 = vld [vmem:[%s7804_s1 + $0x348] sm:$0xff]  }
  0x43   :  { %5418 = vmatpush3.bf16.msra.mxu1 %v6260_v57  ;;  %v6320_v57 = vld [vmem:[%s7804_s1 + $0x380] sm:$0xff]  }
  0x44   :  { %5419 = vmatprep.subr.bf16.mxu1 %v6263_v60  ;;  %v6323_v60 = vld [vmem:[%s7804_s1 + $0x3c8] sm:$0xff]  }
  0x45   :  { %5398 = vmatpush3.bf16.msra.mxu0 %v6262_v59  ;;  %v6322_v59 = vld [vmem:[%s7804_s1 + $0x308] sm:$0xff]  }
  0x46   :  { %5399 = vmatprep.subr.bf16.mxu0 %v6265_v62  ;;  %v6325_v62 = vld [vmem:[%s7804_s1 + $0x350] sm:$0xff]  }
  0x47   :  { %5420 = vmatpush3.bf16.msra.mxu1 %v6264_v61  ;;  %v6324_v61 = vld [vmem:[%s7804_s1 + $0x388] sm:$0xff]  }
  0x48   :  { %5421 = vmatprep.subr.bf16.mxu1 %v6267_v0  ;;  %v6327_v0 = vld [vmem:[%s7804_s1 + $0x3d0] sm:$0xff]  }
  0x49   :  { %5400 = vmatpush3.bf16.msra.mxu0 %v6266_v63  ;;  %v6326_v63 = vld [vmem:[%s7804_s1 + $0x310] sm:$0xff]  }
  0x4a   :  { %5401 = vmatprep.subr.bf16.mxu0 %v6269_v2  ;;  %v6329_v2 = vld [vmem:[%s7804_s1 + $0x358] sm:$0xff]  }
  0x4b   :  { %5422 = vmatpush3.bf16.msra.mxu1 %v6268_v1  ;;  %v6328_v1 = vld [vmem:[%s7804_s1 + $0x390] sm:$0xff]  }
  0x4c   :  { %5423 = vmatprep.subr.bf16.mxu1 %v6271_v4  ;;  %v6331_v4 = vld [vmem:[%s7804_s1 + $0x3d8] sm:$0xff]  }
  0x4d   :  { %5402 = vmatpush3.bf16.msra.mxu0 %v6270_v3  ;;  %v6330_v3 = vld [vmem:[%s7804_s1 + $0x318] sm:$0xff]  }
  0x4e   :  { %5403 = vmatprep.subr.bf16.mxu0 %v6273_v6  ;;  %v6333_v6 = vld [vmem:[%s7804_s1 + $0x360] sm:$0xff]  }
  0x4f   :  { %5424 = vmatpush3.bf16.msra.mxu1 %v6272_v5  ;;  %v6332_v5 = vld [vmem:[%s7804_s1 + $0x398] sm:$0xff]  }
  0x50   :  { %5425 = vmatprep.subr.bf16.mxu1 %v6275_v8  ;;  %v6335_v8 = vld [vmem:[%s7804_s1 + $0x3e0] sm:$0xff]  }
  0x51   :  { %5404 = vmatpush3.bf16.msra.mxu0 %v6274_v7  ;;  %v6334_v7 = vld [vmem:[%s7804_s1 + $0x320] sm:$0xff]  }
  0x52   :  { %5433 = vmatprep.subr.bf16.mxu0 %v6279_v13  ;;  %v6340_v13 = vld [vmem:[%s7804_s1 + $0x3a8] sm:$0xff]  }
  0x53   :  { %5426 = vmatpush3.bf16.msra.mxu1 %v6276_v9  ;;  %v6336_v9 = vld [vmem:[%s7804_s1 + $0x3a0] sm:$0xff]  }
  0x54   :  { %1241 = vmatmul.mubr.bf16.vlgmr.msra.gmra.mrb[4].mxu0 %v5072_v11  ;;  %5455 = vmatprep.subr.bf16.mxu1 %v6283_v18  ;;  %v6338_v11 = vld [vmem:[%s7804_s1 + $0x328] sm:$0xff]   ;;  %v6345_v18 = vld [vmem:[%s7804_s1 + $0x378] sm:$0xff]  }
  0x55   :  { %5434 = vmatpush3.bf16.msra.mxu0 %v6280_v14  ;;  %1320 = vmatprep.mubr.bf16.mxu0 %v5077_v50  ;;  %v6341_v14 = vld [vmem:[%s7804_s1 + $0x370] sm:$0xff]  }
  0x56   :  { %1281 = vmatmul.mubr.bf16.vlgmr.msra.gmra.mrb[4].mxu1 %v5074_v16  ;;  %5435 = vmatprep.subr.bf16.mxu0 %v6285_v20  ;;  %v6343_v16 = vld [vmem:[%s7804_s1 + $0x3f0] sm:$0xff]   ;;  %v6347_v20 = vld [vmem:[%s7804_s1 + $0x3f8] sm:$0xff]  }
  0x57   :  { %5456 = vmatpush3.bf16.msra.mxu1 %v6284_v19  ;;  %1360 = vmatprep.mubr.bf16.mxu1 %v5079_v55  ;;  %v6346_v19 = vld [vmem:[%s7804_s1 + $0x338] sm:$0xff]  }
  0x58   :  { %5457 = vmatprep.subr.bf16.mxu1 %v6287_v22 }
  0x59   :  { %5436 = vmatpush3.bf16.msra.mxu0 %v6286_v21  ;;  %v41_v21 = vld [vmem:[%s7807_s4 + $0x30] sm:$0xff] }
  0x5a   :  { %5437 = vmatprep.subr.bf16.mxu0 %v6289_v24  ;;  %v5080_v22 = vcombine.low %v41_v21, %v41_v21  ;;  %v6350_v24 = vld [vmem:[%s7804_s1 + $0x3b8] sm:$0xff]  }
  0x5b   :  { %5458 = vmatpush3.bf16.msra.mxu1 %v6288_v23  ;;  %v5081_v23 = vcombine.high %v41_v21, %v41_v21 }
  0x5c   :  { %5459 = vmatprep.subr.bf16.mxu1 %v6291_v26 }
  0x5d   :  { %5438 = vmatpush3.bf16.msra.mxu0 %v6290_v25  ;;  %v42_v25 = vld [vmem:[%s7807_s4 + $0x38] sm:$0xff]  ;;  %s6530_s4 = smov 64  }
  0x5e   :  { %5439 = vmatprep.subr.bf16.mxu0 %v6293_v28  ;;  %v5082_v26 = vcombine.low %v42_v25, %v42_v25 }
  0x5f   :  { %5460 = vmatpush3.bf16.msra.mxu1 %v6292_v27  ;;  %v5083_v27 = vcombine.high %v42_v25, %v42_v25 }
  0x60   :  { %5461 = vmatprep.subr.bf16.mxu1 %v6295_v30  ;;  %v6992_v30 = vld [vmem:[%s7806_s3] sm:$0xff] }
  0x61   :  { %5440 = vmatpush3.bf16.msra.mxu0 %v6294_v29 }
  0x62   :  { %5441 = vmatprep.subr.bf16.mxu0 %v6297_v32 }
  0x63   :  { %5462 = vmatpush3.bf16.msra.mxu1 %v6296_v31 }
  0x64   :  { %5463 = vmatprep.subr.bf16.mxu1 %v6299_v34 }
  0x65   :  { %5442 = vmatpush3.bf16.msra.mxu0 %v6298_v33 }
  0x66   :  { %5443 = vmatprep.subr.bf16.mxu0 %v6301_v36 }
  0x67   :  { %5464 = vmatpush3.bf16.msra.mxu1 %v6300_v35  ;;  %v6998_v35 = vld [vmem:[%s7806_s3 + $0x8] sm:$0xff] }
  0x68   :  { %5465 = vmatprep.subr.bf16.mxu1 %v6303_v38 }
  0x69   :  { %5444 = vmatpush3.bf16.msra.mxu0 %v6302_v37 }
  0x6a   :  { %5445 = vmatprep.subr.bf16.mxu0 %v6305_v40  ;;  %v6353_v40 = vld [vmem:[%s7803_s0 + $0x18] sm:$0xff]  }
  0x6b   :  { %5466 = vmatpush3.bf16.msra.mxu1 %v6304_v39 }
  0x6c   :  { %5467 = vmatprep.subr.bf16.mxu1 %v6307_v42  ;;  %v6354_v42 = vld [vmem:[%s7803_s0 + $0x20] sm:$0xff]  }
  0x6d   :  { %5446 = vmatpush3.bf16.msra.mxu0 %v6306_v41  ;;  %v6525_v41 = vmov 0.0  }
  0x6e   :  { %5447 = vmatprep.subr.bf16.mxu0 %v6309_v44  ;;  %1557 = vst.msk [vmem:[#allocation2] sm:$0xff] %vm1556_vm0, %v6525_v41  ;;  %v5067_v44 = vld [vmem:[#allocation3] ss:$0 sm:$0xff] }
  0x6f   :  { %5468 = vmatpush3.bf16.msra.mxu1 %v6308_v43 }
  0x70   :  { %5469 = vmatprep.subr.bf16.mxu1 %v6311_v46 }
  0x71   :  { %5448 = vmatpush3.bf16.msra.mxu0 %v6310_v45 }
  0x72   :  { %5477 = vmatprep.subr.bf16.mxu0 %v6315_v51 }
  0x73   :  { %5470 = vmatpush3.bf16.msra.mxu1 %v6312_v47 }
  0x74   :  { %1321 = vmatmul.mubr.bf16.vlgmr.msra.gmra.mrb[8].mxu0 %v5076_v49  ;;  %5499 = vmatprep.subr.bf16.mxu1 %v6319_v56 }
  0x75   :  { %5478 = vmatpush3.bf16.msra.mxu0 %v6316_v52  ;;  %1400 = vmatprep.mubr.bf16.mxu0 %v5081_v23 }
  0x76   :  { %1361 = vmatmul.mubr.bf16.vlgmr.msra.gmra.mrb[8].mxu1 %v5078_v54  ;;  %5479 = vmatprep.subr.bf16.mxu0 %v6321_v58 }
  0x77   :  { %5500 = vmatpush3.bf16.msra.mxu1 %v6320_v57  ;;  %1440 = vmatprep.mubr.bf16.mxu1 %v5083_v27 }
  0x78   :  { %5501 = vmatprep.subr.bf16.mxu1 %v6323_v60 }
  0x79   :  { %5480 = vmatpush3.bf16.msra.mxu0 %v6322_v59 }
  0x7a   :  { %5481 = vmatprep.subr.bf16.mxu0 %v6325_v62 }
  0x7b   :  { %5502 = vmatpush3.bf16.msra.mxu1 %v6324_v61 }
  0x7c   :  { %5503 = vmatprep.subr.bf16.mxu1 %v6327_v0 }
  0x7d   :  { %5482 = vmatpush3.bf16.msra.mxu0 %v6326_v63 }
  0x7e   :  { %5483 = vmatprep.subr.bf16.mxu0 %v6329_v2 }
  0x7f   :  { %5504 = vmatpush3.bf16.msra.mxu1 %v6328_v1 }
  0x80   :  { %5505 = vmatprep.subr.bf16.mxu1 %v6331_v4 }
  0x81   :  { %5484 = vmatpush3.bf16.msra.mxu0 %v6330_v3 }
  0x82   :  { %5485 = vmatprep.subr.bf16.mxu0 %v6333_v6 }
  0x83   :  { %5506 = vmatpush3.bf16.msra.mxu1 %v6332_v5 }
  0x84   :  { %5507 = vmatprep.subr.bf16.mxu1 %v6335_v8 }
  0x85   :  { %5486 = vmatpush3.bf16.msra.mxu0 %v6334_v7 }
  0x86   :  { %5487 = vmatprep.subr.bf16.mxu0 %v6337_v10 }
  0x87   :  { %5508 = vmatpush3.bf16.msra.mxu1 %v6336_v9 }
  0x88   :  { %5509 = vmatprep.subr.bf16.mxu1 %v6339_v12 }
  0x89   :  { %5488 = vmatpush3.bf16.msra.mxu0 %v6338_v11 }
  0x8a   :  { %5489 = vmatprep.subr.bf16.mxu0 %v6341_v14 }
  0x8b   :  { %5510 = vmatpush3.bf16.msra.mxu1 %v6340_v13 }
  0x8c   :  { %5511 = vmatprep.subr.bf16.mxu1 %v6343_v16 }
  0x8d   :  { %5490 = vmatpush3.bf16.msra.mxu0 %v6342_v15 }
  0x8e   :  { %5491 = vmatprep.subr.bf16.mxu0 %v6345_v18 }
  0x8f   :  { %5512 = vmatpush3.bf16.msra.mxu1 %v6344_v17 }
  0x90   :  { %5513 = vmatprep.subr.bf16.mxu1 %v6347_v20 }
  0x91   :  { %5492 = vmatpush3.bf16.msra.mxu0 %v6346_v19 }
  0x92   :  { %5693 = vmatprep.subr.bf16.mxu0 %v6525_v41 }
  0x93   :  { %5514 = vmatpush3.bf16.msra.mxu1 %v6350_v24 }
  0x94   :  { %1401 = vmatmul.mubr.bf16.vlgmr.msra.gmra.mrb[12].mxu0 %v5080_v22  ;;  %5703 = vmatprep.subr.bf16.mxu1 %v6525_v41 }
  0x95   :  { %5699 = vmatprep.mubr.msk.bf16.mxu0 %vm6526_vm1, %v6525_v41 }
  0x96   :  { %1441 = vmatmul.mubr.bf16.vlgmr.msra.gmra.mrb[12].mxu1 %v5082_v26 }
  0x97   :  { %5704 = vmatpush3.bf16.msra.mxu1 %v6353_v40  ;;  %5707 = vmatprep.mubr.msk.bf16.mxu1 %vm6526_vm1, %v6525_v41 }
  0x98   :  { %5705 = vmatprep.subr.bf16.mxu1 %v6525_v41 }
  0x9b   :  { %5706 = vmatpush3.bf16.msra.mxu1 %v6354_v42  ;;  %v6355_v42 = vld [vmem:[%s7803_s0 + $0x28] sm:$0xff]  }
  0x9c   :  { %5711 = vmatprep.subr.bf16.mxu1 %v6525_v41 }
  0xa1   :  { %v1562_v28 = vpop.xlane.xlu0 %1561 }
  0xa2   :  { %v1567_v29 = vmul.f32 0.03125, %v1562_v28 }
  0xa4   :  { %v1569_v31 = vsub.f32 %v6992_v30, %v1567_v29 }
  0xa5   :  { %v1565_v32 = vpop.xlane.xlu0 %1564 }
  0xa6   :  { %v1568_v33 = vmul.f32 0.03125, %v1565_v32  ;;  %v1571_v34 = vmul.f32 %v1569_v31, %v1569_v31 }
  0xa8   :  { %v1570_v36 = vsub.f32 %v6998_v35, %v1568_v33  ;;  %v1573_v37 = vsel %vm1556_vm0, %v1571_v34, 0.0 }
  0xa9   :  { %1574 = vadd.xlane.f32.xlu1 %v1573_v37 }
  0xaa   :  { %v1572_v38 = vmul.f32 %v1570_v36, %v1570_v36 }
  0xac   :  { %v1576_v39 = vsel %vm1556_vm0, %v1572_v38, 0.0 }
  0xad   :  { %1577 = vadd.xlane.f32.xlu1 %v1576_v39 }
 0x107   :  { %v5361_v43 = vpop.f32.mrb[0].mxu0 }
 0x108   :  { %v5362_v45 = vpop.f32.mrb[1].mxu0 }
 0x109   :  { %v5363_v46 = vadd.f32 %v5362_v45, %v5361_v43  ;;  %v5364_v47 = vpop.f32.mrb[2].mxu0  ;;  %v5383_v48 = vpop.f32.mrb[0].mxu1  ;;  %v5217_v43 = vld [vmem:[#allocation3 + $0x20] ss:$0 sm:$0xff] }
 0x10a   :  { %v5365_v49 = vpop.f32.mrb[3].mxu0  ;;  %v5384_v51 = vpop.f32.mrb[1].mxu1 }
 0x10b   :  { %v1163_v50 = vadd.f32 %v5363_v46, %v5067_v44  ;;  %v5385_v52 = vadd.f32 %v5384_v51, %v5383_v48  ;;  %v5386_v53 = vpop.f32.mrb[2].mxu1 }
 0x10c   :  { %v5387_v54 = vpop.f32.mrb[3].mxu1 }
 0x10d   :  { %v1203_v55 = vadd.f32 %v5385_v52, %v1163_v50 }
 0x127   :  { %v5405_v56 = vpop.f32.mrb[4].mxu0 }
 0x128   :  { %v5406_v57 = vpop.f32.mrb[5].mxu0 }
 0x129   :  { %v5407_v58 = vadd.f32 %v5406_v57, %v5405_v56  ;;  %v5408_v59 = vpop.f32.mrb[6].mxu0  ;;  %v5427_v60 = vpop.f32.mrb[4].mxu1 }
 0x12a   :  { %v5409_v61 = vpop.f32.mrb[7].mxu0  ;;  %v5428_v62 = vpop.f32.mrb[5].mxu1 }
 0x12b   :  { %v1243_v63 = vadd.f32 %v5407_v58, %v1203_v55  ;;  %v5429_v0 = vadd.f32 %v5428_v62, %v5427_v60  ;;  %v5430_v1 = vpop.f32.mrb[6].mxu1  ;;  %v6356_v55 = vld [vmem:[%s7803_s0 + $0x30] sm:$0xff]  }
 0x12c   :  { %v5431_v2 = vpop.f32.mrb[7].mxu1 }
 0x12d   :  { %v1283_v3 = vadd.f32 %v5429_v0, %v1243_v63  ;;  %v5223_v0 = vld [vmem:[#allocation3 + $0x28] ss:$0 sm:$0xff] }
 0x136   :  { %v1575_v4 = vpop.xlane.xlu1 %1574 }
 0x137   :  { %v1579_v5 = vmul.f32 0.03125, %v1575_v4 }
 0x139   :  { %v1581_v6 = vadd.f32 1e-05, %v1579_v5 }
 0x13a   :  { %v1578_v7 = vpop.xlane.xlu1 %1577 }
 0x13b   :  { %v1580_v8 = vmul.f32 0.03125, %v1578_v7  ;;  %6400 = vrsqrt.f32 %v1581_v6 }
 0x13d   :  { %v1582_v9 = vadd.f32 1e-05, %v1580_v8 }
 0x13f   :  { %6402 = vrsqrt.f32 %v1582_v9  ;;  %v1754_v9 = vld [vmem:[#allocation3 + $0x68] sm:$0xff] }
 0x145   :  { %v6401_v10 = vpop.eup %6400 }
 0x146   :  { %v1585_v12 = vmul.f32 %v6401_v10, %v1569_v31  ;;  %v1755_v10 = vld [vmem:[#allocation3 + $0x70] sm:$0xf] }
 0x147   :  { %v5449_v14 = vpop.f32.mrb[8].mxu0 }
 0x148   :  { %v5450_v16 = vpop.f32.mrb[9].mxu0 }
 0x149   :  { %v6403_v11 = vpop.eup %6402  ;;  %v5451_v17 = vadd.f32 %v5450_v16, %v5449_v14  ;;  %v5452_v18 = vpop.f32.mrb[10].mxu0  ;;  %v6358_v14 = vld [vmem:[%s7803_s0 + $0x8] sm:$0xff]  }
 0x14a   :  { %v1586_v13 = vmul.f32 %v6403_v11, %v1570_v36  ;;  %v5471_v19 = vpop.f32.mrb[8].mxu1  ;;  %v5453_v20 = vpop.f32.mrb[11].mxu0  ;;  %v6078_v11 = vpack.c.bf16 %v1755_v10, %v1754_v9 }
 0x14b   :  { %v5472_v21 = vpop.f32.mrb[9].mxu1  ;;  %v1323_v22 = vadd.f32 %v5451_v17, %v1283_v3 }
 0x14c   :  { %v1591_v15 = vpack.c.bf16 %v1586_v13, %v1585_v12  ;;  %v5473_v23 = vadd.f32 %v5472_v21, %v5471_v19  ;;  %v5474_v24 = vpop.f32.mrb[10].mxu1  ;;  %v6357_v13 = vld [vmem:[%s7803_s0] sm:$0xff]   ;;  %v6383_v12 = vld [vmem:[%s7803_s0 + $0xf0] sm:$0xff]  }
 0x14d   :  { %v5475_v25 = vpop.f32.mrb[11].mxu1  ;;  %5694 = vmatpush3.bf16.msra.mxu0 %v6357_v13  ;;  %v1448_v24 = vld [vmem:[%s7806_s3 + $0x30] sm:$0xff] }
 0x14e   :  { %5708 = vmatmul.mubr.msk.bf16.vlgmr.msra.gmra.mrb[16].mxu1 %vm1556_vm0, %v1591_v15  ;;  %v1363_v26 = vadd.f32 %v5473_v23, %v1323_v22  ;;  %5695 = vmatprep.subr.bf16.mxu0 %v6525_v41  ;;  %v6359_v23 = vld [vmem:[%s7803_s0 + $0x10] sm:$0xff]   ;;  %v1449_v25 = vld [vmem:[%s7806_s3 + $0x38] sm:$0xff] }
 0x14f   :  { %5715 = vmatprep.mubr.msk.bf16.mxu1 %vm6526_vm1, %v6525_v41  ;;  %5712 = vmatpush3.bf16.msra.mxu1 %v6355_v42 }
 0x150   :  { %5713 = vmatprep.subr.bf16.mxu1 %v6525_v41 }
 0x151   :  { %5696 = vmatpush3.bf16.msra.mxu0 %v6358_v14 }
 0x152   :  { %5697 = vmatprep.subr.bf16.mxu0 %v6525_v41 }
 0x153   :  { %5714 = vmatpush3.bf16.msra.mxu1 %v6356_v55 }
 0x154   :  { %6080 = vmatprep.subr.msk.bf16.mxu1 %vm7046_vm5, %v6078_v11 }
 0x155   :  { %5698 = vmatpush3.bf16.msra.mxu0 %v6359_v23 }
 0x167   :  { %v5493_v27 = vpop.f32.mrb[12].mxu0 }
 0x168   :  { %v5494_v28 = vpop.f32.mrb[13].mxu0 }
 0x169   :  { %v5495_v29 = vadd.f32 %v5494_v28, %v5493_v27  ;;  %v5515_v31 = vpop.f32.mrb[12].mxu1  ;;  %v5496_v32 = vpop.f32.mrb[14].mxu0  ;;  %v1456_v27 = vpack.c.bf16 %v1449_v25, %v1448_v24  ;;  %v1848_v28 = vld [vmem:[#allocation3 + $0x80] sm:$0xf] }
 0x16a   :  { %v5516_v33 = vpop.f32.mrb[13].mxu1  ;;  %v5497_v34 = vpop.f32.mrb[15].mxu0 }
 0x16b   :  { %v1403_v36 = vadd.f32 %v5495_v29, %v1363_v26  ;;  %v5517_v37 = vadd.f32 %v5516_v33, %v5515_v31  ;;  %v5518_v38 = vpop.f32.mrb[14].mxu1  ;;  %v1847_v26 = vld [vmem:[#allocation3 + $0x78] sm:$0xff]  ;;  %v1943_v29 = vld [vmem:[#allocation3 + $0x88] sm:$0xff]  ;;  %v1944_v31 = vld [vmem:[#allocation3 + $0x90] sm:$0xf]  ;;  %5700 = vmatmul.mubr.msk.bf16.vlgmr.msra.gmra.mrb[16].mxu0 %vm1480_vm6, %v1456_v27 }
 0x16c   :  { %v5519_v39 = vpop.f32.mrb[15].mxu1  ;;  %v6084_v32 = vpack.c.bf16 %v1848_v28, %v1847_v26  ;;  %v6090_v33 = vpack.c.bf16 %v1944_v31, %v1943_v29  ;;  %v2033_v34 = vld [vmem:[#allocation3 + $0x98] sm:$0xff] }
 0x16d   :  { %v7022_v40 = vadd.f32 %v5517_v37, %v1403_v36  ;;  %v2034_v36 = vld [vmem:[#allocation3 + $0xa0] sm:$0xf] }
 0x16e   :  { %6086 = vmatprep.subr.msk.bf16.mxu0 %vm7046_vm5, %v6084_v32  ;;  %v6096_v37 = vpack.c.bf16 %v2034_v36, %v2033_v34 }
 0x16f   :  { %6089 = vmatpush3.bf16.msk.msra.mxu0 %vm7046_vm5, %v6084_v32  ;;  %v7143_v32 = vld [vmem:[#allocation3 + $0x140] sm:$0xff] }
 0x170   :  { %6098 = vmatprep.subr.msk.bf16.mxu0 %vm7046_vm5, %v6096_v37 }
 0x221   :  { %v1646_v44 = vpop.f32.mrb[16].mxu1 }
 0x222   :  { %v1647_v45 = vadd.f32 %v5217_v43, %v1646_v44  ;;  %v5709_v46 = vpop.f32.mrb[17].mxu1 }
 0x223   :  { %v1649_v47 = vpop.f32.mrb[18].mxu1 }
 0x224   :  { %v5221_v48 = vmul.f32 -1.442695, %v1647_v45  ;;  %v1650_v49 = vadd.f32 %v5217_v43, %v1649_v47  ;;  %v5710_v50 = vpop.f32.mrb[19].mxu1 }
 0x226   :  { %6404 = vpow2.f32 %v5221_v48  ;;  %v5222_v51 = vmul.f32 -1.442695, %v1650_v49  ;;  %v6360_v48 = vld [vmem:[%s7803_s0 + $0x38] sm:$0xff]  }
 0x228   :  { %6406 = vpow2.f32 %v5222_v51 }
 0x230   :  { %v6405_v52 = vpop.eup %6404 }
 0x231   :  { %v1659_v53 = vadd.f32 1.0, %v6405_v52 }
 0x232   :  { %v6407_v54 = vpop.eup %6406 }
 0x233   :  { %6408 = vrcp.f32 %v1659_v53  ;;  %v1660_v56 = vadd.f32 1.0, %v6407_v54  ;;  %v6361_v53 = vld [vmem:[%s7803_s0 + $0x40] sm:$0xff]   ;;  %v1529_v54 = vlaneseq }
 0x235   :  { %6410 = vrcp.f32 %v1660_v56  ;;  %v1530_v55 = vshrl.u32 %v1529_v54, 7 }
 0x237   :  { %v1531_v56 = vadd.s32 8, %v1530_v55 }
 0x23d   :  { %v6409_v57 = vpop.eup %6408 }
 0x23e   :  { %1667 = vrot.lane.b32.xlu0 %v6409_v57, %s6527_s7  ;;  %v1543_v57 = vand.u32 7, %v1531_v56 }
 0x23f   :  { %v6411_v58 = vpop.eup %6410 }
 0x240   :  { %1669 = vrot.lane.b32.xlu1 %v6411_v58, %s6527_s7  ;;  %v1536_v58 = vand.u32 7, %v1530_v55  ;;  %vm7109_vm7 = vcmp.ge.s32.totalorder %v1543_v57, 2  ;;  %vm7113_vm8 = vcmp.ge.s32.totalorder %v1543_v57, 1 }
 0x242   :  { %vm7117_vm9 = vcmp.ge.s32.totalorder %v1536_v58, 2  ;;  %vm7121_vm10 = vcmp.ge.s32.totalorder %v1536_v58, 1 }
 0x2b0   :  { %v1668_v59 = vpop.permute.xlu0 %1667 }
 0x2b1   :  { %v7033_v60 = vmul.f32 %v1668_v59, %v1647_v45 }
 0x2b2   :  { %v1670_v61 = vpop.permute.xlu1 %1669 }
 0x2b3   :  { %1845 = vst.msk [vmem:[#allocation2 + $0x8] sm:$0xff] %vm1556_vm0, %v7033_v60  ;;  %v7037_v62 = vmul.f32 %v1670_v61, %v1650_v49  ;;  %v7101_v49 = vpop.f32.mrb[16].mxu0 }
 0x2b4   :  { %v5701_v50 = vpop.f32.mrb[17].mxu0 }
 0x2b5   :  { %v1679_v63 = vpack.c.bf16 %v7037_v62, %v7033_v60  ;;  %1846 = vst.msk [vmem:[#allocation2 + $0x10] sm:$0xff] %vm1556_vm0, %v7037_v62  ;;  %v7103_v51 = vpop.f32.mrb[18].mxu0 }
 0x2b6   :  { %v5702_v52 = vpop.f32.mrb[19].mxu0 }
 0x2b7   :  { %5716 = vmatmul.mubr.msk.bf16.vlgmr.msra.gmra.mrb[20].mxu1 %vm1556_vm0, %v1679_v63 }
 0x2b8   :  { %6083 = vmatpush3.bf16.msk.msra.mxu1 %vm7046_vm5, %v6078_v11 }
 0x2b9   :  { %6092 = vmatprep.subr.msk.bf16.mxu1 %vm7046_vm5, %v6090_v33 }
 0x2bc   :  { %v1934_v59 = vld [vmem:[#allocation2 + $0xe] sm:$0xff] }
 0x2bd   :  { %v2024_v63 = vld [vmem:[#allocation2 + $0xf] sm:$0xff] }
 0x38a   :  { %v1734_v1 = vpop.f32.mrb[20].mxu1 }
 0x38b   :  { %v1735_v2 = vadd.f32 %v5223_v0, %v1734_v1  ;;  %v5717_v3 = vpop.f32.mrb[21].mxu1  ;;  %v1933_v1 = vld [vmem:[#allocation2 + $0x6] sm:$0xff] }
 0x38c   :  { %v1737_v4 = vpop.f32.mrb[22].mxu1  ;;  %v2023_v3 = vld [vmem:[#allocation2 + $0x7] sm:$0xff]  ;;  %v1937_v13 = vsel %vm7117_vm9, %v1933_v1, 0.0 }
 0x38d   :  { %v1738_v5 = vadd.f32 %v5223_v0, %v1737_v4  ;;  %v5718_v6 = vpop.f32.mrb[23].mxu1  ;;  %v1742_v7 = vsel %vm1741_vm2, %v1735_v2, -inf  ;;  %v5304_v4 = vld [vmem:[#allocation3 + $0xb8] ss:$0 sm:$0xff] }
 0x38e   :  { %1743 = vmax.xlane.f32.xlu1 %v1742_v7  ;;  %v1938_v6 = vsel %vm7109_vm7, %v1934_v59, 0.0 }
 0x38f   :  { %v1745_v8 = vsel %vm1741_vm2, %v1738_v5, -inf }
 0x390   :  { %1746 = vmax.xlane.f32.xlu0 %v1745_v8  ;;  %v2028_v8 = vsel %vm7113_vm8, %v2024_v63, 0.0 }
 0x41b   :  { %v1744_v15 = vpop.xlane.xlu1 %1743 }
 0x41c   :  { %v1748_v16 = vsub.f32 %v1735_v2, %v1744_v15  ;;  %v2027_v15 = vsel %vm7121_vm10, %v2023_v3, 0.0  ;;  %v6362_v3 = vld [vmem:[%s7803_s0 + $0x48] sm:$0xff]  }
 0x41d   :  { %v1747_v17 = vpop.xlane.xlu0 %1746 }
 0x41e   :  { %v1750_v18 = vmul.f32 1.442695, %v1748_v16  ;;  %v1749_v19 = vsub.f32 %v1738_v5, %v1747_v17  ;;  %v7133_v16 = vld [vmem:[#allocation3 + $0x130] sm:$0xff]  ;;  %v7135_v17 = vld [vmem:[#allocation3 + $0x138] sm:$0xff] }
 0x41f   :  { %v2283_v23 = vmul.f32 %v7133_v16, %v7022_v40  ;;  %v2284_v24 = vmul.f32 %v7135_v17, %v7022_v40 }
 0x420   :  { %6412 = vpow2.f32 %v1750_v18  ;;  %v1752_v20 = vmul.f32 1.442695, %v1749_v19 }
 0x421   :  { %v2308_v31 = vpack.c.bf16 %v2284_v24, %v2283_v23 }
 0x422   :  { %6414 = vpow2.f32 %v1752_v20 }
 0x423   :  { %v2314_v36 = vsel %vm1556_vm0, %v2308_v31, 0  ;;  %v1526_v31 = vld [vmem:[%s7806_s3 + $0x18] sm:$0xff] }
 0x42a   :  { %v6413_v21 = vpop.eup %6412 }
 0x42b   :  { %5723 = vmatprep.mubr.msk.f32.mxu1 %vm1741_vm2, %v6413_v21 }
 0x42c   :  { %v6415_v22 = vpop.eup %6414 }
 0x42d   :  { %5724 = vmatmul.mubr.msk.f32.vlgmr.msra.gmra.mrb[24].mxu1 %vm1741_vm2, %v6415_v22 }
 0x42e   :  { %6095 = vmatpush3.bf16.msk.msra.mxu1 %vm7046_vm5, %v6090_v33  ;;  %v7145_v33 = vld [vmem:[#allocation3 + $0x148] sm:$0xff] }
 0x42f   :  { %5747 = vmatprep.subr.bf16.mxu1 %v6525_v41 }
 0x500   :  { %v5725_v38 = vpop.f32.mrb[24].mxu1 }
 0x501   :  { %v1838_v39 = vadd.f32 1e-20, %v5725_v38  ;;  %v1832_v42 = vpop.f32.mrb[25].mxu1 }
 0x502   :  { %v1833_v43 = vadd.f32 1e-20, %v1832_v42  ;;  %v5242_v42 = vld [vmem:[#allocation3 + $0x30] ss:$0 sm:$0xff] }
 0x503   :  { %6416 = vrcp.f32 %v1838_v39 }
 0x504   :  { %6418 = vrcp.f32 %v1833_v43 }
 0x50d   :  { %v6417_v44 = vpop.eup %6416 }
 0x50e   :  { %v6419_v45 = vpop.eup %6418  ;;  %v1844_v47 = vmul.f32 %v6417_v44, %v6415_v22 }
 0x50f   :  { %v1843_v46 = vmul.f32 %v6419_v45, %v6413_v21 }
 0x511   :  { %5730 = vmatprep.mubr.msk.f32.mxu0 %vm1741_vm2, %v1843_v46  ;;  %5737 = vmatprep.mubr.msk.f32.mxu1 %vm1741_vm2, %v1843_v46 }
 0x512   :  { %5731 = vmatmul.mubr.msk.f32.vlgmr.msra.gmra.mrb[20].mxu0 %vm1741_vm2, %v1844_v47  ;;  %5738 = vmatmul.mubr.msk.f32.vlgmr.msra.gmra.mrb[26].mxu1 %vm1741_vm2, %v1844_v47 }
 0x513   :  { %6101 = vmatpush3.bf16.msk.msra.mxu0 %vm7046_vm5, %v6096_v37  ;;  %5744 = vmatprep.mubr.msk.f32.mxu0 %vm1741_vm2, %v1843_v46  ;;  %v2285_v37 = vmul.f32 %v7143_v32, %v7022_v40 }
 0x514   :  { %5748 = vmatpush3.bf16.msra.mxu1 %v6360_v48  ;;  %5751 = vmatprep.mubr.msk.bf16.mxu1 %vm6526_vm1, %v6525_v41 }
 0x515   :  { %5749 = vmatprep.subr.bf16.mxu1 %v6525_v41  ;;  %5755 = vmatprep.subr.bf16.mxu0 %v6525_v41 }
 0x516   :  { %5745 = vmatmul.mubr.msk.f32.vlgmr.msra.gmra.mrb[22].mxu0 %vm1741_vm2, %v1844_v47 }
 0x517   :  { %5759 = vmatprep.mubr.msk.bf16.mxu0 %vm6526_vm1, %v6525_v41  ;;  %5756 = vmatpush3.bf16.msra.mxu0 %v6362_v3 }
 0x518   :  { %5750 = vmatpush3.bf16.msra.mxu1 %v6361_v53  ;;  %5757 = vmatprep.subr.bf16.mxu0 %v6525_v41 }
 0x519   :  { %5763 = vmatprep.subr.bf16.mxu1 %v6525_v41 }
 0x5e5   :  { %v5732_v5 = vpop.f32.mrb[20].mxu0  ;;  %v5739_v7 = vpop.f32.mrb[26].mxu1 }
 0x5e6   :  { %v1940_v9 = vmul.f32 %v5732_v5, %v1938_v6  ;;  %v2030_v10 = vmul.f32 %v5739_v7, %v2028_v8  ;;  %v1924_v11 = vpop.f32.mrb[21].mxu0  ;;  %v2014_v14 = vpop.f32.mrb[27].mxu1  ;;  %v6363_v5 = vld [vmem:[%s7803_s0 + $0x50] sm:$0xff]  }
 0x5e7   :  { %v1939_v18 = vmul.f32 %v1937_v13, %v1924_v11  ;;  %v2029_v19 = vmul.f32 %v2027_v15, %v2014_v14  ;;  %5758 = vmatpush3.bf16.msra.mxu0 %v6363_v5 }
 0x5e8   :  { %v2032_v20 = vadd.f32 %v2030_v10, %v1940_v9 }
 0x5e9   :  { %v2031_v21 = vadd.f32 %v2029_v19, %v1939_v18  ;;  %v5746_v22 = vpop.f32.mrb[22].mxu0 }
 0x5ea   :  { %v2114_v25 = vmul.f32 %v5746_v22, %v7037_v62  ;;  %v2104_v26 = vpop.f32.mrb[23].mxu0  ;;  %v2286_v62 = vmul.f32 %v7145_v33, %v7022_v40 }
 0x5eb   :  { %v2113_v27 = vmul.f32 %v2104_v26, %v7033_v60 }
 0x5ec   :  { %v2116_v28 = vadd.f32 %v2114_v25, %v2032_v20  ;;  %v2309_v60 = vpack.c.bf16 %v2286_v62, %v2285_v37  ;;  %v5243_v20 = vld [vmem:[#allocation3 + $0x38] ss:$0 sm:$0xff] }
 0x5ed   :  { %v2115_v29 = vadd.f32 %v2113_v27, %v2031_v21 }
 0x5ee   :  { %v2317_v38 = vsel %vm1556_vm0, %v2309_v60, 0 }
 0x5ef   :  { %v2121_v34 = vpack.c.bf16 %v2116_v28, %v2115_v29  ;;  %v1525_v28 = vld [vmem:[%s7806_s3 + $0x10] sm:$0xff] }
 0x5f1   :  { %5752 = vmatmul.mubr.msk.bf16.vlgmr.msra.gmra.mrb[28].mxu1 %vm1556_vm0, %v2121_v34 }
 0x5f2   :  { %5764 = vmatpush3.bf16.xpose.msra.mxu1 %v2314_v36  ;;  %5767 = vmatprep.mubr.msk.bf16.mxu1 %vm6526_vm1, %v6525_v41 }
 0x5f3   :  { %5765 = vmatprep.subr.bf16.mxu1 %v6525_v41 }
 0x5fa   :  { %5766 = vmatpush3.bf16.xpose.msra.mxu1 %v2317_v38 }
 0x5fb   :  { %5790 = vmatprep.subr.bf16.mxu1 %v6525_v41 }
 0x6c4   :  { %v2171_v39 = vpop.f32.mrb[28].mxu1 }
 0x6c5   :  { %v2178_v43 = vadd.f32 %v6992_v30, %v2171_v39  ;;  %v5753_v44 = vpop.f32.mrb[29].mxu1 }
 0x6c6   :  { %v2174_v45 = vpop.f32.mrb[30].mxu1 }
 0x6c7   :  { %v7159_v46 = vadd.f32 %v5242_v42, %v2178_v43  ;;  %v2179_v47 = vadd.f32 %v6998_v35, %v2174_v45  ;;  %v5754_v48 = vpop.f32.mrb[31].mxu1  ;;  %v2373_v43 = vld [vmem:[#allocation3 + $0x158] sm:$0xff]  ;;  %v2374_v45 = vld [vmem:[#allocation3 + $0x160] sm:$0xff] }
 0x6c9   :  { %v7162_v50 = vadd.f32 %v5242_v42, %v2179_v47  ;;  %v2187_v52 = vsel %vm1556_vm0, %v7159_v46, 0.0  ;;  %v2372_v42 = vld [vmem:[#allocation3 + $0x150] sm:$0xff]  ;;  %v2375_v47 = vld [vmem:[#allocation3 + $0x168] sm:$0xff] }
 0x6ca   :  { %2188 = vadd.xlane.f32.xlu0 %v2187_v52  ;;  %v6102_v44 = vpack.c.bf16 %v2373_v43, %v2372_v42  ;;  %v6106_v48 = vpack.c.bf16 %v2375_v47, %v2374_v45  ;;  %v2588_v43 = vld [vmem:[#allocation3 + $0x1a0] sm:$0xff] }
 0x6cb   :  { %v2190_v53 = vsel %vm1556_vm0, %v7162_v50, 0.0 }
 0x6cc   :  { %2191 = vadd.xlane.f32.xlu1 %v2190_v53  ;;  %6103 = vmatprep.subr.bf16.mxu0 %v6102_v44 }
 0x757   :  { %v2189_v54 = vpop.xlane.xlu0 %2188 }
 0x758   :  { %v2193_v55 = vmul.f32 0.03125, %v2189_v54 }
 0x759   :  { %v2192_v30 = vpop.xlane.xlu1 %2191 }
 0x75a   :  { %v2195_v56 = vsub.f32 %v7159_v46, %v2193_v55  ;;  %v2194_v57 = vmul.f32 0.03125, %v2192_v30 }
 0x75c   :  { %v2196_v58 = vsub.f32 %v7162_v50, %v2194_v57  ;;  %v2197_v35 = vmul.f32 %v2195_v56, %v2195_v56 }
 0x75e   :  { %v2199_v59 = vsel %vm1556_vm0, %v2197_v35, 0.0  ;;  %v2198_v63 = vmul.f32 %v2196_v58, %v2196_v58 }
 0x75f   :  { %2200 = vadd.xlane.f32.xlu0 %v2199_v59 }
 0x760   :  { %v2202_v1 = vsel %vm1556_vm0, %v2198_v63, 0.0 }
 0x761   :  { %2203 = vadd.xlane.f32.xlu1 %v2202_v1 }
 0x7ec   :  { %v2201_v6 = vpop.xlane.xlu0 %2200 }
 0x7ed   :  { %v2205_v7 = vmul.f32 0.03125, %v2201_v6 }
 0x7ee   :  { %v2204_v8 = vpop.xlane.xlu1 %2203 }
 0x7ef   :  { %v2207_v9 = vadd.f32 1e-05, %v2205_v7  ;;  %v2206_v10 = vmul.f32 0.03125, %v2204_v8  ;;  %v6364_v8 = vld [vmem:[%s7803_s0 + $0x58] sm:$0xff]  }
 0x7f1   :  { %6420 = vrsqrt.f32 %v2207_v9  ;;  %v2208_v11 = vadd.f32 1e-05, %v2206_v10 }
 0x7f3   :  { %6422 = vrsqrt.f32 %v2208_v11 }
 0x7fb   :  { %v6421_v13 = vpop.eup %6420 }
 0x7fc   :  { %v2211_v15 = vmul.f32 %v6421_v13, %v2195_v56 }
 0x7fd   :  { %v6423_v14 = vpop.eup %6422 }
 0x7fe   :  { %v2212_v18 = vmul.f32 %v6423_v14, %v2196_v58  ;;  %v5212_v14 = vld [vmem:[#allocation3 + $0x8] ss:$0 sm:$0xff] }
 0x800   :  { %v2217_v19 = vpack.c.bf16 %v2212_v18, %v2211_v15  ;;  %v7218_v15 = vadd.f32 %v5212_v14, %v7101_v49  ;;  %v7221_v18 = vadd.f32 %v5212_v14, %v7103_v51  ;;  %v7231_v49 = vld [vmem:[#allocation3 + $0x180] sm:$0xff]  ;;  %v2718_v14 = vld [vmem:[#allocation3 + $0x1d0] sm:$0xff] }
 0x802   :  { %5760 = vmatmul.mubr.msk.bf16.vlgmr.msra.gmra.mrb[24].mxu0 %vm1556_vm0, %v2217_v19  ;;  %v7223_v19 = vld [vmem:[#allocation3 + $0x170] sm:$0xff]  ;;  %v2596_v47 = vmul.f32 %v2588_v43, %v7218_v15 }
 0x803   :  { %6105 = vmatpush3.bf16.msra.mxu0 %v6102_v44  ;;  %v2589_v44 = vld [vmem:[#allocation3 + $0x1a8] sm:$0xff] }
 0x804   :  { %6107 = vmatprep.subr.bf16.mxu0 %v6106_v48 }
 0x807   :  { %6109 = vmatpush3.bf16.msra.mxu0 %v6106_v48  ;;  %v2597_v48 = vmul.f32 %v2589_v44, %v7221_v18 }
 0x808   :  { %5782 = vmatprep.subr.bf16.mxu0 %v6525_v41 }
 0x8d5   :  { %v2272_v21 = vpop.f32.mrb[24].mxu0 }
 0x8d6   :  { %v5761_v22 = vpop.f32.mrb[25].mxu0  ;;  %v2273_v24 = vadd.f32 %v5243_v20, %v2272_v21  ;;  %v2590_v21 = vmul.f32 %v7223_v19, %v7218_v15 }
 0x8d7   :  { %v2275_v23 = vpop.f32.mrb[26].mxu0 }
 0x8d8   :  { %v2276_v25 = vadd.f32 %v5243_v20, %v2275_v23  ;;  %v5762_v26 = vpop.f32.mrb[27].mxu0  ;;  %v7225_v20 = vld [vmem:[#allocation3 + $0x178] sm:$0xff] }
 0x8d9   :  { %v2591_v22 = vmul.f32 %v7225_v20, %v7221_v18 }
 0x8da   :  { %v2307_v27 = vpack.c.bf16 %v2276_v25, %v2273_v24 }
 0x8dc   :  { %5768 = vmatmul.mubr.msk.bf16.vlgmr.msra.gmra.mrb[32].mxu1 %vm1556_vm0, %v2307_v27 }
 0x8dd   :  { %5794 = vmatprep.mubr.msk.bf16.mxu1 %vm6526_vm1, %v6525_v41  ;;  %5791 = vmatpush3.bf16.msra.mxu1 %v6364_v8  ;;  %v2715_v8 = vld [vmem:[#allocation3 + $0x1b8] sm:$0xff] }
 0x8de   :  { %5792 = vmatprep.subr.bf16.mxu1 %v6525_v41 }
 0x9af   :  { %v2353_v29 = vpop.f32.mrb[32].mxu1 }
 0x9b0   :  { %v2354_v34 = vadd.f32 %v2353_v29, %v1525_v28  ;;  %v5769_v36 = vpop.f32.mrb[33].mxu1  ;;  %v7233_v28 = vld [vmem:[#allocation3 + $0x188] sm:$0xff] }
 0x9b1   :  { %v2356_v37 = vpop.f32.mrb[34].mxu1 }
 0x9b2   :  { %v2357_v62 = vadd.f32 %v2356_v37, %v1526_v31  ;;  %v5770_v60 = vpop.f32.mrb[35].mxu1  ;;  %v2360_v38 = vsel %vm1556_vm0, %v2354_v34, -inf  ;;  %v2592_v31 = vmul.f32 %v7231_v49, %v7218_v15  ;;  %v2586_v37 = vld [vmem:[#allocation3 + $0x190] sm:$0xff] }
 0x9b3   :  { %2361 = vmax.xlane.f32.xlu0 %v2360_v38  ;;  %v2594_v38 = vmul.f32 %v2586_v37, %v7218_v15 }
 0x9b4   :  { %v2363_v39 = vsel %vm1556_vm0, %v2357_v62, -inf }
 0x9b5   :  { %2364 = vmax.xlane.f32.xlu1 %v2363_v39 }
 0x9c6   :  { %2293 = vrot.lane.b32.xlu1 %v7135_v17, %s6529_s27 }
 0x9c9   :  { %2291 = vrot.lane.b32.xlu0 %v7133_v16, %s6529_s27 }
 0x9ca   :  { %2295 = vrot.lane.b32.xlu1 %v7143_v32, %s6529_s27 }
 0x9ce   :  { %2297 = vrot.lane.b32.xlu1 %v7145_v33, %s6529_s27 }
 0xa40   :  { %v2362_v17 = vpop.xlane.xlu0 %2361 }
 0xa41   :  { %v2366_v52 = vsub.f32 %v2354_v34, %v2362_v17  ;;  %v2593_v34 = vmul.f32 %v7233_v28, %v7221_v18  ;;  %v2641_v17 = vpack.c.bf16 %v2597_v48, %v2596_v47 }
 0xa42   :  { %v2365_v53 = vpop.xlane.xlu1 %2364 }
 0xa43   :  { %v2368_v16 = vmul.f32 1.442695, %v2366_v52  ;;  %v2367_v54 = vsub.f32 %v2357_v62, %v2365_v53  ;;  %v2639_v36 = vpack.c.bf16 %v2593_v34, %v2592_v31  ;;  %v7244_v62 = vld [vmem:[#allocation3 + $0x198] sm:$0xff]  ;;  %v2658_v52 = vsel %vm1556_vm0, %v2641_v17, 0 }
 0xa44   :  { %v2292_v55 = vpop.permute.xlu0 %2291  ;;  %v2595_v39 = vmul.f32 %v7244_v62, %v7221_v18 }
 0xa45   :  { %6424 = vpow2.f32 %v2368_v16  ;;  %v2370_v32 = vmul.f32 1.442695, %v2367_v54  ;;  %v2303_v56 = vmul.f32 %v2292_v55, %v7022_v40  ;;  %v2652_v60 = vsel %vm1556_vm0, %v2639_v36, 0  ;;  %v6365_v16 = vld [vmem:[%s7803_s0 + $0x60] sm:$0xff]  }
 0xa46   :  { %v2294_v30 = vpop.permute.xlu1 %2293  ;;  %v2640_v42 = vpack.c.bf16 %v2595_v39, %v2594_v38  ;;  %5793 = vmatpush3.bf16.msra.mxu1 %v6365_v16 }
 0xa47   :  { %6426 = vpow2.f32 %v2370_v32  ;;  %v2304_v57 = vmul.f32 %v2294_v30, %v7022_v40 }
 0xa48   :  { %v2655_v45 = vsel %vm1556_vm0, %v2640_v42, 0 }
 0xa49   :  { %v2462_v58 = vpack.c.bf16 %v2304_v57, %v2303_v56  ;;  %v1527_v57 = vld [vmem:[%s7806_s3 + $0x20] sm:$0xff] }
 0xa4a   :  { %v2296_v33 = vpop.permute.xlu1 %2295 }
 0xa4b   :  { %2466 = vrot.lane.b32.xlu0 %v2462_v58, %s6527_s7  ;;  %v2305_v63 = vmul.f32 %v2296_v33, %v7022_v40  ;;  %v1528_v33 = vld [vmem:[%s7806_s3 + $0x28] sm:$0xff] }
 0xa4e   :  { %v2298_v35 = vpop.permute.xlu1 %2297 }
 0xa4f   :  { %v6425_v59 = vpop.eup %6424  ;;  %v2306_v1 = vmul.f32 %v2298_v35, %v7022_v40  ;;  %2643 = vrot.lane.b32.xlu0 %v2307_v27, %s6527_s7  ;;  %v2638_v27 = vpack.c.bf16 %v2591_v22, %v2590_v21  ;;  %v2719_v21 = vld [vmem:[#allocation3 + $0x1d8] sm:$0xff] }
 0xa50   :  { %5779 = vmatprep.mubr.msk.f32.mxu0 %vm1556_vm0, %v6425_v59  ;;  %v6118_v22 = vpack.c.bf16 %v2719_v21, %v2718_v14 }
 0xa51   :  { %v6427_v3 = vpop.eup %6426  ;;  %v2463_v5 = vpack.c.bf16 %v2306_v1, %v2305_v63  ;;  %v2649_v29 = vsel %vm1556_vm0, %v2638_v27, 0 }
 0xa52   :  { %5780 = vmatmul.mubr.msk.f32.vlgmr.msra.gmra.mrb[28].mxu0 %vm1556_vm0, %v6427_v3 }
 0xa53   :  { %2468 = vrot.lane.b32.xlu1 %v2463_v5, %s6527_s7  ;;  %5786 = vmatprep.mubr.msk.bf16.mxu0 %vm6526_vm1, %v6525_v41 }
 0xabd   :  { %v2467_v6 = vpop.permute.xlu0 %2466 }
 0xabe   :  { %5783 = vmatpush3.bf16.msra.mxu0 %v2467_v6 }
 0xabf   :  { %5784 = vmatprep.subr.bf16.mxu0 %v6525_v41 }
 0xac1   :  { %v2644_v53 = vpop.permute.xlu0 %2643 }
 0xac5   :  { %v2469_v7 = vpop.permute.xlu1 %2468 }
 0xac6   :  { %5785 = vmatpush3.bf16.msra.mxu0 %v2469_v7  ;;  %v2714_v7 = vld [vmem:[#allocation3 + $0x1b0] sm:$0xff] }
 0xac7   :  { %5798 = vmatprep.subr.bf16.mxu0 %v6525_v41 }
 0xb25   :  { %v5781_v9 = vpop.f32.mrb[28].mxu0 }
 0xb26   :  { %v2454_v10 = vadd.f32 1e-20, %v5781_v9  ;;  %v2448_v11 = vpop.f32.mrb[29].mxu0  ;;  %v6110_v9 = vpack.c.bf16 %v2715_v8, %v2714_v7 }
 0xb27   :  { %v2449_v13 = vadd.f32 1e-20, %v2448_v11  ;;  %v2717_v11 = vld [vmem:[#allocation3 + $0x1c8] sm:$0xff] }
 0xb28   :  { %6428 = vrcp.f32 %v2454_v10  ;;  %6111 = vmatprep.subr.bf16.mxu1 %v6110_v9  ;;  %v2716_v10 = vld [vmem:[#allocation3 + $0x1c0] sm:$0xff] }
 0xb29   :  { %6430 = vrcp.f32 %v2449_v13  ;;  %v6114_v13 = vpack.c.bf16 %v2717_v11, %v2716_v10 }
 0xb32   :  { %v6429_v23 = vpop.eup %6428 }
 0xb33   :  { %v6431_v24 = vpop.eup %6430  ;;  %v2460_v25 = vmul.f32 %v6429_v23, %v6427_v3  ;;  %v2720_v23 = vld [vmem:[#allocation3 + $0x1e0] sm:$0xff] }
 0xb34   :  { %v2459_v26 = vmul.f32 %v6431_v24, %v6425_v59  ;;  %v2721_v24 = vld [vmem:[#allocation3 + $0x1e8] sm:$0xff] }
 0xb36   :  { %v2461_v51 = vpack.c.bf16 %v2460_v25, %v2459_v26  ;;  %v6122_v25 = vpack.c.bf16 %v2721_v24, %v2720_v23 }
 0xb38   :  { %5787 = vmatmul.mubr.msk.bf16.vlgmr.msra.gmra.mrb[32].mxu0 %vm1556_vm0, %v2461_v51 }
 0xb39   :  { %5799 = vmatpush3.bf16.xpose.msra.mxu0 %v2649_v29  ;;  %5806 = vmatprep.mubr.msk.bf16.mxu0 %vm6526_vm1, %v6525_v41 }
 0xb3a   :  { %5800 = vmatprep.subr.bf16.mxu0 %v6525_v41 }
 0xb41   :  { %5801 = vmatpush3.bf16.xpose.msra.mxu0 %v2652_v60 }
 0xb42   :  { %5802 = vmatprep.subr.bf16.mxu0 %v6525_v41 }
 0xb49   :  { %5803 = vmatpush3.bf16.xpose.msra.mxu0 %v2655_v45 }
 0xb4a   :  { %5804 = vmatprep.subr.bf16.mxu0 %v6525_v41 }
 0xb51   :  { %5805 = vmatpush3.bf16.xpose.msra.mxu0 %v2658_v52 }
 0xb52   :  { %5841 = vmatprep.subr.bf16.mxu0 %v6525_v41 }
 0xb58   :  { %5807 = vmatmul.mubr.msk.bf16.vlgmr.msra.gmra.mrb[36].mxu0 %vm1556_vm0, %v2644_v53 }
 0xb59   :  { %5845 = vmatprep.mubr.msk.bf16.mxu0 %vm6526_vm1, %v6525_v41 }
 0xc0b   :  { %v2509_v54 = vpop.f32.mrb[32].mxu0 }
 0xc0c   :  { %v5788_v55 = vpop.f32.mrb[33].mxu0 }
 0xc0d   :  { %v2512_v32 = vpop.f32.mrb[34].mxu0 }
 0xc0e   :  { %v2520_v30 = vpack.c.bf16 %v2512_v32, %v2509_v54  ;;  %v5789_v56 = vpop.f32.mrb[35].mxu0 }
 0xc10   :  { %5795 = vmatmul.mubr.msk.bf16.vlgmr.msra.gmra.mrb[36].mxu1 %vm1556_vm0, %v2520_v30 }
 0xc11   :  { %6113 = vmatpush3.bf16.msra.mxu1 %v6110_v9 }
 0xc12   :  { %6115 = vmatprep.subr.bf16.mxu1 %v6114_v13 }
 0xc15   :  { %6117 = vmatpush3.bf16.msra.mxu1 %v6114_v13  ;;  %v6367_v13 = vld [vmem:[%s7803_s0 + $0x70] sm:$0xff]  }
 0xc16   :  { %6119 = vmatprep.subr.bf16.mxu1 %v6118_v22 }
 0xc19   :  { %6121 = vmatpush3.bf16.msra.mxu1 %v6118_v22 }
 0xc1a   :  { %6123 = vmatprep.subr.bf16.mxu1 %v6122_v25 }
 0xc1d   :  { %6125 = vmatpush3.bf16.msra.mxu1 %v6122_v25  ;;  %v6368_v25 = vld [vmem:[%s7803_s0 + $0x78] sm:$0xff]  }
 0xc1e   :  { %5829 = vmatprep.subr.bf16.mxu1 %v6525_v41 }
 0xc2b   :  { %v2694_v58 = vpop.f32.mrb[36].mxu0 }
 0xc2c   :  { %v2695_v35 = vadd.f32 %v2694_v58, %v1527_v57  ;;  %v5808_v59 = vpop.f32.mrb[37].mxu0  ;;  %v6366_v58 = vld [vmem:[%s7803_s0 + $0x68] sm:$0xff]  }
 0xc2d   :  { %v2697_v63 = vpop.f32.mrb[38].mxu0  ;;  %5842 = vmatpush3.bf16.msra.mxu0 %v6366_v58 }
 0xc2e   :  { %v2698_v1 = vadd.f32 %v2697_v63, %v1528_v33  ;;  %v5809_v3 = vpop.f32.mrb[39].mxu0  ;;  %v2702_v5 = vsel %vm2701_vm11, %v2695_v35, -inf  ;;  %5843 = vmatprep.subr.bf16.mxu0 %v6525_v41 }
 0xc2f   :  { %2703 = vmax.xlane.f32.xlu1 %v2702_v5 }
 0xc30   :  { %v2705_v6 = vsel %vm2701_vm11, %v2698_v1, -inf }
 0xc31   :  { %2706 = vmax.xlane.f32.xlu0 %v2705_v6  ;;  %5844 = vmatpush3.bf16.msra.mxu0 %v6367_v13 }
 0xc32   :  { %5861 = vmatprep.subr.bf16.mxu0 %v6525_v41 }
 0xc40   :  { %2608 = vrot.lane.b32.xlu1 %v7225_v20, %s6529_s27 }
 0xc44   :  { %2610 = vrot.lane.b32.xlu1 %v7231_v49, %s6529_s27 }
 0xc47   :  { %2606 = vrot.lane.b32.xlu0 %v7223_v19, %s6529_s27 }
 0xc48   :  { %2614 = vrot.lane.b32.xlu1 %v2586_v37, %s6529_s27 }
 0xc4b   :  { %2612 = vrot.lane.b32.xlu0 %v7233_v28, %s6529_s27 }
 0xc4c   :  { %2618 = vrot.lane.b32.xlu1 %v2588_v43, %s6529_s27 }
 0xc4f   :  { %2616 = vrot.lane.b32.xlu0 %v7244_v62, %s6529_s27 }
 0xc53   :  { %2620 = vrot.lane.b32.xlu0 %v2589_v44, %s6529_s27 }
 0xcbc   :  { %v2704_v19 = vpop.xlane.xlu1 %2703 }
 0xcbd   :  { %v2708_v20 = vsub.f32 %v2695_v35, %v2704_v19  ;;  %v6369_v19 = vld [vmem:[%s7803_s0 + $0x80] sm:$0xff]  }
 0xcbe   :  { %v2707_v26 = vpop.xlane.xlu0 %2706 }
 0xcbf   :  { %v2710_v27 = vmul.f32 1.442695, %v2708_v20  ;;  %v2709_v49 = vsub.f32 %v2698_v1, %v2707_v26  ;;  %v6370_v20 = vld [vmem:[%s7803_s0 + $0x88] sm:$0xff]   ;;  %v6371_v26 = vld [vmem:[%s7803_s0 + $0x90] sm:$0xff]  }
 0xcc0   :  { %v2609_v51 = vpop.permute.xlu1 %2608 }
 0xcc1   :  { %6432 = vpow2.f32 %v2710_v27  ;;  %v2712_v29 = vmul.f32 1.442695, %v2709_v49  ;;  %v2631_v28 = vmul.f32 %v2609_v51, %v7221_v18  ;;  %v5259_v27 = vld [vmem:[#allocation3 + $0x48] ss:$0 sm:$0xff] }
 0xcc2   :  { %v2607_v31 = vpop.permute.xlu0 %2606 }
 0xcc3   :  { %6434 = vpow2.f32 %v2712_v29  ;;  %v2630_v34 = vmul.f32 %v2607_v31, %v7218_v15 }
 0xcc4   :  { %v2611_v36 = vpop.permute.xlu1 %2610 }
 0xcc5   :  { %v2808_v37 = vpack.c.bf16 %v2631_v28, %v2630_v34  ;;  %v2632_v62 = vmul.f32 %v2611_v36, %v7218_v15 }
 0xcc6   :  { %v2613_v60 = vpop.permute.xlu0 %2612 }
 0xcc7   :  { %v2633_v38 = vmul.f32 %v2613_v60, %v7221_v18  ;;  %2816 = vrot.lane.b32.xlu1 %v2808_v37, %s6527_s7 }
 0xcc8   :  { %v2615_v39 = vpop.permute.xlu1 %2614 }
 0xcc9   :  { %v2809_v42 = vpack.c.bf16 %v2633_v38, %v2632_v62  ;;  %v2634_v45 = vmul.f32 %v2615_v39, %v7218_v15  ;;  %v5251_v62 = vld [vmem:[#allocation3 + $0x40] ss:$0 sm:$0xff] }
 0xcca   :  { %v2617_v43 = vpop.permute.xlu0 %2616 }
 0xccb   :  { %v6433_v44 = vpop.eup %6432  ;;  %v2635_v47 = vmul.f32 %v2617_v43, %v7221_v18  ;;  %2818 = vrot.lane.b32.xlu0 %v2809_v42, %s6527_s7 }
 0xccc   :  { %5826 = vmatprep.mubr.msk.f32.mxu1 %vm2701_vm11, %v6433_v44  ;;  %v2619_v48 = vpop.permute.xlu1 %2618 }
 0xccd   :  { %v6435_v17 = vpop.eup %6434  ;;  %v2810_v52 = vpack.c.bf16 %v2635_v47, %v2634_v45  ;;  %v2636_v16 = vmul.f32 %v2619_v48, %v7218_v15 }
 0xcce   :  { %5827 = vmatmul.mubr.msk.f32.vlgmr.msra.gmra.mrb[40].mxu1 %vm2701_vm11, %v6435_v17  ;;  %v2621_v53 = vpop.permute.xlu0 %2620 }
 0xccf   :  { %v2637_v54 = vmul.f32 %v2621_v53, %v7221_v18  ;;  %2820 = vrot.lane.b32.xlu1 %v2810_v52, %s6527_s7  ;;  %5837 = vmatprep.mubr.msk.bf16.mxu1 %vm6526_vm1, %v6525_v41  ;;  %v5263_v53 = vld [vmem:[#allocation3 + $0x50] ss:$0 sm:$0xff] }
 0xcd1   :  { %v2811_v55 = vpack.c.bf16 %v2637_v54, %v2636_v16 }
 0xcd3   :  { %2822 = vrot.lane.b32.xlu0 %v2811_v55, %s6527_s7 }
 0xce3   :  { %v7302_v32 = vpop.f32.mrb[36].mxu1 }
 0xce4   :  { %v5796_v30 = vpop.f32.mrb[37].mxu1  ;;  %v2576_v38 = vadd.f32 %v5251_v62, %v7302_v32 }
 0xce5   :  { %v7304_v56 = vpop.f32.mrb[38].mxu1 }
 0xce6   :  { %v5797_v57 = vpop.f32.mrb[39].mxu1  ;;  %v2579_v39 = vadd.f32 %v5251_v62, %v7304_v56  ;;  %v2938_v43 = vadd.f32 %v2576_v38, %v7159_v46 }
 0xd39   :  { %v2817_v33 = vpop.permute.xlu1 %2816 }
 0xd3a   :  { %5830 = vmatpush3.bf16.msra.mxu1 %v2817_v33 }
 0xd3b   :  { %5831 = vmatprep.subr.bf16.mxu1 %v6525_v41 }
 0xd3d   :  { %v2819_v35 = vpop.permute.xlu0 %2818 }
 0xd3e   :  { %5832 = vmatpush3.bf16.msra.mxu1 %v2819_v35 }
 0xd3f   :  { %5833 = vmatprep.subr.bf16.mxu1 %v6525_v41 }
 0xd41   :  { %v2821_v59 = vpop.permute.xlu1 %2820 }
 0xd42   :  { %5834 = vmatpush3.bf16.msra.mxu1 %v2821_v59 }
 0xd43   :  { %5835 = vmatprep.subr.bf16.mxu1 %v6525_v41 }
 0xd45   :  { %v2823_v63 = vpop.permute.xlu0 %2822 }
 0xd46   :  { %5836 = vmatpush3.bf16.msra.mxu1 %v2823_v63 }
 0xd47   :  { %5849 = vmatprep.subr.bf16.mxu1 %v6525_v41 }
 0xda1   :  { %v5828_v1 = vpop.f32.mrb[40].mxu1 }
 0xda2   :  { %v2800_v3 = vadd.f32 1e-20, %v5828_v1  ;;  %v2794_v5 = vpop.f32.mrb[41].mxu1 }
 0xda3   :  { %v2795_v6 = vadd.f32 1e-20, %v2794_v5 }
 0xda4   :  { %6436 = vrcp.f32 %v2800_v3 }
 0xda5   :  { %6438 = vrcp.f32 %v2795_v6 }
 0xdae   :  { %v6437_v7 = vpop.eup %6436 }
 0xdaf   :  { %v6439_v8 = vpop.eup %6438  ;;  %v2806_v9 = vmul.f32 %v6437_v7, %v6435_v17  ;;  %v6372_v7 = vld [vmem:[%s7803_s0 + $0x98] sm:$0xff]  }
 0xdb0   :  { %v2805_v10 = vmul.f32 %v6439_v8, %v6433_v44  ;;  %v2939_v44 = vadd.f32 %v2579_v39, %v7162_v50  ;;  %v6373_v8 = vld [vmem:[%s7803_s0 + $0xa0] sm:$0xff]  }
 0xdb2   :  { %v2807_v11 = vpack.c.bf16 %v2806_v9, %v2805_v10 }
 0xdb4   :  { %5838 = vmatmul.mubr.msk.bf16.vlgmr.msra.gmra.mrb[44].mxu1 %vm2701_vm11, %v2807_v11 }
 0xdb5   :  { %5857 = vmatprep.mubr.msk.bf16.mxu1 %vm6526_vm1, %v6525_v41  ;;  %5850 = vmatpush3.bf16.msra.mxu1 %v6368_v25 }
 0xdb6   :  { %5851 = vmatprep.subr.bf16.mxu1 %v6525_v41 }
 0xdb9   :  { %5852 = vmatpush3.bf16.msra.mxu1 %v6369_v19  ;;  %v6374_v19 = vld [vmem:[%s7803_s0 + $0xa8] sm:$0xff]  }
 0xdba   :  { %5853 = vmatprep.subr.bf16.mxu1 %v6525_v41 }
 0xdbd   :  { %5854 = vmatpush3.bf16.msra.mxu1 %v6370_v20 }
 0xdbe   :  { %5855 = vmatprep.subr.bf16.mxu1 %v6525_v41 }
 0xdc1   :  { %5856 = vmatpush3.bf16.msra.mxu1 %v6371_v26  ;;  %v6375_v26 = vld [vmem:[%s7803_s0 + $0xb0] sm:$0xff]  }
 0xdc2   :  { %5881 = vmatprep.subr.bf16.mxu1 %v6525_v41 }
 0xe87   :  { %v2865_v14 = vpop.f32.mrb[44].mxu1 }
 0xe88   :  { %v5839_v21 = vpop.f32.mrb[45].mxu1 }
 0xe89   :  { %v2868_v22 = vpop.f32.mrb[46].mxu1 }
 0xe8a   :  { %v2876_v23 = vpack.c.bf16 %v2868_v22, %v2865_v14  ;;  %v5840_v24 = vpop.f32.mrb[47].mxu1 }
 0xe8c   :  { %5846 = vmatmul.mubr.msk.bf16.vlgmr.msra.gmra.mrb[40].mxu0 %vm1556_vm0, %v2876_v23 }
 0xe8d   :  { %5865 = vmatprep.mubr.msk.bf16.mxu0 %vm6526_vm1, %v6525_v41  ;;  %5862 = vmatpush3.bf16.msra.mxu0 %v6372_v7 }
 0xe8e   :  { %5863 = vmatprep.subr.bf16.mxu0 %v6525_v41 }
 0xe91   :  { %5864 = vmatpush3.bf16.msra.mxu0 %v6373_v8 }
 0xe92   :  { %5869 = vmatprep.subr.bf16.mxu0 %v6525_v41 }
 0xf5f   :  { %v2931_v49 = vpop.f32.mrb[40].mxu0 }
 0xf60   :  { %v2932_v51 = vadd.f32 %v5259_v27, %v2931_v49  ;;  %v5847_v29 = vpop.f32.mrb[41].mxu0  ;;  %v6377_v49 = vld [vmem:[%s7803_s0 + $0xc0] sm:$0xff]  }
 0xf61   :  { %v2934_v31 = vpop.f32.mrb[42].mxu0 }
 0xf62   :  { %v2935_v28 = vadd.f32 %v5259_v27, %v2934_v31  ;;  %v5848_v34 = vpop.f32.mrb[43].mxu0  ;;  %v2940_v36 = vadd.f32 %v2932_v51, %v7159_v46  ;;  %v6376_v27 = vld [vmem:[%s7803_s0 + $0xb8] sm:$0xff]   ;;  %v5269_v51 = vld [vmem:[#allocation3 + $0x58] ss:$0 sm:$0xff] }
 0xf64   :  { %v2941_v37 = vadd.f32 %v2935_v28, %v7162_v50 }
 0xf66   :  { %v6199_v60 = vpack.i.bf16 %v2941_v37, %v2940_v36 }
 0xf68   :  { %6200 = vrot.lane.b32.xlu1 %v6199_v60, %s6529_s27 }
 0xfda   :  { %v6201_v42 = vpop.permute.xlu1 %6200 }
 0xfdb   :  { %v6203_v45 = vunpack.i.h.bf16 %v6201_v42  ;;  %v6202_v47 = vunpack.i.l.bf16 %v6201_v42  ;;  %v5278_v42 = vld [vmem:[#allocation3 + $0x60] ss:$0 sm:$0xff] }
 0xfdd   :  { %v2951_v48 = vsel %vm1556_vm0, %v2939_v44, %v6203_v45  ;;  %v2950_v17 = vsel %vm1556_vm0, %v2938_v43, %v6202_v47 }
 0xfde   :  { %v2960_v52 = vpack.c.bf16 %v2951_v48, %v2950_v17 }
 0xfe0   :  { %5858 = vmatmul.mubr.msk.bf16.vlgmr.msra.gmra.mrb[48].mxu1 %vm2701_vm11, %v2960_v52 }
 0xfe1   :  { %5885 = vmatprep.mubr.msk.bf16.mxu1 %vm6526_vm1, %v6525_v41 }
0x10b3   :  { %v3027_v16 = vpop.f32.mrb[48].mxu1 }
0x10b4   :  { %v7352_v54 = vadd.f32 %v5263_v53, %v3027_v16  ;;  %v5859_v55 = vpop.f32.mrb[49].mxu1 }
0x10b5   :  { %v3030_v46 = vpop.f32.mrb[50].mxu1 }
0x10b6   :  { %v7354_v32 = vadd.f32 %v5263_v53, %v3030_v46  ;;  %v5860_v50 = vpop.f32.mrb[51].mxu1  ;;  %v3034_v30 = vsel %vm1556_vm0, %v7352_v54, 0.0 }
0x10b7   :  { %3035 = vadd.xlane.f32.xlu0 %v3034_v30 }
0x10b8   :  { %v3037_v56 = vsel %vm1556_vm0, %v7354_v32, 0.0 }
0x10b9   :  { %3038 = vadd.xlane.f32.xlu1 %v3037_v56 }
0x1144   :  { %v3036_v57 = vpop.xlane.xlu0 %3035 }
0x1145   :  { %v3040_v58 = vmul.f32 0.03125, %v3036_v57 }
0x1146   :  { %v3039_v33 = vpop.xlane.xlu1 %3038 }
0x1147   :  { %v3042_v35 = vsub.f32 %v7352_v54, %v3040_v58  ;;  %v3041_v59 = vmul.f32 0.03125, %v3039_v33 }
0x1149   :  { %v3043_v63 = vsub.f32 %v7354_v32, %v3041_v59  ;;  %v3044_v1 = vmul.f32 %v3042_v35, %v3042_v35  ;;  %v6379_v59 = vld [vmem:[%s7803_s0 + $0xd0] sm:$0xff]  }
0x114b   :  { %v3046_v3 = vsel %vm1556_vm0, %v3044_v1, 0.0  ;;  %v3045_v5 = vmul.f32 %v3043_v63, %v3043_v63 }
0x114c   :  { %3047 = vadd.xlane.f32.xlu0 %v3046_v3 }
0x114d   :  { %v3049_v6 = vsel %vm1556_vm0, %v3045_v5, 0.0 }
0x1150   :  { %3050 = vadd.xlane.f32.xlu0 %v3049_v6 }
0x11d9   :  { %v3048_v9 = vpop.xlane.xlu0 %3047 }
0x11da   :  { %v3052_v10 = vmul.f32 0.03125, %v3048_v9 }
0x11dc   :  { %v3054_v11 = vadd.f32 1e-05, %v3052_v10 }
0x11dd   :  { %v3051_v13 = vpop.xlane.xlu0 %3050 }
0x11de   :  { %v3053_v14 = vmul.f32 0.03125, %v3051_v13  ;;  %6440 = vrsqrt.f32 %v3054_v11 }
0x11e0   :  { %v3055_v21 = vadd.f32 1e-05, %v3053_v14  ;;  %v6380_v14 = vld [vmem:[%s7803_s0 + $0xd8] sm:$0xff]  }
0x11e2   :  { %6442 = vrsqrt.f32 %v3055_v21  ;;  %v5279_v21 = vld [vmem:[#allocation3 + $0xa8] ss:$0 sm:$0xff] }
0x11e8   :  { %v6441_v22 = vpop.eup %6440 }
0x11e9   :  { %v3058_v24 = vmul.f32 %v6441_v22, %v3042_v35  ;;  %v6378_v35 = vld [vmem:[%s7803_s0 + $0xc8] sm:$0xff]  }
0x11ea   :  { %5882 = vmatpush3.bf16.msra.mxu1 %v6378_v35 }
0x11eb   :  { %5883 = vmatprep.subr.bf16.mxu1 %v6525_v41 }
0x11ec   :  { %v6443_v23 = vpop.eup %6442 }
0x11ed   :  { %v3059_v25 = vmul.f32 %v6443_v23, %v3043_v63 }
0x11ee   :  { %5884 = vmatpush3.bf16.msra.mxu1 %v6379_v59 }
0x11ef   :  { %v3064_v20 = vpack.c.bf16 %v3059_v25, %v3058_v24  ;;  %5889 = vmatprep.subr.bf16.mxu1 %v6525_v41 }
0x11f1   :  { %5866 = vmatmul.mubr.msk.bf16.vlgmr.msra.gmra.mrb[44].mxu0 %vm1556_vm0, %v3064_v20 }
0x11f2   :  { %5870 = vmatpush3.bf16.msra.mxu0 %v6374_v19  ;;  %5877 = vmatprep.mubr.msk.bf16.mxu0 %vm6526_vm1, %v6525_v41 }
0x11f3   :  { %5871 = vmatprep.subr.bf16.mxu0 %v6525_v41 }
0x11f6   :  { %5872 = vmatpush3.bf16.msra.mxu0 %v6375_v26 }
0x11f7   :  { %5873 = vmatprep.subr.bf16.mxu0 %v6525_v41 }
0x11fa   :  { %5874 = vmatpush3.bf16.msra.mxu0 %v6376_v27 }
0x11fb   :  { %5875 = vmatprep.subr.bf16.mxu0 %v6525_v41 }
0x11fe   :  { %5876 = vmatpush3.bf16.msra.mxu0 %v6377_v49 }
0x12c4   :  { %v3119_v29 = vpop.f32.mrb[44].mxu0 }
0x12c5   :  { %v3120_v31 = vadd.f32 %v5269_v51, %v3119_v29  ;;  %v5867_v28 = vpop.f32.mrb[45].mxu0 }
0x12c6   :  { %v3122_v34 = vpop.f32.mrb[46].mxu0 }
0x12c7   :  { %v3123_v36 = vadd.f32 %v5269_v51, %v3122_v34  ;;  %v5868_v37 = vpop.f32.mrb[47].mxu0  ;;  %v3126_v60 = vmax.f32 %v3120_v31, 0.0  ;;  %v6381_v31 = vld [vmem:[%s7803_s0 + $0xe0] sm:$0xff]  }
0x12c9   :  { %v3127_v62 = vmax.f32 %v3123_v36, 0.0 }
0x12cb   :  { %v3136_v38 = vpack.c.bf16 %v3127_v62, %v3126_v60 }
0x12cd   :  { %5878 = vmatmul.mubr.msk.bf16.vlgmr.msra.gmra.mrb[48].mxu0 %vm2701_vm11, %v3136_v38 }
0x13a0   :  { %v3198_v39 = vpop.f32.mrb[48].mxu0 }
0x13a1   :  { %v3205_v43 = vadd.f32 %v3198_v39, %v7352_v54  ;;  %v5879_v44 = vpop.f32.mrb[49].mxu0 }
0x13a2   :  { %v3201_v45 = vpop.f32.mrb[50].mxu0 }
0x13a3   :  { %v7392_v47 = vadd.f32 %v5278_v42, %v3205_v43  ;;  %v3206_v48 = vadd.f32 %v3201_v45, %v7354_v32  ;;  %v5880_v17 = vpop.f32.mrb[51].mxu0 }
0x13a5   :  { %v7395_v52 = vadd.f32 %v5278_v42, %v3206_v48  ;;  %v3214_v53 = vsel %vm1556_vm0, %v7392_v47, 0.0  ;;  %v5285_v42 = vld [vmem:[#allocation3 + $0xb0] ss:$0 sm:$0xff] }
0x13a6   :  { %3215 = vadd.xlane.f32.xlu0 %v3214_v53  ;;  %5058 = vst [vmem:[%s7808_s5 + $0x10] sm:$0xff] %v3214_v53 }
0x13a7   :  { %v3217_v16 = vsel %vm1556_vm0, %v7395_v52, 0.0 }
0x13a8   :  { %3218 = vadd.xlane.f32.xlu1 %v3217_v16  ;;  %5059 = vst [vmem:[%s7808_s5 + $0x18] sm:$0xff] %v3217_v16 }
0x1433   :  { %v3216_v54 = vpop.xlane.xlu0 %3215 }
0x1434   :  { %v3220_v55 = vmul.f32 0.03125, %v3216_v54 }
0x1435   :  { %v3219_v46 = vpop.xlane.xlu1 %3218 }
0x1436   :  { %v3222_v32 = vsub.f32 %v7392_v47, %v3220_v55  ;;  %v3221_v50 = vmul.f32 0.03125, %v3219_v46  ;;  %v3406_v55 = vld [vmem:[#allocation3 + $0xf0] sm:$0xff]  ;;  %v3407_v46 = vld [vmem:[#allocation3 + $0xf8] sm:$0xf] }
0x1438   :  { %v3223_v30 = vsub.f32 %v7395_v52, %v3221_v50  ;;  %v3224_v56 = vmul.f32 %v3222_v32, %v3222_v32 }
0x143a   :  { %v3226_v57 = vsel %vm1556_vm0, %v3224_v56, 0.0  ;;  %v3225_v58 = vmul.f32 %v3223_v30, %v3223_v30 }
0x143b   :  { %3227 = vadd.xlane.f32.xlu0 %v3226_v57 }
0x143c   :  { %v3229_v33 = vsel %vm1556_vm0, %v3225_v58, 0.0 }
0x143d   :  { %3230 = vadd.xlane.f32.xlu1 %v3229_v33 }
0x14c8   :  { %v3228_v63 = vpop.xlane.xlu0 %3227 }
0x14c9   :  { %v3232_v1 = vmul.f32 0.03125, %v3228_v63  ;;  %v3592_v63 = vld [vmem:[#allocation3 + $0x110] sm:$0xff] }
0x14ca   :  { %v3231_v3 = vpop.xlane.xlu1 %3230 }
0x14cb   :  { %v3234_v5 = vadd.f32 1e-05, %v3232_v1  ;;  %v3233_v6 = vmul.f32 0.03125, %v3231_v3  ;;  %v3593_v1 = vld [vmem:[#allocation3 + $0x118] sm:$0xf]  ;;  %v3498_v3 = vld [vmem:[#allocation3 + $0x100] sm:$0xff] }
0x14cd   :  { %6444 = vrsqrt.f32 %v3234_v5  ;;  %v3235_v7 = vadd.f32 1e-05, %v3233_v6  ;;  %v6138_v5 = vpack.c.bf16 %v3593_v1, %v3592_v63  ;;  %v3499_v6 = vld [vmem:[#allocation3 + $0x108] sm:$0xf] }
0x14cf   :  { %6446 = vrsqrt.f32 %v3235_v7  ;;  %v6132_v7 = vpack.c.bf16 %v3499_v6, %v3498_v3 }
0x14d7   :  { %v6445_v8 = vpop.eup %6444 }
0x14d8   :  { %v3238_v10 = vmul.f32 %v6445_v8, %v3222_v32  ;;  %v6126_v32 = vpack.c.bf16 %v3407_v46, %v3406_v55  ;;  %v3680_v8 = vld [vmem:[#allocation3 + $0x120] sm:$0xff] }
0x14d9   :  { %v6447_v9 = vpop.eup %6446 }
0x14da   :  { %v3239_v11 = vmul.f32 %v6447_v9, %v3223_v30  ;;  %6128 = vmatprep.subr.msk.bf16.mxu0 %vm7046_vm5, %v6126_v32  ;;  %v3681_v9 = vld [vmem:[#allocation3 + $0x128] sm:$0xf] }
0x14db   :  { %6131 = vmatpush3.bf16.msk.msra.mxu0 %vm7046_vm5, %v6126_v32 }
0x14dc   :  { %v3244_v13 = vpack.c.bf16 %v3239_v11, %v3238_v10  ;;  %6134 = vmatprep.subr.msk.bf16.mxu0 %vm7046_vm5, %v6132_v7  ;;  %v6144_v10 = vpack.c.bf16 %v3681_v9, %v3680_v8  ;;  %v7511_v8 = vld [vmem:[#allocation3 + $0x130] sm:$0xff]  ;;  %v7515_v9 = vld [vmem:[#allocation3 + $0x140] sm:$0xff] }
0x14de   :  { %5886 = vmatmul.mubr.msk.bf16.vlgmr.msra.gmra.mrb[52].mxu1 %vm1556_vm0, %v3244_v13 }
0x14df   :  { %5893 = vmatprep.mubr.msk.bf16.mxu1 %vm6526_vm1, %v6525_v41  ;;  %5890 = vmatpush3.bf16.msra.mxu1 %v6380_v14 }
0x14e0   :  { %5891 = vmatprep.subr.bf16.mxu1 %v6525_v41 }
0x14e3   :  { %5892 = vmatpush3.bf16.msra.mxu1 %v6381_v31 }
0x14e4   :  { %6140 = vmatprep.subr.msk.bf16.mxu1 %vm7046_vm5, %v6138_v5 }
0x15b1   :  { %v3299_v22 = vpop.f32.mrb[52].mxu1 }
0x15b2   :  { %v3300_v23 = vadd.f32 %v5279_v21, %v3299_v22  ;;  %v5887_v24 = vpop.f32.mrb[53].mxu1 }
0x15b3   :  { %v3302_v25 = vpop.f32.mrb[54].mxu1 }
0x15b4   :  { %v5283_v19 = vmul.f32 -1.442695, %v3300_v23  ;;  %v3303_v20 = vadd.f32 %v5279_v21, %v3302_v25  ;;  %v5888_v26 = vpop.f32.mrb[55].mxu1 }
0x15b6   :  { %6448 = vpow2.f32 %v5283_v19  ;;  %v5284_v27 = vmul.f32 -1.442695, %v3303_v20  ;;  %v6382_v19 = vld [vmem:[%s7803_s0 + $0xe8] sm:$0xff]  }
0x15b8   :  { %6450 = vpow2.f32 %v5284_v27 }
0x15c0   :  { %v6449_v49 = vpop.eup %6448 }
0x15c1   :  { %v3312_v51 = vadd.f32 1.0, %v6449_v49 }
0x15c2   :  { %v6451_v29 = vpop.eup %6450 }
0x15c3   :  { %6452 = vrcp.f32 %v3312_v51  ;;  %v3313_v28 = vadd.f32 1.0, %v6451_v29 }
0x15c5   :  { %6454 = vrcp.f32 %v3313_v28 }
0x15cd   :  { %v6453_v34 = vpop.eup %6452 }
0x15ce   :  { %3320 = vrot.lane.b32.xlu0 %v6453_v34, %s6527_s7 }
0x15cf   :  { %v6455_v36 = vpop.eup %6454 }
0x15d0   :  { %3322 = vrot.lane.b32.xlu1 %v6455_v36, %s6527_s7 }
0x1640   :  { %v3321_v37 = vpop.permute.xlu0 %3320 }
0x1641   :  { %v7431_v60 = vmul.f32 %v3321_v37, %v3300_v23 }
0x1642   :  { %v3323_v62 = vpop.permute.xlu1 %3322 }
0x1643   :  { %3496 = vst.msk [vmem:[#allocation2 + $0x8] sm:$0xff] %vm1556_vm0, %v7431_v60  ;;  %v7435_v38 = vmul.f32 %v3323_v62, %v3303_v20 }
0x1645   :  { %v3332_v39 = vpack.c.bf16 %v7435_v38, %v7431_v60  ;;  %3497 = vst.msk [vmem:[#allocation2 + $0x10] sm:$0xff] %vm1556_vm0, %v7435_v38 }
0x1647   :  { %5894 = vmatmul.mubr.msk.bf16.vlgmr.msra.gmra.mrb[56].mxu1 %vm1556_vm0, %v3332_v39 }
0x1648   :  { %6143 = vmatpush3.bf16.msk.msra.mxu1 %vm7046_vm5, %v6138_v5 }
0x1649   :  { %5925 = vmatprep.subr.bf16.mxu1 %v6525_v41 }
0x164a   :  { %v3584_v27 = vld [vmem:[#allocation2 + $0x6] sm:$0xff] }
0x164b   :  { %v3672_v49 = vld [vmem:[#allocation2 + $0x7] sm:$0xff]  ;;  %v3586_v62 = vsel %vm7117_vm9, %v3584_v27, 0.0 }
0x164c   :  { %v3585_v20 = vld [vmem:[#allocation2 + $0xe] sm:$0xff] }
0x164d   :  { %v3673_v26 = vld [vmem:[#allocation2 + $0xf] sm:$0xff]  ;;  %v3587_v29 = vsel %vm7109_vm7, %v3585_v20, 0.0 }
0x164e   :  { %v3675_v28 = vsel %vm7113_vm8, %v3673_v26, 0.0 }
0x171a   :  { %v3387_v43 = vpop.f32.mrb[56].mxu1 }
0x171b   :  { %v3388_v44 = vadd.f32 %v5285_v42, %v3387_v43  ;;  %v5895_v45 = vpop.f32.mrb[57].mxu1 }
0x171c   :  { %v3390_v48 = vpop.f32.mrb[58].mxu1 }
0x171d   :  { %v3391_v17 = vadd.f32 %v5285_v42, %v3390_v48  ;;  %v5896_v53 = vpop.f32.mrb[59].mxu1  ;;  %v3394_v16 = vsel %vm1741_vm2, %v3388_v44, -inf  ;;  %v3674_v42 = vsel %vm7121_vm10, %v3672_v49, 0.0 }
0x171e   :  { %3395 = vmax.xlane.f32.xlu1 %v3394_v16 }
0x171f   :  { %v3397_v54 = vsel %vm1741_vm2, %v3391_v17, -inf }
0x1720   :  { %3398 = vmax.xlane.f32.xlu0 %v3397_v54 }
0x17ab   :  { %v3396_v50 = vpop.xlane.xlu1 %3395 }
0x17ac   :  { %v3400_v30 = vsub.f32 %v3388_v44, %v3396_v50 }
0x17ad   :  { %v3399_v56 = vpop.xlane.xlu0 %3398 }
0x17ae   :  { %v3402_v57 = vmul.f32 1.442695, %v3400_v30  ;;  %v3401_v58 = vsub.f32 %v3391_v17, %v3399_v56 }
0x17b0   :  { %6456 = vpow2.f32 %v3402_v57  ;;  %v3404_v33 = vmul.f32 1.442695, %v3401_v58 }
0x17b2   :  { %6458 = vpow2.f32 %v3404_v33 }
0x17ba   :  { %v6457_v35 = vpop.eup %6456 }
0x17bb   :  { %5901 = vmatprep.mubr.msk.f32.mxu0 %vm1741_vm2, %v6457_v35 }
0x17bc   :  { %v6459_v59 = vpop.eup %6458 }
0x17bd   :  { %5902 = vmatmul.mubr.msk.f32.vlgmr.msra.gmra.mrb[30].mxu0 %vm1741_vm2, %v6459_v59 }
0x17be   :  { %6137 = vmatpush3.bf16.msk.msra.mxu0 %vm7046_vm5, %v6132_v7  ;;  %v7509_v7 = vld [vmem:[#allocation3 + $0x138] sm:$0xff] }
0x17bf   :  { %6146 = vmatprep.subr.msk.bf16.mxu0 %vm7046_vm5, %v6144_v10 }
0x1890   :  { %v5903_v11 = vpop.f32.mrb[30].mxu0 }
0x1891   :  { %v3489_v13 = vadd.f32 1e-20, %v5903_v11  ;;  %v3483_v14 = vpop.f32.mrb[31].mxu0  ;;  %v6384_v11 = vld [vmem:[%s7803_s0 + $0xf8] sm:$0xff]  }
0x1892   :  { %v3484_v21 = vadd.f32 1e-20, %v3483_v14 }
0x1893   :  { %6460 = vrcp.f32 %v3489_v13  ;;  %v6385_v13 = vld [vmem:[%s7803_s0 + $0x100] sm:$0xff]  }
0x1894   :  { %6462 = vrcp.f32 %v3484_v21 }
0x189d   :  { %v6461_v22 = vpop.eup %6460 }
0x189e   :  { %v6463_v23 = vpop.eup %6462  ;;  %v3495_v25 = vmul.f32 %v6461_v22, %v6459_v59 }
0x189f   :  { %v3494_v24 = vmul.f32 %v6463_v23, %v6457_v35 }
0x18a1   :  { %5908 = vmatprep.mubr.msk.f32.mxu0 %vm1741_vm2, %v3494_v24  ;;  %5915 = vmatprep.mubr.msk.f32.mxu1 %vm1741_vm2, %v3494_v24 }
0x18a2   :  { %5909 = vmatmul.mubr.msk.f32.vlgmr.msra.gmra.mrb[52].mxu0 %vm1741_vm2, %v3495_v25  ;;  %5916 = vmatmul.mubr.msk.f32.vlgmr.msra.gmra.mrb[42].mxu1 %vm1741_vm2, %v3495_v25 }
0x18a3   :  { %6149 = vmatpush3.bf16.msk.msra.mxu0 %vm7046_vm5, %v6144_v10  ;;  %5922 = vmatprep.mubr.msk.f32.mxu0 %vm1741_vm2, %v3494_v24  ;;  %v7521_v10 = vld [vmem:[#allocation3 + $0x148] sm:$0xff] }
0x18a4   :  { %5929 = vmatprep.mubr.msk.bf16.mxu1 %vm6526_vm1, %v6525_v41  ;;  %5933 = vmatprep.subr.bf16.mxu0 %v6525_v41 }
0x18a5   :  { %5926 = vmatpush3.bf16.msra.mxu1 %v6382_v19 }
0x18a6   :  { %5923 = vmatmul.mubr.msk.f32.vlgmr.msra.gmra.mrb[54].mxu0 %vm1741_vm2, %v3495_v25  ;;  %5927 = vmatprep.subr.bf16.mxu1 %v6525_v41 }
0x18a7   :  { %5937 = vmatprep.mubr.msk.bf16.mxu0 %vm6526_vm1, %v6525_v41  ;;  %5934 = vmatpush3.bf16.msra.mxu0 %v6384_v11  ;;  %v7592_v11 = vld [vmem:[#allocation3 + $0x1a0] sm:$0xff] }
0x18a8   :  { %5935 = vmatprep.subr.bf16.mxu0 %v6525_v41 }
0x18a9   :  { %5928 = vmatpush3.bf16.msra.mxu1 %v6383_v12 }
0x18aa   :  { %5941 = vmatprep.subr.bf16.mxu1 %v6525_v41 }
0x18ab   :  { %5936 = vmatpush3.bf16.msra.mxu0 %v6385_v13 }
0x1975   :  { %v5910_v51 = vpop.f32.mrb[52].mxu0  ;;  %v5917_v31 = vpop.f32.mrb[42].mxu1 }
0x1976   :  { %v3589_v34 = vmul.f32 %v5910_v51, %v3587_v29  ;;  %v3677_v36 = vmul.f32 %v5917_v31, %v3675_v28  ;;  %v3575_v37 = vpop.f32.mrb[53].mxu0  ;;  %v3663_v39 = vpop.f32.mrb[43].mxu1 }
0x1977   :  { %v3588_v43 = vmul.f32 %v3586_v62, %v3575_v37  ;;  %v3676_v44 = vmul.f32 %v3674_v42, %v3663_v39 }
0x1978   :  { %v3679_v45 = vadd.f32 %v3677_v36, %v3589_v34 }
0x1979   :  { %v3678_v48 = vadd.f32 %v3676_v44, %v3588_v43  ;;  %v5924_v61 = vpop.f32.mrb[54].mxu0 }
0x197a   :  { %v3761_v17 = vmul.f32 %v5924_v61, %v7435_v38  ;;  %v3751_v53 = vpop.f32.mrb[55].mxu0 }
0x197b   :  { %v3760_v0 = vmul.f32 %v3751_v53, %v7431_v60 }
0x197c   :  { %v3763_v16 = vadd.f32 %v3761_v17, %v3679_v45 }
0x197d   :  { %v3762_v54 = vadd.f32 %v3760_v0, %v3678_v48  ;;  %v5305_v48 = vld [vmem:[#allocation3 + $0xc0] ss:$0 sm:$0xff] }
0x197f   :  { %v3768_v55 = vpack.c.bf16 %v3763_v16, %v3762_v54 }
0x1981   :  { %5930 = vmatmul.mubr.msk.bf16.vlgmr.msra.gmra.mrb[60].mxu1 %vm1556_vm0, %v3768_v55 }
0x1982   :  { %5945 = vmatprep.mubr.msk.bf16.mxu1 %vm6526_vm1, %v6525_v41 }
0x1a54   :  { %v3818_v2 = vpop.f32.mrb[60].mxu1 }
0x1a55   :  { %v3825_v46 = vadd.f32 %v3818_v2, %v7392_v47  ;;  %v5931_v32 = vpop.f32.mrb[61].mxu1 }
0x1a56   :  { %v3821_v50 = vpop.f32.mrb[62].mxu1 }
0x1a57   :  { %v7496_v30 = vadd.f32 %v5304_v4, %v3825_v46  ;;  %v3826_v38 = vadd.f32 %v3821_v50, %v7395_v52  ;;  %v5932_v56 = vpop.f32.mrb[63].mxu1 }
0x1a59   :  { %v7499_v60 = vadd.f32 %v5304_v4, %v3826_v38  ;;  %v3834_v57 = vsel %vm1556_vm0, %v7496_v30, 0.0  ;;  %v6494_v4 = vld [vmem:[%s7806_s3 + $0x10] sm:$0xff]  ;;  %v6495_v38 = vld [vmem:[%s7806_s3 + $0x18] sm:$0xff] }
0x1a5a   :  { %3835 = vadd.xlane.f32.xlu0 %v3834_v57 }
0x1a5b   :  { %v3837_v58 = vsel %vm1556_vm0, %v7499_v60, 0.0 }
0x1a5c   :  { %3838 = vadd.xlane.f32.xlu1 %v3837_v58 }
0x1ae7   :  { %v3836_v33 = vpop.xlane.xlu0 %3835 }
0x1ae8   :  { %v3840_v35 = vmul.f32 0.03125, %v3836_v33 }
0x1ae9   :  { %v3839_v47 = vpop.xlane.xlu1 %3838 }
0x1aea   :  { %v3842_v59 = vsub.f32 %v7496_v30, %v3840_v35  ;;  %v3841_v63 = vmul.f32 0.03125, %v3839_v47  ;;  %v4037_v35 = vld [vmem:[#allocation3 + $0x150] sm:$0xff]  ;;  %v4038_v47 = vld [vmem:[#allocation3 + $0x158] sm:$0xff] }
0x1aec   :  { %v3843_v1 = vsub.f32 %v7499_v60, %v3841_v63  ;;  %v3844_v52 = vmul.f32 %v3842_v59, %v3842_v59  ;;  %v7563_v63 = vld [vmem:[#allocation3 + $0x178] sm:$0xff] }
0x1aee   :  { %v3846_v3 = vsel %vm1556_vm0, %v3844_v52, 0.0  ;;  %v3845_v5 = vmul.f32 %v3843_v1, %v3843_v1  ;;  %v4040_v52 = vld [vmem:[#allocation3 + $0x168] sm:$0xff] }
0x1aef   :  { %3847 = vadd.xlane.f32.xlu0 %v3846_v3 }
0x1af0   :  { %v3849_v6 = vsel %vm1556_vm0, %v3845_v5, 0.0  ;;  %v7567_v5 = vld [vmem:[#allocation3 + $0x170] sm:$0xff] }
0x1af1   :  { %3850 = vadd.xlane.f32.xlu1 %v3849_v6  ;;  %v7571_v6 = vld [vmem:[#allocation3 + $0x188] sm:$0xff] }
0x1b02   :  { %3936 = vrot.lane.b32.xlu1 %v7509_v7, %s6530_s4 }
0x1b05   :  { %3934 = vrot.lane.b32.xlu0 %v7511_v8, %s6530_s4 }
0x1b06   :  { %3938 = vrot.lane.b32.xlu1 %v7515_v9, %s6530_s4 }
0x1b0a   :  { %3940 = vrot.lane.b32.xlu1 %v7521_v10, %s6530_s4 }
0x1b7c   :  { %v3848_v14 = vpop.xlane.xlu0 %3847 }
0x1b7d   :  { %v3852_v21 = vmul.f32 0.03125, %v3848_v14 }
0x1b7e   :  { %v3851_v22 = vpop.xlane.xlu1 %3850 }
0x1b7f   :  { %v3854_v23 = vadd.f32 1e-05, %v3852_v21  ;;  %v3853_v24 = vmul.f32 0.03125, %v3851_v22 }
0x1b80   :  { %v3935_v25 = vpop.permute.xlu0 %3934 }
0x1b81   :  { %6464 = vrsqrt.f32 %v3854_v23  ;;  %v3855_v19 = vadd.f32 1e-05, %v3853_v24  ;;  %v3946_v20 = vmul.f32 %v3935_v25, %v7022_v40 }
0x1b82   :  { %v3937_v12 = vpop.permute.xlu1 %3936 }
0x1b83   :  { %6466 = vrsqrt.f32 %v3855_v19  ;;  %v3947_v26 = vmul.f32 %v3937_v12, %v7022_v40 }
0x1b85   :  { %v3967_v27 = vpack.c.bf16 %v3947_v26, %v3946_v20 }
0x1b86   :  { %v3939_v49 = vpop.permute.xlu1 %3938 }
0x1b87   :  { %3971 = vrot.lane.b32.xlu0 %v3967_v27, %s6530_s4  ;;  %v3948_v31 = vmul.f32 %v3939_v49, %v7022_v40 }
0x1b8a   :  { %v3941_v51 = vpop.permute.xlu1 %3940 }
0x1b8b   :  { %v6465_v29 = vpop.eup %6464  ;;  %v3949_v28 = vmul.f32 %v3941_v51, %v7022_v40 }
0x1b8c   :  { %v3858_v37 = vmul.f32 %v6465_v29, %v3842_v59  ;;  %v6150_v59 = vpack.c.bf16 %v4038_v47, %v4037_v35 }
0x1b8d   :  { %v6467_v34 = vpop.eup %6466  ;;  %v3968_v36 = vpack.c.bf16 %v3949_v28, %v3948_v31 }
0x1b8e   :  { %v3859_v62 = vmul.f32 %v6467_v34, %v3843_v1  ;;  %6151 = vmatprep.subr.bf16.mxu0 %v6150_v59  ;;  %v4039_v1 = vld [vmem:[#allocation3 + $0x160] sm:$0xff] }
0x1b8f   :  { %3973 = vrot.lane.b32.xlu1 %v3968_v36, %s6530_s4  ;;  %v6154_v3 = vpack.c.bf16 %v4040_v52, %v4039_v1 }
0x1b90   :  { %v3864_v39 = vpack.c.bf16 %v3859_v62, %v3858_v37 }
0x1b92   :  { %5938 = vmatmul.mubr.msk.bf16.vlgmr.msra.gmra.mrb[56].mxu0 %vm1556_vm0, %v3864_v39 }
0x1b93   :  { %6153 = vmatpush3.bf16.msra.mxu0 %v6150_v59 }
0x1b94   :  { %6155 = vmatprep.subr.bf16.mxu0 %v6154_v3 }
0x1b97   :  { %6157 = vmatpush3.bf16.msra.mxu0 %v6154_v3 }
0x1b98   :  { %5960 = vmatprep.subr.bf16.mxu0 %v6525_v41 }
0x1bf9   :  { %v3972_v42 = vpop.permute.xlu0 %3971 }
0x1bfa   :  { %v3979_v43 = vsel %vm1556_vm0, %v3972_v42, 0 }
0x1bfb   :  { %5942 = vmatpush3.bf16.xpose.msra.mxu1 %v3979_v43 }
0x1bfc   :  { %5943 = vmatprep.subr.bf16.mxu1 %v6525_v41 }
0x1c01   :  { %v3974_v44 = vpop.permute.xlu1 %3973 }
0x1c02   :  { %v3982_v45 = vsel %vm1556_vm0, %v3974_v44, 0 }
0x1c03   :  { %5944 = vmatpush3.bf16.xpose.msra.mxu1 %v3982_v45 }
0x1c04   :  { %5968 = vmatprep.subr.bf16.mxu1 %v6525_v41 }
0x1c65   :  { %v3919_v61 = vpop.f32.mrb[56].mxu0 }
0x1c66   :  { %v5939_v17 = vpop.f32.mrb[57].mxu0  ;;  %v3920_v0 = vadd.f32 %v5305_v48, %v3919_v61 }
0x1c67   :  { %v3922_v53 = vpop.f32.mrb[58].mxu0 }
0x1c68   :  { %v3923_v16 = vadd.f32 %v5305_v48, %v3922_v53  ;;  %v5940_v54 = vpop.f32.mrb[59].mxu0 }
0x1c6a   :  { %v7543_v55 = vpack.c.bf16 %v3923_v16, %v3920_v0 }
0x1c6c   :  { %5946 = vmatmul.mubr.msk.bf16.vlgmr.msra.gmra.mrb[64].mxu1 %vm1556_vm0, %v7543_v55 }
0x1c6d   :  { %5972 = vmatprep.mubr.msk.bf16.mxu1 %vm6526_vm1, %v6525_v41 }
0x1d3f   :  { %v4018_v2 = vpop.f32.mrb[64].mxu1 }
0x1d40   :  { %v4019_v46 = vadd.f32 %v6494_v4, %v4018_v2  ;;  %v5947_v32 = vpop.f32.mrb[65].mxu1 }
0x1d41   :  { %v4021_v50 = vpop.f32.mrb[66].mxu1 }
0x1d42   :  { %v4022_v56 = vadd.f32 %v6495_v38, %v4021_v50  ;;  %v5948_v57 = vpop.f32.mrb[67].mxu1  ;;  %v4025_v58 = vsel %vm1556_vm0, %v4019_v46, -inf }
0x1d43   :  { %4026 = vmax.xlane.f32.xlu0 %v4025_v58 }
0x1d44   :  { %v4028_v33 = vsel %vm1556_vm0, %v4022_v56, -inf }
0x1d45   :  { %4029 = vmax.xlane.f32.xlu1 %v4028_v33 }
0x1d56   :  { %3952 = vrot.lane.b32.xlu1 %v7509_v7, %s6527_s7  ;;  %v7576_v7 = vld [vmem:[#allocation3 + $0x180] sm:$0xff] }
0x1d59   :  { %3950 = vrot.lane.b32.xlu0 %v7511_v8, %s6527_s7  ;;  %v7580_v8 = vld [vmem:[#allocation3 + $0x198] sm:$0xff] }
0x1d5a   :  { %3956 = vrot.lane.b32.xlu1 %v7521_v10, %s6527_s7  ;;  %v7588_v10 = vld [vmem:[#allocation3 + $0x1a8] sm:$0xff] }
0x1d5d   :  { %3954 = vrot.lane.b32.xlu0 %v7515_v9, %s6527_s7  ;;  %v7584_v9 = vld [vmem:[#allocation3 + $0x190] sm:$0xff] }
0x1d5e   :  { %4265 = vrot.lane.b32.xlu1 %v7563_v63, %s6530_s4 }
0x1d61   :  { %4263 = vrot.lane.b32.xlu0 %v7567_v5, %s6530_s4 }
0x1d62   :  { %4269 = vrot.lane.b32.xlu1 %v7571_v6, %s6530_s4 }
0x1d65   :  { %4267 = vrot.lane.b32.xlu0 %v7576_v7, %s6530_s4 }
0x1d66   :  { %4273 = vrot.lane.b32.xlu1 %v7580_v8, %s6530_s4 }
0x1d69   :  { %4271 = vrot.lane.b32.xlu0 %v7584_v9, %s6530_s4 }
0x1d6a   :  { %4277 = vrot.lane.b32.xlu1 %v7588_v10, %s6530_s4 }
0x1d6d   :  { %4275 = vrot.lane.b32.xlu0 %v7592_v11, %s6530_s4 }
0x1dd0   :  { %v4027_v13 = vpop.xlane.xlu0 %4026 }
0x1dd1   :  { %v4031_v14 = vsub.f32 %v4019_v46, %v4027_v13 }
0x1dd2   :  { %v4030_v21 = vpop.xlane.xlu1 %4029 }
0x1dd3   :  { %v4033_v22 = vmul.f32 1.442695, %v4031_v14  ;;  %v4032_v23 = vsub.f32 %v4022_v56, %v4030_v21  ;;  %v6386_v56 = vld [vmem:[%s7803_s0 + $0x108] sm:$0xff]  }
0x1dd4   :  { %v3951_v24 = vpop.permute.xlu0 %3950  ;;  %5969 = vmatpush3.bf16.msra.mxu1 %v6386_v56 }
0x1dd5   :  { %6468 = vpow2.f32 %v4033_v22  ;;  %v4035_v25 = vmul.f32 1.442695, %v4032_v23  ;;  %v3962_v12 = vmul.f32 %v3951_v24, %v7022_v40  ;;  %5970 = vmatprep.subr.bf16.mxu1 %v6525_v41 }
0x1dd6   :  { %v3953_v19 = vpop.permute.xlu1 %3952 }
0x1dd7   :  { %6470 = vpow2.f32 %v4035_v25  ;;  %v3963_v20 = vmul.f32 %v3953_v19, %v7022_v40 }
0x1dd8   :  { %v3955_v26 = vpop.permute.xlu0 %3954 }
0x1dd9   :  { %v4127_v27 = vpack.c.bf16 %v3963_v20, %v3962_v12  ;;  %v3964_v51 = vmul.f32 %v3955_v26, %v7022_v40  ;;  %v6387_v12 = vld [vmem:[%s7803_s0 + $0x110] sm:$0xff]  }
0x1dda   :  { %v3957_v49 = vpop.permute.xlu1 %3956  ;;  %5971 = vmatpush3.bf16.msra.mxu1 %v6387_v12 }
0x1ddb   :  { %v3965_v29 = vmul.f32 %v3957_v49, %v7022_v40  ;;  %4131 = vrot.lane.b32.xlu0 %v4127_v27, %s6529_s27 }
0x1ddc   :  { %v4264_v31 = vpop.permute.xlu0 %4263 }
0x1ddd   :  { %v4128_v28 = vpack.c.bf16 %v3965_v29, %v3964_v51  ;;  %v4287_v37 = vmul.f32 %v4264_v31, %v7218_v15  ;;  %v6496_v31 = vld [vmem:[%s7806_s3 + $0x20] sm:$0xff] }
0x1dde   :  { %v4266_v34 = vpop.permute.xlu1 %4265 }
0x1ddf   :  { %v6469_v36 = vpop.eup %6468  ;;  %v4288_v62 = vmul.f32 %v4266_v34, %v7221_v18  ;;  %4133 = vrot.lane.b32.xlu1 %v4128_v28, %s6529_s27 }
0x1de0   :  { %5957 = vmatprep.mubr.msk.f32.mxu0 %vm1556_vm0, %v6469_v36  ;;  %v4268_v39 = vpop.permute.xlu0 %4267 }
0x1de1   :  { %v6471_v42 = vpop.eup %6470  ;;  %v4327_v43 = vpack.c.bf16 %v4288_v62, %v4287_v37  ;;  %v4289_v44 = vmul.f32 %v4268_v39, %v7218_v15  ;;  %v6497_v37 = vld [vmem:[%s7806_s3 + $0x28] sm:$0xff] }
0x1de2   :  { %5958 = vmatmul.mubr.msk.f32.vlgmr.msra.gmra.mrb[60].mxu0 %vm1556_vm0, %v6471_v42  ;;  %v4270_v40 = vpop.permute.xlu1 %4269 }
0x1de3   :  { %v4290_v45 = vmul.f32 %v4270_v40, %v7221_v18  ;;  %4338 = vrot.lane.b32.xlu0 %v4327_v43, %s6530_s4  ;;  %5964 = vmatprep.mubr.msk.bf16.mxu0 %vm6526_vm1, %v6525_v41  ;;  %v4414_v40 = vld [vmem:[#allocation3 + $0x1b0] sm:$0xff] }
0x1de4   :  { %v4272_v48 = vpop.permute.xlu0 %4271 }
0x1de5   :  { %v4328_v61 = vpack.c.bf16 %v4290_v45, %v4289_v44  ;;  %v4291_v53 = vmul.f32 %v4272_v48, %v7218_v15  ;;  %v4415_v44 = vld [vmem:[#allocation3 + $0x1b8] sm:$0xff]  ;;  %v4416_v48 = vld [vmem:[#allocation3 + $0x1c0] sm:$0xff] }
0x1de6   :  { %v4274_v17 = vpop.permute.xlu1 %4273  ;;  %v6158_v45 = vpack.c.bf16 %v4415_v44, %v4414_v40 }
0x1de7   :  { %v4292_v0 = vmul.f32 %v4274_v17, %v7221_v18  ;;  %4340 = vrot.lane.b32.xlu1 %v4328_v61, %s6530_s4  ;;  %v4417_v61 = vld [vmem:[#allocation3 + $0x1c8] sm:$0xff] }
0x1de8   :  { %v4276_v16 = vpop.permute.xlu0 %4275  ;;  %6159 = vmatprep.subr.bf16.mxu1 %v6158_v45  ;;  %v6162_v17 = vpack.c.bf16 %v4417_v61, %v4416_v48  ;;  %v4642_v48 = vld [vmem:[#allocation3 + $0x210] sm:$0xff]  ;;  %v4643_v61 = vld [vmem:[#allocation3 + $0x218] sm:$0xff] }
0x1de9   :  { %v4329_v54 = vpack.c.bf16 %v4292_v0, %v4291_v53  ;;  %v4293_v4 = vmul.f32 %v4276_v16, %v7218_v15  ;;  %v4418_v53 = vld [vmem:[#allocation3 + $0x1d0] sm:$0xff]  ;;  %v4419_v0 = vld [vmem:[#allocation3 + $0x1d8] sm:$0xff] }
0x1dea   :  { %v4278_v2 = vpop.permute.xlu1 %4277  ;;  %v6166_v16 = vpack.c.bf16 %v4419_v0, %v4418_v53  ;;  %v4644_v53 = vld [vmem:[#allocation3 + $0x220] sm:$0xff]  ;;  %v4645_v0 = vld [vmem:[#allocation3 + $0x228] sm:$0xff] }
0x1deb   :  { %v4294_v46 = vmul.f32 %v4278_v2, %v7221_v18  ;;  %4342 = vrot.lane.b32.xlu0 %v4329_v54, %s6530_s4  ;;  %v4420_v54 = vld [vmem:[#allocation3 + $0x1e0] sm:$0xff]  ;;  %v4421_v2 = vld [vmem:[#allocation3 + $0x1e8] sm:$0xff] }
0x1ded   :  { %v4330_v32 = vpack.c.bf16 %v4294_v46, %v4293_v4 }
0x1def   :  { %4332 = vrot.lane.b32.xlu0 %v7543_v55, %s6527_s7  ;;  %4344 = vrot.lane.b32.xlu1 %v4330_v32, %s6530_s4 }
0x1e4d   :  { %v4132_v50 = vpop.permute.xlu0 %4131 }
0x1e4e   :  { %5961 = vmatpush3.bf16.msra.mxu0 %v4132_v50 }
0x1e4f   :  { %5962 = vmatprep.subr.bf16.mxu0 %v6525_v41 }
0x1e51   :  { %v4134_v38 = vpop.permute.xlu1 %4133 }
0x1e52   :  { %5963 = vmatpush3.bf16.msra.mxu0 %v4134_v38 }
0x1e53   :  { %5976 = vmatprep.subr.bf16.mxu0 %v6525_v41 }
0x1e55   :  { %v4339_v52 = vpop.permute.xlu0 %4338 }
0x1e56   :  { %v4350_v13 = vsel %vm1556_vm0, %v4339_v52, 0 }
0x1e59   :  { %v4341_v14 = vpop.permute.xlu1 %4340 }
0x1e5a   :  { %v4353_v21 = vsel %vm1556_vm0, %v4341_v14, 0 }
0x1e5d   :  { %v4343_v22 = vpop.permute.xlu0 %4342 }
0x1e5e   :  { %v4356_v23 = vsel %vm1556_vm0, %v4343_v22, 0 }
0x1e61   :  { %v4345_v24 = vpop.permute.xlu1 %4344  ;;  %v4333_v19 = vpop.permute.xlu0 %4332 }
0x1e62   :  { %v4359_v25 = vsel %vm1556_vm0, %v4345_v24, 0 }
0x1eb5   :  { %v5959_v57 = vpop.f32.mrb[60].mxu0 }
0x1eb6   :  { %v4119_v58 = vadd.f32 1e-20, %v5959_v57  ;;  %v4113_v55 = vpop.f32.mrb[61].mxu0 }
0x1eb7   :  { %v4114_v33 = vadd.f32 1e-20, %v4113_v55 }
0x1eb8   :  { %6472 = vrcp.f32 %v4119_v58 }
0x1eb9   :  { %6474 = vrcp.f32 %v4114_v33 }
0x1ec2   :  { %v6473_v35 = vpop.eup %6472 }
0x1ec3   :  { %v6475_v47 = vpop.eup %6474  ;;  %v4125_v59 = vmul.f32 %v6473_v35, %v6471_v42 }
0x1ec4   :  { %v4124_v1 = vmul.f32 %v6475_v47, %v6469_v36 }
0x1ec6   :  { %v4126_v3 = vpack.c.bf16 %v4125_v59, %v4124_v1 }
0x1ec8   :  { %5965 = vmatmul.mubr.msk.bf16.vlgmr.msra.gmra.mrb[64].mxu0 %vm1556_vm0, %v4126_v3 }
0x1ec9   :  { %5977 = vmatpush3.bf16.xpose.msra.mxu0 %v4350_v13  ;;  %5984 = vmatprep.mubr.msk.bf16.mxu0 %vm6526_vm1, %v6525_v41 }
0x1eca   :  { %5978 = vmatprep.subr.bf16.mxu0 %v6525_v41 }
0x1ed1   :  { %5979 = vmatpush3.bf16.xpose.msra.mxu0 %v4353_v21 }
0x1ed2   :  { %5980 = vmatprep.subr.bf16.mxu0 %v6525_v41 }
0x1ed9   :  { %5981 = vmatpush3.bf16.xpose.msra.mxu0 %v4356_v23 }
0x1eda   :  { %5982 = vmatprep.subr.bf16.mxu0 %v6525_v41 }
0x1ee1   :  { %5983 = vmatpush3.bf16.xpose.msra.mxu0 %v4359_v25 }
0x1ee2   :  { %6019 = vmatprep.subr.bf16.mxu0 %v6525_v41 }
0x1ee8   :  { %5985 = vmatmul.mubr.msk.bf16.vlgmr.msra.gmra.mrb[68].mxu0 %vm1556_vm0, %v4333_v19 }
0x1ee9   :  { %6023 = vmatprep.mubr.msk.bf16.mxu0 %vm6526_vm1, %v6525_v41 }
0x1f9b   :  { %v4174_v20 = vpop.f32.mrb[64].mxu0 }
0x1f9c   :  { %v5966_v26 = vpop.f32.mrb[65].mxu0 }
0x1f9d   :  { %v4177_v27 = vpop.f32.mrb[66].mxu0  ;;  %v4639_v26 = vld [vmem:[#allocation3 + $0x1f8] sm:$0xff] }
0x1f9e   :  { %v4185_v49 = vpack.c.bf16 %v4177_v27, %v4174_v20  ;;  %v5967_v51 = vpop.f32.mrb[67].mxu0 }
0x1f9f   :  { %v6388_v51 = vld [vmem:[%s7803_s0 + $0x118] sm:$0xff]  }
0x1fa0   :  { %5973 = vmatmul.mubr.msk.bf16.vlgmr.msra.gmra.mrb[68].mxu1 %vm1556_vm0, %v4185_v49  ;;  %6020 = vmatpush3.bf16.msra.mxu0 %v6388_v51 }
0x1fa1   :  { %6161 = vmatpush3.bf16.msra.mxu1 %v6158_v45  ;;  %6021 = vmatprep.subr.bf16.mxu0 %v6525_v41 }
0x1fa2   :  { %6163 = vmatprep.subr.bf16.mxu1 %v6162_v17 }
0x1fa5   :  { %6165 = vmatpush3.bf16.msra.mxu1 %v6162_v17  ;;  %v6182_v17 = vpack.c.bf16 %v4643_v61, %v4642_v48 }
0x1fa6   :  { %6167 = vmatprep.subr.bf16.mxu1 %v6166_v16 }
0x1fa9   :  { %6169 = vmatpush3.bf16.msra.mxu1 %v6166_v16  ;;  %v6186_v16 = vpack.c.bf16 %v4645_v0, %v4644_v53 }
0x1fbb   :  { %v4395_v29 = vpop.f32.mrb[68].mxu0 }
0x1fbc   :  { %v4396_v28 = vadd.f32 %v6496_v31, %v4395_v29  ;;  %v5986_v34 = vpop.f32.mrb[69].mxu0 }
0x1fbd   :  { %v4398_v36 = vpop.f32.mrb[70].mxu0 }
0x1fbe   :  { %v4399_v62 = vadd.f32 %v6497_v37, %v4398_v36  ;;  %v5987_v39 = vpop.f32.mrb[71].mxu0  ;;  %v4402_v42 = vsel %vm2701_vm11, %v4396_v28, -inf }
0x1fbf   :  { %4403 = vmax.xlane.f32.xlu1 %v4402_v42  ;;  %v4640_v42 = vld [vmem:[#allocation3 + $0x200] sm:$0xff] }
0x1fc0   :  { %v4405_v43 = vsel %vm2701_vm11, %v4399_v62, -inf }
0x1fc1   :  { %4406 = vmax.xlane.f32.xlu0 %v4405_v43  ;;  %v4641_v43 = vld [vmem:[#allocation3 + $0x208] sm:$0xff] }
0x1fc2   :  { %v6178_v45 = vpack.c.bf16 %v4641_v43, %v4640_v42  ;;  %v6394_v42 = vld [vmem:[%s7803_s0 + $0x148] sm:$0xff]   ;;  %v6395_v43 = vld [vmem:[%s7803_s0 + $0x150] sm:$0xff]  }
0x1fd0   :  { %4297 = vrot.lane.b32.xlu1 %v7563_v63, %s6527_s7  ;;  %v6170_v63 = vpack.c.bf16 %v4421_v2, %v4420_v54  ;;  %v6389_v54 = vld [vmem:[%s7803_s0 + $0x120] sm:$0xff]  }
0x1fd1   :  { %6022 = vmatpush3.bf16.msra.mxu0 %v6389_v54 }
0x1fd2   :  { %6171 = vmatprep.subr.bf16.mxu1 %v6170_v63  ;;  %6046 = vmatprep.subr.bf16.mxu0 %v6525_v41 }
0x1fd3   :  { %6173 = vmatpush3.bf16.msra.mxu1 %v6170_v63 }
0x1fd4   :  { %4299 = vrot.lane.b32.xlu1 %v7576_v7, %s6527_s7  ;;  %6007 = vmatprep.subr.bf16.mxu1 %v6525_v41 }
0x1fd7   :  { %4295 = vrot.lane.b32.xlu0 %v7567_v5, %s6527_s7 }
0x1fd8   :  { %4303 = vrot.lane.b32.xlu1 %v7584_v9, %s6527_s7 }
0x1fdb   :  { %4301 = vrot.lane.b32.xlu0 %v7571_v6, %s6527_s7 }
0x1fdc   :  { %4307 = vrot.lane.b32.xlu1 %v7592_v11, %s6527_s7 }
0x1fdf   :  { %4305 = vrot.lane.b32.xlu0 %v7580_v8, %s6527_s7 }
0x1fe3   :  { %4309 = vrot.lane.b32.xlu0 %v7588_v10, %s6527_s7 }
0x204c   :  { %v4404_v5 = vpop.xlane.xlu1 %4403 }
0x204d   :  { %v4408_v7 = vsub.f32 %v4396_v28, %v4404_v5 }
0x204e   :  { %v4407_v9 = vpop.xlane.xlu0 %4406 }
0x204f   :  { %v4410_v4 = vmul.f32 1.442695, %v4408_v7  ;;  %v4409_v46 = vsub.f32 %v4399_v62, %v4407_v9 }
0x2050   :  { %v4298_v32 = vpop.permute.xlu1 %4297 }
0x2051   :  { %6476 = vpow2.f32 %v4410_v4  ;;  %v4412_v6 = vmul.f32 1.442695, %v4409_v46  ;;  %v4320_v11 = vmul.f32 %v4298_v32, %v7221_v18  ;;  %v6390_v32 = vld [vmem:[%s7803_s0 + $0x128] sm:$0xff]  }
0x2052   :  { %v4296_v50 = vpop.permute.xlu0 %4295 }
0x2053   :  { %6478 = vpow2.f32 %v4412_v6  ;;  %v4319_v38 = vmul.f32 %v4296_v50, %v7218_v15  ;;  %v6391_v6 = vld [vmem:[%s7803_s0 + $0x130] sm:$0xff]   ;;  %v6392_v50 = vld [vmem:[%s7803_s0 + $0x138] sm:$0xff]  }
0x2054   :  { %v4300_v56 = vpop.permute.xlu1 %4299 }
0x2055   :  { %v4508_v57 = vpack.c.bf16 %v4320_v11, %v4319_v38  ;;  %v4321_v58 = vmul.f32 %v4300_v56, %v7218_v15  ;;  %v6393_v11 = vld [vmem:[%s7803_s0 + $0x140] sm:$0xff]   ;;  %v5321_v38 = vld [vmem:[#allocation3 + $0xd0] ss:$0 sm:$0xff] }
0x2056   :  { %v4302_v8 = vpop.permute.xlu0 %4301 }
0x2057   :  { %v4322_v10 = vmul.f32 %v4302_v8, %v7221_v18  ;;  %4516 = vrot.lane.b32.xlu1 %v4508_v57, %s6529_s27 }
0x2058   :  { %v4304_v55 = vpop.permute.xlu1 %4303 }
0x2059   :  { %v4509_v33 = vpack.c.bf16 %v4322_v10, %v4321_v58  ;;  %v4323_v59 = vmul.f32 %v4304_v55, %v7218_v15 }
0x205a   :  { %v4306_v35 = vpop.permute.xlu0 %4305 }
0x205b   :  { %v6477_v47 = vpop.eup %6476  ;;  %v4324_v1 = vmul.f32 %v4306_v35, %v7221_v18  ;;  %4518 = vrot.lane.b32.xlu0 %v4509_v33, %s6529_s27 }
0x205c   :  { %6004 = vmatprep.mubr.msk.f32.mxu1 %vm2701_vm11, %v6477_v47  ;;  %v4308_v52 = vpop.permute.xlu1 %4307 }
0x205d   :  { %v6479_v3 = vpop.eup %6478  ;;  %v4510_v13 = vpack.c.bf16 %v4324_v1, %v4323_v59  ;;  %v4325_v21 = vmul.f32 %v4308_v52, %v7218_v15  ;;  %v5313_v59 = vld [vmem:[#allocation3 + $0xc8] ss:$0 sm:$0xff] }
0x205e   :  { %6005 = vmatmul.mubr.msk.f32.vlgmr.msra.gmra.mrb[72].mxu1 %vm2701_vm11, %v6479_v3  ;;  %v4310_v14 = vpop.permute.xlu0 %4309 }
0x205f   :  { %v4326_v22 = vmul.f32 %v4310_v14, %v7221_v18  ;;  %4520 = vrot.lane.b32.xlu1 %v4510_v13, %s6529_s27  ;;  %6015 = vmatprep.mubr.msk.bf16.mxu1 %vm6526_vm1, %v6525_v41  ;;  %v4638_v18 = vld [vmem:[#allocation3 + $0x1f0] sm:$0xff] }
0x2060   :  { %v6174_v49 = vpack.c.bf16 %v4639_v26, %v4638_v18 }
0x2061   :  { %v4511_v23 = vpack.c.bf16 %v4326_v22, %v4325_v21 }
0x2063   :  { %4522 = vrot.lane.b32.xlu0 %v4511_v23, %s6529_s27 }
0x2073   :  { %v7687_v24 = vpop.f32.mrb[68].mxu1 }
0x2074   :  { %v5974_v25 = vpop.f32.mrb[69].mxu1  ;;  %v4241_v1 = vadd.f32 %v5313_v59, %v7687_v24  ;;  %v5327_v24 = vld [vmem:[#allocation3 + $0xd8] ss:$0 sm:$0xff] }
0x2075   :  { %v7689_v19 = vpop.f32.mrb[70].mxu1 }
0x2076   :  { %v5975_v12 = vpop.f32.mrb[71].mxu1  ;;  %v4244_v52 = vadd.f32 %v5313_v59, %v7689_v19  ;;  %v4727_v13 = vadd.f32 %v4241_v1, %v7496_v30 }
0x2078   :  { %v4728_v14 = vadd.f32 %v4244_v52, %v7499_v60 }
0x20c9   :  { %v4517_v20 = vpop.permute.xlu1 %4516 }
0x20ca   :  { %6008 = vmatpush3.bf16.msra.mxu1 %v4517_v20 }
0x20cb   :  { %6009 = vmatprep.subr.bf16.mxu1 %v6525_v41 }
0x20cd   :  { %v4519_v15 = vpop.permute.xlu0 %4518 }
0x20ce   :  { %6010 = vmatpush3.bf16.msra.mxu1 %v4519_v15 }
0x20cf   :  { %6011 = vmatprep.subr.bf16.mxu1 %v6525_v41 }
0x20d1   :  { %v4521_v27 = vpop.permute.xlu1 %4520 }
0x20d2   :  { %6012 = vmatpush3.bf16.msra.mxu1 %v4521_v27 }
0x20d3   :  { %6013 = vmatprep.subr.bf16.mxu1 %v6525_v41 }
0x20d5   :  { %v4523_v29 = vpop.permute.xlu0 %4522 }
0x20d6   :  { %6014 = vmatpush3.bf16.msra.mxu1 %v4523_v29 }
0x20d7   :  { %6175 = vmatprep.subr.bf16.mxu1 %v6174_v49 }
0x2131   :  { %v6006_v31 = vpop.f32.mrb[72].mxu1 }
0x2132   :  { %v4500_v28 = vadd.f32 1e-20, %v6006_v31  ;;  %v4494_v34 = vpop.f32.mrb[73].mxu1 }
0x2133   :  { %v4495_v36 = vadd.f32 1e-20, %v4494_v34 }
0x2134   :  { %6480 = vrcp.f32 %v4500_v28 }
0x2135   :  { %6482 = vrcp.f32 %v4495_v36 }
0x213e   :  { %v6481_v37 = vpop.eup %6480 }
0x213f   :  { %v6483_v62 = vpop.eup %6482  ;;  %v4506_v39 = vmul.f32 %v6481_v37, %v6479_v3 }
0x2140   :  { %v4505_v40 = vmul.f32 %v6483_v62, %v6477_v47 }
0x2142   :  { %v4507_v44 = vpack.c.bf16 %v4506_v39, %v4505_v40 }
0x2144   :  { %6016 = vmatmul.mubr.msk.bf16.vlgmr.msra.gmra.mrb[76].mxu1 %vm2701_vm11, %v4507_v44  ;;  %v6397_v44 = vld [vmem:[%s7803_s0 + $0x160] sm:$0xff]  }
0x2145   :  { %6177 = vmatpush3.bf16.msra.mxu1 %v6174_v49  ;;  %6043 = vmatprep.mubr.msk.f32.mxu1 %vm2701_vm11, %v4505_v40  ;;  %v6396_v40 = vld [vmem:[%s7803_s0 + $0x158] sm:$0xff]  }
0x2146   :  { %6179 = vmatprep.subr.bf16.mxu1 %v6178_v45 }
0x2149   :  { %6181 = vmatpush3.bf16.msra.mxu1 %v6178_v45 }
0x214a   :  { %6183 = vmatprep.subr.bf16.mxu1 %v6182_v17 }
0x214d   :  { %6185 = vmatpush3.bf16.msra.mxu1 %v6182_v17 }
0x214e   :  { %6187 = vmatprep.subr.bf16.mxu1 %v6186_v16 }
0x2151   :  { %6189 = vmatpush3.bf16.msra.mxu1 %v6186_v16 }
0x2152   :  { %6058 = vmatprep.subr.bf16.mxu1 %v6525_v41 }
0x2154   :  { %6044 = vmatmul.mubr.msk.f32.vlgmr.msra.gmra.mrb[74].mxu1 %vm2701_vm11, %v4506_v39 }
0x2155   :  { %6062 = vmatprep.mubr.msk.bf16.mxu1 %vm6526_vm1, %v6525_v41  ;;  %6059 = vmatpush3.bf16.msra.mxu1 %v6394_v42 }
0x2156   :  { %6060 = vmatprep.subr.bf16.mxu1 %v6525_v41 }
0x2159   :  { %6061 = vmatpush3.bf16.msra.mxu1 %v6395_v43 }
0x2217   :  { %v4565_v2 = vpop.f32.mrb[76].mxu1 }
0x2218   :  { %v6017_v63 = vpop.f32.mrb[77].mxu1 }
0x2219   :  { %v4568_v5 = vpop.f32.mrb[78].mxu1 }
0x221a   :  { %v4576_v7 = vpack.c.bf16 %v4568_v5, %v4565_v2  ;;  %v6018_v9 = vpop.f32.mrb[79].mxu1 }
0x221b   :  { %v6399_v9 = vld [vmem:[%s7803_s0 + $0x170] sm:$0xff]  }
0x221c   :  { %6024 = vmatmul.mubr.msk.bf16.vlgmr.msra.gmra.mrb[72].mxu0 %vm1556_vm0, %v4576_v7  ;;  %v6398_v7 = vld [vmem:[%s7803_s0 + $0x168] sm:$0xff]  }
0x221d   :  { %6054 = vmatprep.mubr.msk.bf16.mxu0 %vm6526_vm1, %v6525_v41  ;;  %6047 = vmatpush3.bf16.msra.mxu0 %v6390_v32  ;;  %v5333_v32 = vld [vmem:[#allocation3 + $0xe0] ss:$0 sm:$0xff] }
0x221e   :  { %6048 = vmatprep.subr.bf16.mxu0 %v6525_v41 }
0x2221   :  { %6049 = vmatpush3.bf16.msra.mxu0 %v6391_v6 }
0x2222   :  { %6050 = vmatprep.subr.bf16.mxu0 %v6525_v41 }
0x2225   :  { %6051 = vmatpush3.bf16.msra.mxu0 %v6392_v50 }
0x2226   :  { %6052 = vmatprep.subr.bf16.mxu0 %v6525_v41 }
0x2227   :  { %v7711_v4 = vpop.f32.mrb[74].mxu1 }
0x2228   :  { %v7713_v46 = vpop.f32.mrb[75].mxu1 }
0x2229   :  { %6053 = vmatpush3.bf16.msra.mxu0 %v6393_v11 }
0x222a   :  { %6066 = vmatprep.subr.bf16.mxu0 %v6525_v41 }
0x22ef   :  { %v4631_v56 = vpop.f32.mrb[72].mxu0 }
0x22f0   :  { %v4632_v57 = vadd.f32 %v5321_v38, %v4631_v56  ;;  %v6025_v8 = vpop.f32.mrb[73].mxu0 }
0x22f1   :  { %v4634_v58 = vpop.f32.mrb[74].mxu0 }
0x22f2   :  { %v4635_v10 = vadd.f32 %v5321_v38, %v4634_v58  ;;  %v6026_v55 = vpop.f32.mrb[75].mxu0  ;;  %v4729_v33 = vadd.f32 %v4632_v57, %v7496_v30 }
0x22f4   :  { %v4730_v35 = vadd.f32 %v4635_v10, %v7499_v60 }
0x22f6   :  { %v6204_v47 = vpack.i.bf16 %v4730_v35, %v4729_v33  ;;  %v5342_v33 = vld [vmem:[#allocation3 + $0xe8] ss:$0 sm:$0xff] }
0x22f8   :  { %6205 = vrot.lane.b32.xlu1 %v6204_v47, %s6529_s27 }
0x236a   :  { %v6206_v3 = vpop.permute.xlu1 %6205 }
0x236b   :  { %v6208_v21 = vunpack.i.h.bf16 %v6206_v3  ;;  %v6207_v22 = vunpack.i.l.bf16 %v6206_v3 }
0x236d   :  { %v4740_v23 = vsel %vm1556_vm0, %v4728_v14, %v6208_v21  ;;  %v4739_v25 = vsel %vm1556_vm0, %v4727_v13, %v6207_v22 }
0x236e   :  { %v4749_v12 = vpack.c.bf16 %v4740_v23, %v4739_v25 }
0x2370   :  { %6055 = vmatmul.mubr.msk.bf16.vlgmr.msra.gmra.mrb[76].mxu0 %vm2701_vm11, %v4749_v12 }
0x2371   :  { %6074 = vmatprep.mubr.msk.bf16.mxu0 %vm6526_vm1, %v6525_v41  ;;  %6067 = vmatpush3.bf16.msra.mxu0 %v6396_v40 }
0x2372   :  { %6068 = vmatprep.subr.bf16.mxu0 %v6525_v41 }
0x2375   :  { %6069 = vmatpush3.bf16.msra.mxu0 %v6397_v44 }
0x2376   :  { %6070 = vmatprep.subr.bf16.mxu0 %v6525_v41 }
0x2379   :  { %6071 = vmatpush3.bf16.msra.mxu0 %v6398_v7 }
0x237a   :  { %6072 = vmatprep.subr.bf16.mxu0 %v6525_v41 }
0x237d   :  { %6073 = vmatpush3.bf16.msra.mxu0 %v6399_v9 }
0x2443   :  { %v4816_v20 = vpop.f32.mrb[76].mxu0 }
0x2444   :  { %v7743_v19 = vadd.f32 %v5327_v24, %v4816_v20  ;;  %v6056_v15 = vpop.f32.mrb[77].mxu0 }
0x2445   :  { %v4819_v30 = vpop.f32.mrb[78].mxu0 }
0x2446   :  { %v7745_v18 = vadd.f32 %v5327_v24, %v4819_v30  ;;  %v6057_v60 = vpop.f32.mrb[79].mxu0  ;;  %v4823_v26 = vsel %vm1556_vm0, %v7743_v19, 0.0 }
0x2447   :  { %4824 = vadd.xlane.f32.xlu0 %v4823_v26 }
0x2448   :  { %v4826_v27 = vsel %vm1556_vm0, %v7745_v18, 0.0 }
0x2449   :  { %4827 = vadd.xlane.f32.xlu1 %v4826_v27 }
0x24d4   :  { %v4825_v49 = vpop.xlane.xlu0 %4824 }
0x24d5   :  { %v4829_v51 = vmul.f32 0.03125, %v4825_v49 }
0x24d6   :  { %v4828_v29 = vpop.xlane.xlu1 %4827 }
0x24d7   :  { %v4831_v31 = vsub.f32 %v7743_v19, %v4829_v51  ;;  %v4830_v28 = vmul.f32 0.03125, %v4828_v29 }
0x24d9   :  { %v4832_v34 = vsub.f32 %v7745_v18, %v4830_v28  ;;  %v4833_v36 = vmul.f32 %v4831_v31, %v4831_v31 }
0x24db   :  { %v4835_v37 = vsel %vm1556_vm0, %v4833_v36, 0.0  ;;  %v4834_v62 = vmul.f32 %v4832_v34, %v4832_v34  ;;  %v5344_v36 = vld [vmem:[#allocation3 + $0x18] ss:$0 sm:$0xff] }
0x24dc   :  { %4836 = vadd.xlane.f32.xlu0 %v4835_v37 }
0x24dd   :  { %v4838_v39 = vsel %vm1556_vm0, %v4834_v62, 0.0 }
0x24e0   :  { %4839 = vadd.xlane.f32.xlu0 %v4838_v39 }
0x2569   :  { %v4837_v45 = vpop.xlane.xlu0 %4836 }
0x256a   :  { %v4841_v48 = vmul.f32 0.03125, %v4837_v45 }
0x256c   :  { %v4843_v61 = vadd.f32 1e-05, %v4841_v48 }
0x256d   :  { %v4840_v17 = vpop.xlane.xlu0 %4839 }
0x256e   :  { %v4842_v53 = vmul.f32 0.03125, %v4840_v17  ;;  %6484 = vrsqrt.f32 %v4843_v61 }
0x2570   :  { %v4844_v0 = vadd.f32 1e-05, %v4842_v53 }
0x2572   :  { %6486 = vrsqrt.f32 %v4844_v0 }
0x2578   :  { %v6485_v16 = vpop.eup %6484 }
0x2579   :  { %v4847_v2 = vmul.f32 %v6485_v16, %v4831_v31  ;;  %v5343_v31 = vld [vmem:[#allocation3 + $0x10] ss:$0 sm:$0xff] }
0x257c   :  { %v6487_v54 = vpop.eup %6486 }
0x257d   :  { %v4848_v63 = vmul.f32 %v6487_v54, %v4832_v34 }
0x257f   :  { %v4853_v5 = vpack.c.bf16 %v4848_v63, %v4847_v2 }
0x2581   :  { %6063 = vmatmul.mubr.msk.bf16.vlgmr.msra.gmra.mrb[80].mxu1 %vm1556_vm0, %v4853_v5 }
0x2654   :  { %v4908_v6 = vpop.f32.mrb[80].mxu1 }
0x2655   :  { %v4909_v50 = vadd.f32 %v5333_v32, %v4908_v6  ;;  %v6064_v11 = vpop.f32.mrb[81].mxu1 }
0x2656   :  { %v4911_v38 = vpop.f32.mrb[82].mxu1 }
0x2657   :  { %v4912_v56 = vadd.f32 %v5333_v32, %v4911_v38  ;;  %v6065_v57 = vpop.f32.mrb[83].mxu1  ;;  %v4915_v8 = vmax.f32 %v4909_v50, 0.0 }
0x2659   :  { %v4916_v58 = vmax.f32 %v4912_v56, 0.0 }
0x265b   :  { %v4925_v10 = vpack.c.bf16 %v4916_v58, %v4915_v8 }
0x265d   :  { %6075 = vmatmul.mubr.msk.bf16.vlgmr.msra.gmra.mrb[80].mxu0 %vm2701_vm11, %v4925_v10 }
0x2730   :  { %v4987_v55 = vpop.f32.mrb[80].mxu0 }
0x2731   :  { %v4994_v41 = vadd.f32 %v4987_v55, %v7743_v19  ;;  %v6076_v35 = vpop.f32.mrb[81].mxu0 }
0x2732   :  { %v4990_v47 = vpop.f32.mrb[82].mxu0 }
0x2733   :  { %v5001_v59 = vadd.f32 %v5342_v33, %v4994_v41  ;;  %v4995_v1 = vadd.f32 %v4990_v47, %v7745_v18  ;;  %v6077_v52 = vpop.f32.mrb[83].mxu0 }
0x2735   :  { %v5002_v3 = vadd.f32 %v5342_v33, %v4995_v1  ;;  %v5003_v13 = vsel %vm1556_vm0, %v5001_v59, 0.0 }
0x2736   :  { %5004 = vadd.xlane.f32.xlu0 %v5003_v13  ;;  %5060 = vst [vmem:[%s7808_s5 + $0x20] sm:$0xff] %v5003_v13 }
0x2737   :  { %v5006_v14 = vsel %vm1556_vm0, %v5002_v3, 0.0 }
0x2738   :  { %5007 = vadd.xlane.f32.xlu1 %v5006_v14  ;;  %5061 = vst [vmem:[%s7808_s5 + $0x28] sm:$0xff] %v5006_v14 }
0x27c3   :  { %v5005_v21 = vpop.xlane.xlu0 %5004 }
0x27c4   :  { %v5009_v22 = vmul.f32 0.03125, %v5005_v21 }
0x27c5   :  { %v5008_v23 = vpop.xlane.xlu1 %5007 }
0x27c6   :  { %v5011_v25 = vsub.f32 %v5001_v59, %v5009_v22  ;;  %v5010_v12 = vmul.f32 0.03125, %v5008_v23 }
0x27c8   :  { %v5012_v24 = vsub.f32 %v5002_v3, %v5010_v12  ;;  %v5013_v20 = vmul.f32 %v5011_v25, %v5011_v25 }
0x27ca   :  { %v5015_v19 = vsel %vm1556_vm0, %v5013_v20, 0.0  ;;  %v5014_v15 = vmul.f32 %v5012_v24, %v5012_v24 }
0x27cb   :  { %5016 = vadd.xlane.f32.xlu0 %v5015_v19 }
0x27cc   :  { %v5018_v30 = vsel %vm1556_vm0, %v5014_v15, 0.0 }
0x27cd   :  { %5019 = vadd.xlane.f32.xlu1 %v5018_v30 }
0x27de   :  { %5047 = vrot.lane.b32.xlu1 %v7711_v4, %s6529_s27 }
0x27e1   :  { %5045 = vrot.lane.b32.xlu0 %v7713_v46, %s6529_s27 }
0x2858   :  { %v5017_v18 = vpop.xlane.xlu0 %5016 }
0x2859   :  { %v5021_v60 = vmul.f32 0.03125, %v5017_v18 }
0x285a   :  { %v5020_v26 = vpop.xlane.xlu1 %5019 }
0x285b   :  { %v5023_v27 = vadd.f32 1e-05, %v5021_v60  ;;  %v5022_v49 = vmul.f32 0.03125, %v5020_v26 }
0x285c   :  { %v5046_v42 = vpop.permute.xlu0 %5045 }
0x285d   :  { %6488 = vrsqrt.f32 %v5023_v27  ;;  %v5024_v51 = vadd.f32 1e-05, %v5022_v49 }
0x285e   :  { %v5048_v44 = vpop.permute.xlu1 %5047 }
0x285f   :  { %6490 = vrsqrt.f32 %v5024_v51 }
0x2867   :  { %v6489_v29 = vpop.eup %6488 }
0x2868   :  { %v5027_v28 = vmul.f32 %v6489_v29, %v5011_v25 }
0x2869   :  { %v6491_v34 = vpop.eup %6490 }
0x286a   :  { %v5034_v37 = vmul.f32 %v5343_v31, %v5027_v28  ;;  %v5028_v62 = vmul.f32 %v6491_v34, %v5012_v24 }
0x286c   :  { %v5041_v39 = vadd.f32 %v5344_v36, %v5034_v37  ;;  %v5035_v4 = vmul.f32 %v5343_v31, %v5028_v62 }
0x286e   :  { %v5051_v46 = vsel %vm1556_vm0, %v5041_v39, %v5046_v42  ;;  %v5042_v43 = vadd.f32 %v5344_v36, %v5035_v4 }
0x286f   :  { %v5054_v40 = vsel %vm5053_vm12, %v5051_v46, 0.0 }
0x2870   :  { %5056 = vst [vmem:[%s7808_s5] sm:$0xff] %v5054_v40  ;;  %v5052_v45 = vsel %vm1556_vm0, %v5042_v43, %v5048_v44 }
0x2871   :  { %v5055_v48 = vsel %vm5053_vm12, %v5052_v45, 0.0 }
0x2872   :  { %5057 = vst [vmem:[%s7808_s5 + $0x8] sm:$0xff] %v5055_v48 }
0x2873   :  { %5066 = vsyncpa [#allocation4], 1 }

</bundles_post_ra>
